<compile_context>
chip_gen: v5e
topology: v5e:2x2
jax: 0.10.0
libtpu: 0.0.40
codegen_flags: <defaults>
</compile_context>

<pallas_src>
import functools

import jax
import jax.numpy as jnp
import numpy as np
from jax.experimental import pallas as pl
from jax.experimental.pallas import tpu as pltpu


def _round_up(x, m):
    return ((x + m - 1) // m) * m


# ----------------------------------------------------------------------------
# Fused kernel: entire TopoObsNet forward for one bm-row batch tile.
# ----------------------------------------------------------------------------
def _topo_obs_kernel(front_meta, back_meta, rc, compute_dtype, *refs):
    """front_meta: tuple of (input_idx, n_layers)      row-domain chains (batch on sublanes)
       back_meta:  tuple of (chain_idx, row0, rows, n_layers)
                                                        transposed-domain branches (batch on lanes)
    """
    n_inputs = max(m[0] for m in front_meta) + 1

    pos = 0
    in_refs = refs[pos:pos + n_inputs]; pos += n_inputs
    front_refs = []
    for (_, n_layers) in front_meta:
        front_refs.append(refs[pos:pos + 2 * n_layers]); pos += 2 * n_layers
    back_refs = []
    for (_, _, _, n_layers) in back_meta:
        back_refs.append(refs[pos:pos + 2 * n_layers + 2]); pos += 2 * n_layers + 2
    wf_ref, bf_ref, out_ref = refs[pos], refs[pos + 1], refs[pos + 2]

    bm = in_refs[0].shape[0]
    wf = wf_ref[...]                              # (n_branches, 1) f32
    bf = bf_ref[...]                              # (1, 1) f32

    # Static unroll over rc-row chunks: bounds vreg pressure at large bm while the
    # big grid tile amortizes per-grid-step overhead and input DMA setup.
    for c in range(bm // rc):
        r0 = c * rc

        # ---- row-domain layers: relu(h @ W + b); the BN affine is pre-folded
        # ---- into the next layer's (W, b), so the epilogue is bias + ReLU only.
        hTs = []
        for ci, (in_idx, n_layers) in enumerate(front_meta):
            z = in_refs[in_idx][r0:r0 + rc, :].astype(jnp.float32)
            h = z.astype(compute_dtype)
            for l in range(n_layers):             # unrolled at trace time
                w = front_refs[ci][2 * l][...]    # (din, dout)  bf16 (MXU operand)
                b = front_refs[ci][2 * l + 1][...]  # (1, dout)  f32
                z = jnp.dot(h, w, preferred_element_type=jnp.float32)
                z = jnp.maximum(z + b, 0.0)
                h = z.astype(compute_dtype)
            # One (8,128)-aligned XLU transpose per chain: the batch moves from
            # sublanes to lanes, making every downstream op / store lane-dense.
            hTs.append(z.T)                       # (dout, rc) f32

        # ---- transposed-domain tail layers + classify heads (lane-dense).
        probs = []
        for bi, (chain_idx, row0, rows, n_layers) in enumerate(back_meta):
            hT = hTs[chain_idx][row0:row0 + rows, :]          # (rows, rc) f32
            for l in range(n_layers):
                wt = back_refs[bi][2 * l][...]                # (dout, din) bf16
                bcol = back_refs[bi][2 * l + 1][...]          # (dout, 1)   f32
                zt = jnp.dot(wt, hT.astype(compute_dtype),
                             preferred_element_type=jnp.float32)
                hT = jnp.maximum(zt + bcol, 0.0)
            wc_col = back_refs[bi][2 * n_layers][...]         # (dlast, 1) f32
            bc = back_refs[bi][2 * n_layers + 1][...]         # (1, 1)     f32
            # Head as VPU multiply + sublane reduce: no N=1 MXU dot in the tail.
            logit = jnp.sum(hT * wc_col, axis=0, keepdims=True) + bc   # (1, rc)
            probs.append(jax.nn.sigmoid(logit))

        # ---- final 2->1 classifier: pure VPU math, still lane-dense.
        acc = bf
        for bi in range(len(probs)):
            acc = acc + probs[bi] * wf[bi:bi + 1, :]
        out_ref[:, r0:r0 + rc] = jax.nn.sigmoid(acc).astype(out_ref.dtype)


# ----------------------------------------------------------------------------
# Host-side parameter preparation (exact BN folding + layer "plan").
# ----------------------------------------------------------------------------
def _fold_bn_into_next(branch):
    """Exact eval-mode BatchNorm folding.

    Each block computes relu(h @ W + b) * s + t followed by the next Linear
    (W', b').  The affine sits between the ReLU and the next matmul, so it folds
    exactly into the NEXT layer for any sign of gamma:
        W' <- diag(s) @ W'      b' <- b' + t @ W'
    (the last hidden layer's affine folds into the classify head the same way).
    """
    folded, carry = [], None
    for (W, b, s, t) in branch["layers"]:
        if carry is not None:
            s_p, t_p = carry
            b = b + t_p @ W                      # uses the un-scaled W
            W = s_p.reshape(-1, 1) * W
        folded.append((W, b))
        carry = (s, t)
    wc, bc = branch["classify"]
    if carry is not None:
        s_p, t_p = carry
        bc = bc + t_p @ wc
        wc = s_p.reshape(-1, 1) * wc
    return folded, (wc, bc)


def _split_point(wb, lane=128):
    """Deepest layer whose output width is a multiple of `lane`, so the
    batch->lane transpose right after it is (8,128)-aligned."""
    k = None
    for i, (W, _) in enumerate(wb):
        if W.shape[1] % lane == 0:
            k = i + 1
    assert k is not None, (
        "TopoObsNet Pallas kernel expects at least one hidden width per branch "
        "that is a multiple of 128 (true for the reference configuration).")
    return k


def _build_plan(params, *, pair_branches, compute_dtype):
    topo_wb, topo_head = _fold_bn_into_next(params["topo"])
    obs_wb, obs_head = _fold_bn_into_next(params["obs"])

    front_arrays, back_arrays = [], []
    front_meta, back_meta = [], []

    if pair_branches:
        # Block-diagonal pairing: the first len(obs) layers of both branches run
        # as one 256-wide matmul chain so the 2x256x256 MXU (v6e/v7x) is filled.
        n_shared = len(obs_wb)
        chain = []
        for l in range(n_shared):
            Wt, bt = topo_wb[l]
            Wo, bo = obs_wb[l]
            dt_in, dt_out = Wt.shape
            do_in, do_out = Wo.shape
            dout = dt_out + do_out
            # Pad the LAST shared layer's output to a multiple of 128 so the
            # transpose that follows it is lane-aligned (zero cols cost no MXU passes).
            dout_pad = _round_up(dout, 128) if l == n_shared - 1 else dout
            W = jnp.zeros((dt_in + do_in, dout_pad), jnp.float32)
            W = W.at[:dt_in, :dt_out].set(Wt)
            W = W.at[dt_in:, dt_out:dt_out + do_out].set(Wo)
            b = jnp.zeros((1, dout_pad), jnp.float32)
            b = b.at[:, :dt_out].set(bt)
            b = b.at[:, dt_out:dt_out + do_out].set(bo)
            chain += [W.astype(compute_dtype), b]
        front_arrays.append(chain)
        front_meta.append((0, n_shared))

        topo_cols = topo_wb[n_shared - 1][0].shape[1]
        obs_cols = obs_wb[n_shared - 1][0].shape[1]

        tail = []
        for (W, b) in topo_wb[n_shared:]:                      # topo-only layers (transposed)
            tail += [W.T.astype(compute_dtype), b.reshape(-1, 1)]
        tail += [topo_head[0], topo_head[1]]
        back_arrays.append(tail)
        back_meta.append((0, 0, topo_cols, len(topo_wb) - n_shared))

        back_arrays.append([obs_head[0], obs_head[1]])         # obs: head only
        back_meta.append((0, topo_cols, obs_cols, 0))
    else:
        # Two independent chains (v5e and older: 128x128 MXU, pairing wastes MACs).
        for idx, (wb, head) in enumerate(((topo_wb, topo_head), (obs_wb, obs_head))):
            k = _split_point(wb)
            chain = []
            for (W, b) in wb[:k]:
                chain += [W.astype(compute_dtype), b]
            front_arrays.append(chain)
            front_meta.append((idx, k))
            tail = []
            for (W, b) in wb[k:]:
                tail += [W.T.astype(compute_dtype), b.reshape(-1, 1)]
            tail += [head[0], head[1]]
            back_arrays.append(tail)
            back_meta.append((idx, 0, wb[k - 1][0].shape[1], len(wb) - k))

    wf, bf = params["final"]
    return front_arrays, back_arrays, tuple(front_meta), tuple(back_meta), wf, bf


# ----------------------------------------------------------------------------
# Wrapper: one pallas_call over batch tiles.
# ----------------------------------------------------------------------------
def _mxu_is_256_wide():
    """Block-diagonal branch pairing only pays off on 256-wide MXUs (v6e / v7x)."""
    try:
        kind = jax.devices()[0].device_kind.lower()
    except Exception:
        return True
    return not any(tag in kind for tag in ("v2", "v3", "v4", "v5"))


def _choose_bm(n, bm_max, rc):
    """Big tiles amortize the ~0.35us per-grid-step overhead; for small batches
    cap the tile so the grid keeps >= 2 steps (both v7x TensorCores get work)."""
    bm_max = max(rc, (bm_max // rc) * rc)
    if pl.cdiv(n, bm_max) >= 2:
        return bm_max
    return min(bm_max, max(rc, pl.cdiv(pl.cdiv(n, 2), rc) * rc))


def topo_obs_net_pallas(x, obs, params, *, bm=512, rc=128,
                        compute_dtype=jnp.bfloat16, pair_branches=None):
    n = x.shape[0]
    assert obs.shape[0] == n
    assert rc % 128 == 0

    if pair_branches is None:
        pair_branches = _mxu_is_256_wide()
    pair_branches = pair_branches and (
        len(params["obs"]["layers"]) <= len(params["topo"]["layers"]))

    bm = _choose_bm(n, bm, rc)
    n_pad = pl.cdiv(n, bm) * bm
    grid = n_pad // bm

    # Inputs may be f32 or bf16 (bf16 halves the dominant input DMA); they are
    # cast to the MXU dtype inside the kernel -- no standalone wrapper-side cast.
    if pair_branches:
        inputs = [jnp.concatenate([x, obs], axis=1)]   # one contiguous (n, 56) stream
    else:
        inputs = [x, obs]
    if n_pad != n:
        inputs = [jnp.pad(a, ((0, n_pad - n), (0, 0))) for a in inputs]

    front_arrays, back_arrays, front_meta, back_meta, wf, bf = _build_plan(
        params, pair_branches=pair_branches, compute_dtype=compute_dtype)

    in_arrays = list(inputs)
    in_specs = [pl.BlockSpec((bm, a.shape[1]), lambda i: (i, 0)) for a in inputs]
    consts = ([a for chain in front_arrays for a in chain]
              + [a for tail in back_arrays for a in tail]
              + [wf, bf])
    for a in consts:
        in_arrays.append(a)
        in_specs.append(pl.BlockSpec(a.shape, lambda i: (0, 0)))   # VMEM-resident

    # VMEM sanity check (double-buffered params + streamed tiles + chunk scratch).
    const_bytes = sum(int(a.size) * a.dtype.itemsize for a in consts)
    tile_bytes = sum(2 * bm * a.shape[1] * a.dtype.itemsize for a in inputs) + 2 * bm * 4
    assert 2 * const_bytes + tile_bytes + 8 * rc * 256 * 4 < 24 * 1024 * 1024, \
        "VMEM estimate too large; lower bm"

    kernel = functools.partial(_topo_obs_kernel, front_meta, back_meta, rc, compute_dtype)

    out = pl.pallas_call(
        kernel,
        out_shape=jax.ShapeDtypeStruct((1, n_pad), jnp.float32),   # lane-dense output slab
        grid=(grid,),
        in_specs=in_specs,
        out_specs=pl.BlockSpec((1, bm), lambda i: (0, i)),
        compiler_params=pltpu.CompilerParams(
            dimension_semantics=("parallel",),                     # megacore / 2-TC sharding
            vmem_limit_bytes=32 * 1024 * 1024),
    )(*in_arrays)
    return out.reshape(n_pad, 1)[:n]


# ----------------------------------------------------------------------------
# Parameter construction (mimics PyTorch shapes; eval-mode BN with non-trivial
# running stats so the BN-folding math is actually exercised by the test).
# ----------------------------------------------------------------------------
def _init_linear(key, din, dout):
    kw, kb = jax.random.split(key)
    bound = 1.0 / np.sqrt(din)
    w = jax.random.uniform(kw, (din, dout), jnp.float32, -bound, bound)
    b = jax.random.uniform(kb, (1, dout), jnp.float32, -bound, bound)
    return w, b


def _init_bn(key, dout, eps=1e-5):
    kg, kb, km, kv = jax.random.split(key, 4)
    gamma = 1.0 + 0.1 * jax.random.normal(kg, (1, dout), jnp.float32)
    beta = 0.05 * jax.random.normal(kb, (1, dout), jnp.float32)
    mean = 0.05 * jax.random.normal(km, (1, dout), jnp.float32)
    var = jax.random.uniform(kv, (1, dout), jnp.float32, 0.8, 1.25)
    scale = gamma / jnp.sqrt(var + eps)
    shift = beta - mean * scale
    return scale, shift


def init_fcn_net(key, layers, indim):
    dims = [indim] + list(layers)
    keys = jax.random.split(key, 2 * len(layers) + 1)
    p = {"layers": [], "classify": None}
    for i in range(len(layers)):
        w, b = _init_linear(keys[2 * i], dims[i], dims[i + 1])
        s, t = _init_bn(keys[2 * i + 1], dims[i + 1])
        p["layers"].append((w, b, s, t))
    p["classify"] = _init_linear(keys[-1], dims[-1], 1)
    return p


def init_topo_obs_net(key, topo_layers=(128, 128, 128, 64, 16), topo_indim=50,
                      obs_layers=(128, 128, 16), obs_indim=6):
    k1, k2, k3 = jax.random.split(key, 3)
    return {"topo": init_fcn_net(k1, topo_layers, topo_indim),
            "obs": init_fcn_net(k2, obs_layers, obs_indim),
            "final": _init_linear(k3, 2, 1)}


# ----------------------------------------------------------------------------
# Pure-JAX f32 reference (mirrors the PyTorch forward: Linear -> ReLU -> eval BN).
# ----------------------------------------------------------------------------
def fcn_net_ref(x, p):
    h = x
    for (w, b, s, t) in p["layers"]:
        h = jnp.maximum(h @ w + b, 0.0) * s + t
    wc, bc = p["classify"]
    return jax.nn.sigmoid(h @ wc + bc)


def topo_obs_net_ref(x, obs, params):
    topo_out = fcn_net_ref(x, params["topo"])
    obs_out = fcn_net_ref(obs, params["obs"])
    cat = jnp.concatenate([topo_out.reshape(-1, 1), obs_out.reshape(-1, 1)], axis=1)
    wf, bf = params["final"]
    return jax.nn.sigmoid(cat @ wf + bf)


# ----------------------------------------------------------------------------
if __name__ == "__main__":
    key = jax.random.PRNGKey(0)
    kp, kx, ko = jax.random.split(key, 3)

    N = 500                       # not a multiple of the tile -> exercises padding; auto tile=256 -> grid=(2,)
    TOPO_INDIM, OBS_INDIM = 50, 6

    params = init_topo_obs_net(kp, topo_indim=TOPO_INDIM, obs_indim=OBS_INDIM)
    x = jax.random.normal(kx, (N, TOPO_INDIM), jnp.float32)
    obs = jax.random.normal(ko, (N, OBS_INDIM), jnp.float32)

    ref = jax.block_until_ready(topo_obs_net_ref(x, obs, params))

    # Exercise both code paths: unpaired (v5e and older) and block-diagonal paired (v6e/v7x).
    for paired in (False, True):
        out = jax.block_until_ready(
            topo_obs_net_pallas(x, obs, params, pair_branches=paired))
        assert out.shape == (N, 1), out.shape
        # bf16 MXU operands with f32 accumulation/epilogue vs. pure-f32 reference.
        np.testing.assert_allclose(np.asarray(out), np.asarray(ref), rtol=2e-2, atol=2e-2)

    print("KERNEL_OK")
</pallas_src>

<mosaic_0001>
module attributes {stable_mosaic.version = 11 : i64} {
  func.func @_topo_obs_kernel(%arg0: i32, %arg1: memref<256x50xf32, #tpu.memory_space<vmem>>, %arg2: memref<256x6xf32, #tpu.memory_space<vmem>>, %arg3: memref<50x128xbf16, #tpu.memory_space<vmem>>, %arg4: memref<1x128xf32, #tpu.memory_space<vmem>>, %arg5: memref<128x128xbf16, #tpu.memory_space<vmem>>, %arg6: memref<1x128xf32, #tpu.memory_space<vmem>>, %arg7: memref<128x128xbf16, #tpu.memory_space<vmem>>, %arg8: memref<1x128xf32, #tpu.memory_space<vmem>>, %arg9: memref<6x128xbf16, #tpu.memory_space<vmem>>, %arg10: memref<1x128xf32, #tpu.memory_space<vmem>>, %arg11: memref<128x128xbf16, #tpu.memory_space<vmem>>, %arg12: memref<1x128xf32, #tpu.memory_space<vmem>>, %arg13: memref<64x128xbf16, #tpu.memory_space<vmem>>, %arg14: memref<64x1xf32, #tpu.memory_space<vmem>>, %arg15: memref<16x64xbf16, #tpu.memory_space<vmem>>, %arg16: memref<16x1xf32, #tpu.memory_space<vmem>>, %arg17: memref<16x1xf32, #tpu.memory_space<vmem>>, %arg18: memref<1x1xf32, #tpu.memory_space<vmem>>, %arg19: memref<16x128xbf16, #tpu.memory_space<vmem>>, %arg20: memref<16x1xf32, #tpu.memory_space<vmem>>, %arg21: memref<16x1xf32, #tpu.memory_space<vmem>>, %arg22: memref<1x1xf32, #tpu.memory_space<vmem>>, %arg23: memref<2x1xf32, #tpu.memory_space<vmem>>, %arg24: memref<1x1xf32, #tpu.memory_space<vmem>>, %arg25: memref<1x256xf32, #tpu.memory_space<vmem>>) attributes {dimension_semantics = [#tpu.dimension_semantics<parallel>], iteration_bounds = array<i64: 2>, scalar_prefetch = 0 : i64, scratch_operands = 0 : i64, tpu.core_type = #tpu.core_type<tc>, window_params = [{transform_indices = @transform_0, window_bounds = array<i64: 256, 50>}, {transform_indices = @transform_1, window_bounds = array<i64: 256, 6>}, {pipeline_mode = #tpu.pipeline_mode<synchronous>, transform_indices = @transform_2, window_bounds = array<i64: 50, 128>}, {pipeline_mode = #tpu.pipeline_mode<synchronous>, transform_indices = @transform_3, window_bounds = array<i64: 1, 128>}, {pipeline_mode = #tpu.pipeline_mode<synchronous>, transform_indices = @transform_4, window_bounds = array<i64: 128, 128>}, {pipeline_mode = #tpu.pipeline_mode<synchronous>, transform_indices = @transform_5, window_bounds = array<i64: 1, 128>}, {pipeline_mode = #tpu.pipeline_mode<synchronous>, transform_indices = @transform_6, window_bounds = array<i64: 128, 128>}, {pipeline_mode = #tpu.pipeline_mode<synchronous>, transform_indices = @transform_7, window_bounds = array<i64: 1, 128>}, {pipeline_mode = #tpu.pipeline_mode<synchronous>, transform_indices = @transform_8, window_bounds = array<i64: 6, 128>}, {pipeline_mode = #tpu.pipeline_mode<synchronous>, transform_indices = @transform_9, window_bounds = array<i64: 1, 128>}, {pipeline_mode = #tpu.pipeline_mode<synchronous>, transform_indices = @transform_10, window_bounds = array<i64: 128, 128>}, {pipeline_mode = #tpu.pipeline_mode<synchronous>, transform_indices = @transform_11, window_bounds = array<i64: 1, 128>}, {pipeline_mode = #tpu.pipeline_mode<synchronous>, transform_indices = @transform_12, window_bounds = array<i64: 64, 128>}, {pipeline_mode = #tpu.pipeline_mode<synchronous>, transform_indices = @transform_13, window_bounds = array<i64: 64, 1>}, {pipeline_mode = #tpu.pipeline_mode<synchronous>, transform_indices = @transform_14, window_bounds = array<i64: 16, 64>}, {pipeline_mode = #tpu.pipeline_mode<synchronous>, transform_indices = @transform_15, window_bounds = array<i64: 16, 1>}, {pipeline_mode = #tpu.pipeline_mode<synchronous>, transform_indices = @transform_16, window_bounds = array<i64: 16, 1>}, {pipeline_mode = #tpu.pipeline_mode<synchronous>, transform_indices = @transform_17, window_bounds = array<i64: 1, 1>}, {pipeline_mode = #tpu.pipeline_mode<synchronous>, transform_indices = @transform_18, window_bounds = array<i64: 16, 128>}, {pipeline_mode = #tpu.pipeline_mode<synchronous>, transform_indices = @transform_19, window_bounds = array<i64: 16, 1>}, {pipeline_mode = #tpu.pipeline_mode<synchronous>, transform_indices = @transform_20, window_bounds = array<i64: 16, 1>}, {pipeline_mode = #tpu.pipeline_mode<synchronous>, transform_indices = @transform_21, window_bounds = array<i64: 1, 1>}, {pipeline_mode = #tpu.pipeline_mode<synchronous>, transform_indices = @transform_22, window_bounds = array<i64: 2, 1>}, {pipeline_mode = #tpu.pipeline_mode<synchronous>, transform_indices = @transform_23, window_bounds = array<i64: 1, 1>}, {transform_indices = @transform_24, window_bounds = array<i64: 1, 256>}]} {
    %c0 = arith.constant 0 : index
    %c0_0 = arith.constant 0 : index
    %0 = vector.load %arg23[%c0, %c0_0] : memref<2x1xf32, #tpu.memory_space<vmem>>, vector<2x1xf32>
    %c0_1 = arith.constant 0 : index
    %c0_2 = arith.constant 0 : index
    %1 = vector.load %arg24[%c0_1, %c0_2] : memref<1x1xf32, #tpu.memory_space<vmem>>, vector<1x1xf32>
    %c0_3 = arith.constant 0 : index
    %c0_4 = arith.constant 0 : index
    %2 = vector.load %arg1[%c0_3, %c0_4] : memref<256x50xf32, #tpu.memory_space<vmem>>, vector<128x50xf32>
    %3 = arith.truncf %2 : vector<128x50xf32> to vector<128x50xbf16>
    %c0_5 = arith.constant 0 : index
    %c0_6 = arith.constant 0 : index
    %4 = vector.load %arg3[%c0_5, %c0_6] : memref<50x128xbf16, #tpu.memory_space<vmem>>, vector<50x128xbf16>
    %c0_7 = arith.constant 0 : index
    %c0_8 = arith.constant 0 : index
    %5 = vector.load %arg4[%c0_7, %c0_8] : memref<1x128xf32, #tpu.memory_space<vmem>>, vector<1x128xf32>
    %cst = arith.constant dense<0.000000e+00> : vector<128x128xf32>
    %6 = tpu.matmul %3, %4, %cst {dimension_numbers = #tpu.dot_dimension_numbers<[1], [0], [0], [1], [0, 0, 1, 1], [], []>} : vector<128x50xbf16>, vector<50x128xbf16>, vector<128x128xf32> -> vector<128x128xf32>
    %7 = vector.broadcast %5 : vector<1x128xf32> to vector<128x128xf32>
    %8 = arith.addf %6, %7 : vector<128x128xf32>
    %cst_9 = arith.constant 0.000000e+00 : f32
    %9 = vector.broadcast %cst_9 : f32 to vector<128x128xf32>
    %10 = arith.maximumf %8, %9 : vector<128x128xf32>
    %11 = arith.truncf %10 : vector<128x128xf32> to vector<128x128xbf16>
    %c0_10 = arith.constant 0 : index
    %c0_11 = arith.constant 0 : index
    %12 = vector.load %arg5[%c0_10, %c0_11] : memref<128x128xbf16, #tpu.memory_space<vmem>>, vector<128x128xbf16>
    %c0_12 = arith.constant 0 : index
    %c0_13 = arith.constant 0 : index
    %13 = vector.load %arg6[%c0_12, %c0_13] : memref<1x128xf32, #tpu.memory_space<vmem>>, vector<1x128xf32>
    %cst_14 = arith.constant dense<0.000000e+00> : vector<128x128xf32>
    %14 = tpu.matmul %11, %12, %cst_14 {dimension_numbers = #tpu.dot_dimension_numbers<[1], [0], [0], [1], [0, 0, 1, 1], [], []>} : vector<128x128xbf16>, vector<128x128xbf16>, vector<128x128xf32> -> vector<128x128xf32>
    %15 = vector.broadcast %13 : vector<1x128xf32> to vector<128x128xf32>
    %16 = arith.addf %14, %15 : vector<128x128xf32>
    %cst_15 = arith.constant 0.000000e+00 : f32
    %17 = vector.broadcast %cst_15 : f32 to vector<128x128xf32>
    %18 = arith.maximumf %16, %17 : vector<128x128xf32>
    %19 = arith.truncf %18 : vector<128x128xf32> to vector<128x128xbf16>
    %c0_16 = arith.constant 0 : index
    %c0_17 = arith.constant 0 : index
    %20 = vector.load %arg7[%c0_16, %c0_17] : memref<128x128xbf16, #tpu.memory_space<vmem>>, vector<128x128xbf16>
    %c0_18 = arith.constant 0 : index
    %c0_19 = arith.constant 0 : index
    %21 = vector.load %arg8[%c0_18, %c0_19] : memref<1x128xf32, #tpu.memory_space<vmem>>, vector<1x128xf32>
    %cst_20 = arith.constant dense<0.000000e+00> : vector<128x128xf32>
    %22 = tpu.matmul %19, %20, %cst_20 {dimension_numbers = #tpu.dot_dimension_numbers<[1], [0], [0], [1], [0, 0, 1, 1], [], []>} : vector<128x128xbf16>, vector<128x128xbf16>, vector<128x128xf32> -> vector<128x128xf32>
    %23 = vector.broadcast %21 : vector<1x128xf32> to vector<128x128xf32>
    %24 = arith.addf %22, %23 : vector<128x128xf32>
    %cst_21 = arith.constant 0.000000e+00 : f32
    %25 = vector.broadcast %cst_21 : f32 to vector<128x128xf32>
    %26 = arith.maximumf %24, %25 : vector<128x128xf32>
    %27 = tpu.transpose %26, [1, 0] : vector<128x128xf32> -> vector<128x128xf32>
    %c0_22 = arith.constant 0 : index
    %c0_23 = arith.constant 0 : index
    %28 = vector.load %arg2[%c0_22, %c0_23] : memref<256x6xf32, #tpu.memory_space<vmem>>, vector<128x6xf32>
    %29 = arith.truncf %28 : vector<128x6xf32> to vector<128x6xbf16>
    %c0_24 = arith.constant 0 : index
    %c0_25 = arith.constant 0 : index
    %30 = vector.load %arg9[%c0_24, %c0_25] : memref<6x128xbf16, #tpu.memory_space<vmem>>, vector<6x128xbf16>
    %c0_26 = arith.constant 0 : index
    %c0_27 = arith.constant 0 : index
    %31 = vector.load %arg10[%c0_26, %c0_27] : memref<1x128xf32, #tpu.memory_space<vmem>>, vector<1x128xf32>
    %cst_28 = arith.constant dense<0.000000e+00> : vector<128x128xf32>
    %32 = tpu.matmul %29, %30, %cst_28 {dimension_numbers = #tpu.dot_dimension_numbers<[1], [0], [0], [1], [0, 0, 1, 1], [], []>} : vector<128x6xbf16>, vector<6x128xbf16>, vector<128x128xf32> -> vector<128x128xf32>
    %33 = vector.broadcast %31 : vector<1x128xf32> to vector<128x128xf32>
    %34 = arith.addf %32, %33 : vector<128x128xf32>
    %cst_29 = arith.constant 0.000000e+00 : f32
    %35 = vector.broadcast %cst_29 : f32 to vector<128x128xf32>
    %36 = arith.maximumf %34, %35 : vector<128x128xf32>
    %37 = arith.truncf %36 : vector<128x128xf32> to vector<128x128xbf16>
    %c0_30 = arith.constant 0 : index
    %c0_31 = arith.constant 0 : index
    %38 = vector.load %arg11[%c0_30, %c0_31] : memref<128x128xbf16, #tpu.memory_space<vmem>>, vector<128x128xbf16>
    %c0_32 = arith.constant 0 : index
    %c0_33 = arith.constant 0 : index
    %39 = vector.load %arg12[%c0_32, %c0_33] : memref<1x128xf32, #tpu.memory_space<vmem>>, vector<1x128xf32>
    %cst_34 = arith.constant dense<0.000000e+00> : vector<128x128xf32>
    %40 = tpu.matmul %37, %38, %cst_34 {dimension_numbers = #tpu.dot_dimension_numbers<[1], [0], [0], [1], [0, 0, 1, 1], [], []>} : vector<128x128xbf16>, vector<128x128xbf16>, vector<128x128xf32> -> vector<128x128xf32>
    %41 = vector.broadcast %39 : vector<1x128xf32> to vector<128x128xf32>
    %42 = arith.addf %40, %41 : vector<128x128xf32>
    %cst_35 = arith.constant 0.000000e+00 : f32
    %43 = vector.broadcast %cst_35 : f32 to vector<128x128xf32>
    %44 = arith.maximumf %42, %43 : vector<128x128xf32>
    %45 = tpu.transpose %44, [1, 0] : vector<128x128xf32> -> vector<128x128xf32>
    %c0_36 = arith.constant 0 : index
    %c0_37 = arith.constant 0 : index
    %46 = vector.load %arg13[%c0_36, %c0_37] : memref<64x128xbf16, #tpu.memory_space<vmem>>, vector<64x128xbf16>
    %c0_38 = arith.constant 0 : index
    %c0_39 = arith.constant 0 : index
    %47 = vector.load %arg14[%c0_38, %c0_39] : memref<64x1xf32, #tpu.memory_space<vmem>>, vector<64x1xf32>
    %48 = arith.truncf %27 : vector<128x128xf32> to vector<128x128xbf16>
    %cst_40 = arith.constant dense<0.000000e+00> : vector<64x128xf32>
    %49 = tpu.matmul %46, %48, %cst_40 {dimension_numbers = #tpu.dot_dimension_numbers<[1], [0], [0], [1], [0, 0, 1, 1], [], []>} : vector<64x128xbf16>, vector<128x128xbf16>, vector<64x128xf32> -> vector<64x128xf32>
    %50 = vector.broadcast %47 : vector<64x1xf32> to vector<64x128xf32>
    %51 = arith.addf %49, %50 : vector<64x128xf32>
    %cst_41 = arith.constant 0.000000e+00 : f32
    %52 = vector.broadcast %cst_41 : f32 to vector<64x128xf32>
    %53 = arith.maximumf %51, %52 : vector<64x128xf32>
    %c0_42 = arith.constant 0 : index
    %c0_43 = arith.constant 0 : index
    %54 = vector.load %arg15[%c0_42, %c0_43] : memref<16x64xbf16, #tpu.memory_space<vmem>>, vector<16x64xbf16>
    %c0_44 = arith.constant 0 : index
    %c0_45 = arith.constant 0 : index
    %55 = vector.load %arg16[%c0_44, %c0_45] : memref<16x1xf32, #tpu.memory_space<vmem>>, vector<16x1xf32>
    %56 = arith.truncf %53 : vector<64x128xf32> to vector<64x128xbf16>
    %cst_46 = arith.constant dense<0.000000e+00> : vector<16x128xf32>
    %57 = tpu.matmul %54, %56, %cst_46 {dimension_numbers = #tpu.dot_dimension_numbers<[1], [0], [0], [1], [0, 0, 1, 1], [], []>} : vector<16x64xbf16>, vector<64x128xbf16>, vector<16x128xf32> -> vector<16x128xf32>
    %58 = vector.broadcast %55 : vector<16x1xf32> to vector<16x128xf32>
    %59 = arith.addf %57, %58 : vector<16x128xf32>
    %cst_47 = arith.constant 0.000000e+00 : f32
    %60 = vector.broadcast %cst_47 : f32 to vector<16x128xf32>
    %61 = arith.maximumf %59, %60 : vector<16x128xf32>
    %c0_48 = arith.constant 0 : index
    %c0_49 = arith.constant 0 : index
    %62 = vector.load %arg17[%c0_48, %c0_49] : memref<16x1xf32, #tpu.memory_space<vmem>>, vector<16x1xf32>
    %c0_50 = arith.constant 0 : index
    %c0_51 = arith.constant 0 : index
    %63 = vector.load %arg18[%c0_50, %c0_51] : memref<1x1xf32, #tpu.memory_space<vmem>>, vector<1x1xf32>
    %64 = vector.broadcast %62 : vector<16x1xf32> to vector<16x128xf32>
    %65 = arith.mulf %61, %64 : vector<16x128xf32>
    %cst_52 = arith.constant dense<0.000000e+00> : vector<128xf32>
    %66 = vector.multi_reduction <add>, %65, %cst_52 [0] : vector<16x128xf32> to vector<128xf32>
    %67 = vector.shape_cast %66 : vector<128xf32> to vector<1x128xf32>
    %68 = vector.broadcast %63 : vector<1x1xf32> to vector<1x128xf32>
    %69 = arith.addf %67, %68 : vector<1x128xf32>
    %70 = arith.negf %69 : vector<1x128xf32>
    %71 = math.exp %70 : vector<1x128xf32>
    %cst_53 = arith.constant 1.000000e+00 : f32
    %72 = vector.broadcast %cst_53 : f32 to vector<1x128xf32>
    %73 = arith.addf %72, %71 : vector<1x128xf32>
    %74 = arith.divf %72, %73 : vector<1x128xf32>
    %c0_54 = arith.constant 0 : index
    %c0_55 = arith.constant 0 : index
    %75 = vector.load %arg19[%c0_54, %c0_55] : memref<16x128xbf16, #tpu.memory_space<vmem>>, vector<16x128xbf16>
    %c0_56 = arith.constant 0 : index
    %c0_57 = arith.constant 0 : index
    %76 = vector.load %arg20[%c0_56, %c0_57] : memref<16x1xf32, #tpu.memory_space<vmem>>, vector<16x1xf32>
    %77 = arith.truncf %45 : vector<128x128xf32> to vector<128x128xbf16>
    %cst_58 = arith.constant dense<0.000000e+00> : vector<16x128xf32>
    %78 = tpu.matmul %75, %77, %cst_58 {dimension_numbers = #tpu.dot_dimension_numbers<[1], [0], [0], [1], [0, 0, 1, 1], [], []>} : vector<16x128xbf16>, vector<128x128xbf16>, vector<16x128xf32> -> vector<16x128xf32>
    %79 = vector.broadcast %76 : vector<16x1xf32> to vector<16x128xf32>
    %80 = arith.addf %78, %79 : vector<16x128xf32>
    %cst_59 = arith.constant 0.000000e+00 : f32
    %81 = vector.broadcast %cst_59 : f32 to vector<16x128xf32>
    %82 = arith.maximumf %80, %81 : vector<16x128xf32>
    %c0_60 = arith.constant 0 : index
    %c0_61 = arith.constant 0 : index
    %83 = vector.load %arg21[%c0_60, %c0_61] : memref<16x1xf32, #tpu.memory_space<vmem>>, vector<16x1xf32>
    %c0_62 = arith.constant 0 : index
    %c0_63 = arith.constant 0 : index
    %84 = vector.load %arg22[%c0_62, %c0_63] : memref<1x1xf32, #tpu.memory_space<vmem>>, vector<1x1xf32>
    %85 = vector.broadcast %83 : vector<16x1xf32> to vector<16x128xf32>
    %86 = arith.mulf %82, %85 : vector<16x128xf32>
    %cst_64 = arith.constant dense<0.000000e+00> : vector<128xf32>
    %87 = vector.multi_reduction <add>, %86, %cst_64 [0] : vector<16x128xf32> to vector<128xf32>
    %88 = vector.shape_cast %87 : vector<128xf32> to vector<1x128xf32>
    %89 = vector.broadcast %84 : vector<1x1xf32> to vector<1x128xf32>
    %90 = arith.addf %88, %89 : vector<1x128xf32>
    %91 = arith.negf %90 : vector<1x128xf32>
    %92 = math.exp %91 : vector<1x128xf32>
    %cst_65 = arith.constant 1.000000e+00 : f32
    %93 = vector.broadcast %cst_65 : f32 to vector<1x128xf32>
    %94 = arith.addf %93, %92 : vector<1x128xf32>
    %95 = arith.divf %93, %94 : vector<1x128xf32>
    %96 = vector.extract_strided_slice %0 {offsets = [0, 0], sizes = [1, 1], strides = [1, 1]} : vector<2x1xf32> to vector<1x1xf32>
    %97 = vector.broadcast %96 : vector<1x1xf32> to vector<1x128xf32>
    %98 = arith.mulf %74, %97 : vector<1x128xf32>
    %99 = vector.broadcast %1 : vector<1x1xf32> to vector<1x128xf32>
    %100 = arith.addf %99, %98 : vector<1x128xf32>
    %101 = vector.extract_strided_slice %0 {offsets = [1, 0], sizes = [1, 1], strides = [1, 1]} : vector<2x1xf32> to vector<1x1xf32>
    %102 = vector.broadcast %101 : vector<1x1xf32> to vector<1x128xf32>
    %103 = arith.mulf %95, %102 : vector<1x128xf32>
    %104 = arith.addf %100, %103 : vector<1x128xf32>
    %105 = arith.negf %104 : vector<1x128xf32>
    %106 = math.exp %105 : vector<1x128xf32>
    %cst_66 = arith.constant 1.000000e+00 : f32
    %107 = vector.broadcast %cst_66 : f32 to vector<1x128xf32>
    %108 = arith.addf %107, %106 : vector<1x128xf32>
    %109 = arith.divf %107, %108 : vector<1x128xf32>
    %c0_67 = arith.constant 0 : index
    %c0_68 = arith.constant 0 : index
    %110 = vector.load %arg25[%c0_67, %c0_68] : memref<1x256xf32, #tpu.memory_space<vmem>>, vector<1x128xf32>
    tpu.vector_store %arg25[%c0_67, %c0_68], %109 {strides = array<i32>} : memref<1x256xf32, #tpu.memory_space<vmem>>, vector<1x128xf32>,
    %c128 = arith.constant 128 : index
    %c0_69 = arith.constant 0 : index
    %111 = vector.load %arg1[%c128, %c0_69] : memref<256x50xf32, #tpu.memory_space<vmem>>, vector<128x50xf32>
    %112 = arith.truncf %111 : vector<128x50xf32> to vector<128x50xbf16>
    %c0_70 = arith.constant 0 : index
    %c0_71 = arith.constant 0 : index
    %113 = vector.load %arg3[%c0_70, %c0_71] : memref<50x128xbf16, #tpu.memory_space<vmem>>, vector<50x128xbf16>
    %c0_72 = arith.constant 0 : index
    %c0_73 = arith.constant 0 : index
    %114 = vector.load %arg4[%c0_72, %c0_73] : memref<1x128xf32, #tpu.memory_space<vmem>>, vector<1x128xf32>
    %cst_74 = arith.constant dense<0.000000e+00> : vector<128x128xf32>
    %115 = tpu.matmul %112, %113, %cst_74 {dimension_numbers = #tpu.dot_dimension_numbers<[1], [0], [0], [1], [0, 0, 1, 1], [], []>} : vector<128x50xbf16>, vector<50x128xbf16>, vector<128x128xf32> -> vector<128x128xf32>
    %116 = vector.broadcast %114 : vector<1x128xf32> to vector<128x128xf32>
    %117 = arith.addf %115, %116 : vector<128x128xf32>
    %cst_75 = arith.constant 0.000000e+00 : f32
    %118 = vector.broadcast %cst_75 : f32 to vector<128x128xf32>
    %119 = arith.maximumf %117, %118 : vector<128x128xf32>
    %120 = arith.truncf %119 : vector<128x128xf32> to vector<128x128xbf16>
    %c0_76 = arith.constant 0 : index
    %c0_77 = arith.constant 0 : index
    %121 = vector.load %arg5[%c0_76, %c0_77] : memref<128x128xbf16, #tpu.memory_space<vmem>>, vector<128x128xbf16>
    %c0_78 = arith.constant 0 : index
    %c0_79 = arith.constant 0 : index
    %122 = vector.load %arg6[%c0_78, %c0_79] : memref<1x128xf32, #tpu.memory_space<vmem>>, vector<1x128xf32>
    %cst_80 = arith.constant dense<0.000000e+00> : vector<128x128xf32>
    %123 = tpu.matmul %120, %121, %cst_80 {dimension_numbers = #tpu.dot_dimension_numbers<[1], [0], [0], [1], [0, 0, 1, 1], [], []>} : vector<128x128xbf16>, vector<128x128xbf16>, vector<128x128xf32> -> vector<128x128xf32>
    %124 = vector.broadcast %122 : vector<1x128xf32> to vector<128x128xf32>
    %125 = arith.addf %123, %124 : vector<128x128xf32>
    %cst_81 = arith.constant 0.000000e+00 : f32
    %126 = vector.broadcast %cst_81 : f32 to vector<128x128xf32>
    %127 = arith.maximumf %125, %126 : vector<128x128xf32>
    %128 = arith.truncf %127 : vector<128x128xf32> to vector<128x128xbf16>
    %c0_82 = arith.constant 0 : index
    %c0_83 = arith.constant 0 : index
    %129 = vector.load %arg7[%c0_82, %c0_83] : memref<128x128xbf16, #tpu.memory_space<vmem>>, vector<128x128xbf16>
    %c0_84 = arith.constant 0 : index
    %c0_85 = arith.constant 0 : index
    %130 = vector.load %arg8[%c0_84, %c0_85] : memref<1x128xf32, #tpu.memory_space<vmem>>, vector<1x128xf32>
    %cst_86 = arith.constant dense<0.000000e+00> : vector<128x128xf32>
    %131 = tpu.matmul %128, %129, %cst_86 {dimension_numbers = #tpu.dot_dimension_numbers<[1], [0], [0], [1], [0, 0, 1, 1], [], []>} : vector<128x128xbf16>, vector<128x128xbf16>, vector<128x128xf32> -> vector<128x128xf32>
    %132 = vector.broadcast %130 : vector<1x128xf32> to vector<128x128xf32>
    %133 = arith.addf %131, %132 : vector<128x128xf32>
    %cst_87 = arith.constant 0.000000e+00 : f32
    %134 = vector.broadcast %cst_87 : f32 to vector<128x128xf32>
    %135 = arith.maximumf %133, %134 : vector<128x128xf32>
    %136 = tpu.transpose %135, [1, 0] : vector<128x128xf32> -> vector<128x128xf32>
    %c128_88 = arith.constant 128 : index
    %c0_89 = arith.constant 0 : index
    %137 = vector.load %arg2[%c128_88, %c0_89] : memref<256x6xf32, #tpu.memory_space<vmem>>, vector<128x6xf32>
    %138 = arith.truncf %137 : vector<128x6xf32> to vector<128x6xbf16>
    %c0_90 = arith.constant 0 : index
    %c0_91 = arith.constant 0 : index
    %139 = vector.load %arg9[%c0_90, %c0_91] : memref<6x128xbf16, #tpu.memory_space<vmem>>, vector<6x128xbf16>
    %c0_92 = arith.constant 0 : index
    %c0_93 = arith.constant 0 : index
    %140 = vector.load %arg10[%c0_92, %c0_93] : memref<1x128xf32, #tpu.memory_space<vmem>>, vector<1x128xf32>
    %cst_94 = arith.constant dense<0.000000e+00> : vector<128x128xf32>
    %141 = tpu.matmul %138, %139, %cst_94 {dimension_numbers = #tpu.dot_dimension_numbers<[1], [0], [0], [1], [0, 0, 1, 1], [], []>} : vector<128x6xbf16>, vector<6x128xbf16>, vector<128x128xf32> -> vector<128x128xf32>
    %142 = vector.broadcast %140 : vector<1x128xf32> to vector<128x128xf32>
    %143 = arith.addf %141, %142 : vector<128x128xf32>
    %cst_95 = arith.constant 0.000000e+00 : f32
    %144 = vector.broadcast %cst_95 : f32 to vector<128x128xf32>
    %145 = arith.maximumf %143, %144 : vector<128x128xf32>
    %146 = arith.truncf %145 : vector<128x128xf32> to vector<128x128xbf16>
    %c0_96 = arith.constant 0 : index
    %c0_97 = arith.constant 0 : index
    %147 = vector.load %arg11[%c0_96, %c0_97] : memref<128x128xbf16, #tpu.memory_space<vmem>>, vector<128x128xbf16>
    %c0_98 = arith.constant 0 : index
    %c0_99 = arith.constant 0 : index
    %148 = vector.load %arg12[%c0_98, %c0_99] : memref<1x128xf32, #tpu.memory_space<vmem>>, vector<1x128xf32>
    %cst_100 = arith.constant dense<0.000000e+00> : vector<128x128xf32>
    %149 = tpu.matmul %146, %147, %cst_100 {dimension_numbers = #tpu.dot_dimension_numbers<[1], [0], [0], [1], [0, 0, 1, 1], [], []>} : vector<128x128xbf16>, vector<128x128xbf16>, vector<128x128xf32> -> vector<128x128xf32>
    %150 = vector.broadcast %148 : vector<1x128xf32> to vector<128x128xf32>
    %151 = arith.addf %149, %150 : vector<128x128xf32>
    %cst_101 = arith.constant 0.000000e+00 : f32
    %152 = vector.broadcast %cst_101 : f32 to vector<128x128xf32>
    %153 = arith.maximumf %151, %152 : vector<128x128xf32>
    %154 = tpu.transpose %153, [1, 0] : vector<128x128xf32> -> vector<128x128xf32>
    %c0_102 = arith.constant 0 : index
    %c0_103 = arith.constant 0 : index
    %155 = vector.load %arg13[%c0_102, %c0_103] : memref<64x128xbf16, #tpu.memory_space<vmem>>, vector<64x128xbf16>
    %c0_104 = arith.constant 0 : index
    %c0_105 = arith.constant 0 : index
    %156 = vector.load %arg14[%c0_104, %c0_105] : memref<64x1xf32, #tpu.memory_space<vmem>>, vector<64x1xf32>
    %157 = arith.truncf %136 : vector<128x128xf32> to vector<128x128xbf16>
    %cst_106 = arith.constant dense<0.000000e+00> : vector<64x128xf32>
    %158 = tpu.matmul %155, %157, %cst_106 {dimension_numbers = #tpu.dot_dimension_numbers<[1], [0], [0], [1], [0, 0, 1, 1], [], []>} : vector<64x128xbf16>, vector<128x128xbf16>, vector<64x128xf32> -> vector<64x128xf32>
    %159 = vector.broadcast %156 : vector<64x1xf32> to vector<64x128xf32>
    %160 = arith.addf %158, %159 : vector<64x128xf32>
    %cst_107 = arith.constant 0.000000e+00 : f32
    %161 = vector.broadcast %cst_107 : f32 to vector<64x128xf32>
    %162 = arith.maximumf %160, %161 : vector<64x128xf32>
    %c0_108 = arith.constant 0 : index
    %c0_109 = arith.constant 0 : index
    %163 = vector.load %arg15[%c0_108, %c0_109] : memref<16x64xbf16, #tpu.memory_space<vmem>>, vector<16x64xbf16>
    %c0_110 = arith.constant 0 : index
    %c0_111 = arith.constant 0 : index
    %164 = vector.load %arg16[%c0_110, %c0_111] : memref<16x1xf32, #tpu.memory_space<vmem>>, vector<16x1xf32>
    %165 = arith.truncf %162 : vector<64x128xf32> to vector<64x128xbf16>
    %cst_112 = arith.constant dense<0.000000e+00> : vector<16x128xf32>
    %166 = tpu.matmul %163, %165, %cst_112 {dimension_numbers = #tpu.dot_dimension_numbers<[1], [0], [0], [1], [0, 0, 1, 1], [], []>} : vector<16x64xbf16>, vector<64x128xbf16>, vector<16x128xf32> -> vector<16x128xf32>
    %167 = vector.broadcast %164 : vector<16x1xf32> to vector<16x128xf32>
    %168 = arith.addf %166, %167 : vector<16x128xf32>
    %cst_113 = arith.constant 0.000000e+00 : f32
    %169 = vector.broadcast %cst_113 : f32 to vector<16x128xf32>
    %170 = arith.maximumf %168, %169 : vector<16x128xf32>
    %c0_114 = arith.constant 0 : index
    %c0_115 = arith.constant 0 : index
    %171 = vector.load %arg17[%c0_114, %c0_115] : memref<16x1xf32, #tpu.memory_space<vmem>>, vector<16x1xf32>
    %c0_116 = arith.constant 0 : index
    %c0_117 = arith.constant 0 : index
    %172 = vector.load %arg18[%c0_116, %c0_117] : memref<1x1xf32, #tpu.memory_space<vmem>>, vector<1x1xf32>
    %173 = vector.broadcast %171 : vector<16x1xf32> to vector<16x128xf32>
    %174 = arith.mulf %170, %173 : vector<16x128xf32>
    %cst_118 = arith.constant dense<0.000000e+00> : vector<128xf32>
    %175 = vector.multi_reduction <add>, %174, %cst_118 [0] : vector<16x128xf32> to vector<128xf32>
    %176 = vector.shape_cast %175 : vector<128xf32> to vector<1x128xf32>
    %177 = vector.broadcast %172 : vector<1x1xf32> to vector<1x128xf32>
    %178 = arith.addf %176, %177 : vector<1x128xf32>
    %179 = arith.negf %178 : vector<1x128xf32>
    %180 = math.exp %179 : vector<1x128xf32>
    %cst_119 = arith.constant 1.000000e+00 : f32
    %181 = vector.broadcast %cst_119 : f32 to vector<1x128xf32>
    %182 = arith.addf %181, %180 : vector<1x128xf32>
    %183 = arith.divf %181, %182 : vector<1x128xf32>
    %c0_120 = arith.constant 0 : index
    %c0_121 = arith.constant 0 : index
    %184 = vector.load %arg19[%c0_120, %c0_121] : memref<16x128xbf16, #tpu.memory_space<vmem>>, vector<16x128xbf16>
    %c0_122 = arith.constant 0 : index
    %c0_123 = arith.constant 0 : index
    %185 = vector.load %arg20[%c0_122, %c0_123] : memref<16x1xf32, #tpu.memory_space<vmem>>, vector<16x1xf32>
    %186 = arith.truncf %154 : vector<128x128xf32> to vector<128x128xbf16>
    %cst_124 = arith.constant dense<0.000000e+00> : vector<16x128xf32>
    %187 = tpu.matmul %184, %186, %cst_124 {dimension_numbers = #tpu.dot_dimension_numbers<[1], [0], [0], [1], [0, 0, 1, 1], [], []>} : vector<16x128xbf16>, vector<128x128xbf16>, vector<16x128xf32> -> vector<16x128xf32>
    %188 = vector.broadcast %185 : vector<16x1xf32> to vector<16x128xf32>
    %189 = arith.addf %187, %188 : vector<16x128xf32>
    %cst_125 = arith.constant 0.000000e+00 : f32
    %190 = vector.broadcast %cst_125 : f32 to vector<16x128xf32>
    %191 = arith.maximumf %189, %190 : vector<16x128xf32>
    %c0_126 = arith.constant 0 : index
    %c0_127 = arith.constant 0 : index
    %192 = vector.load %arg21[%c0_126, %c0_127] : memref<16x1xf32, #tpu.memory_space<vmem>>, vector<16x1xf32>
    %c0_128 = arith.constant 0 : index
    %c0_129 = arith.constant 0 : index
    %193 = vector.load %arg22[%c0_128, %c0_129] : memref<1x1xf32, #tpu.memory_space<vmem>>, vector<1x1xf32>
    %194 = vector.broadcast %192 : vector<16x1xf32> to vector<16x128xf32>
    %195 = arith.mulf %191, %194 : vector<16x128xf32>
    %cst_130 = arith.constant dense<0.000000e+00> : vector<128xf32>
    %196 = vector.multi_reduction <add>, %195, %cst_130 [0] : vector<16x128xf32> to vector<128xf32>
    %197 = vector.shape_cast %196 : vector<128xf32> to vector<1x128xf32>
    %198 = vector.broadcast %193 : vector<1x1xf32> to vector<1x128xf32>
    %199 = arith.addf %197, %198 : vector<1x128xf32>
    %200 = arith.negf %199 : vector<1x128xf32>
    %201 = math.exp %200 : vector<1x128xf32>
    %cst_131 = arith.constant 1.000000e+00 : f32
    %202 = vector.broadcast %cst_131 : f32 to vector<1x128xf32>
    %203 = arith.addf %202, %201 : vector<1x128xf32>
    %204 = arith.divf %202, %203 : vector<1x128xf32>
    %205 = vector.extract_strided_slice %0 {offsets = [0, 0], sizes = [1, 1], strides = [1, 1]} : vector<2x1xf32> to vector<1x1xf32>
    %206 = vector.broadcast %205 : vector<1x1xf32> to vector<1x128xf32>
    %207 = arith.mulf %183, %206 : vector<1x128xf32>
    %208 = vector.broadcast %1 : vector<1x1xf32> to vector<1x128xf32>
    %209 = arith.addf %208, %207 : vector<1x128xf32>
    %210 = vector.extract_strided_slice %0 {offsets = [1, 0], sizes = [1, 1], strides = [1, 1]} : vector<2x1xf32> to vector<1x1xf32>
    %211 = vector.broadcast %210 : vector<1x1xf32> to vector<1x128xf32>
    %212 = arith.mulf %204, %211 : vector<1x128xf32>
    %213 = arith.addf %209, %212 : vector<1x128xf32>
    %214 = arith.negf %213 : vector<1x128xf32>
    %215 = math.exp %214 : vector<1x128xf32>
    %cst_132 = arith.constant 1.000000e+00 : f32
    %216 = vector.broadcast %cst_132 : f32 to vector<1x128xf32>
    %217 = arith.addf %216, %215 : vector<1x128xf32>
    %218 = arith.divf %216, %217 : vector<1x128xf32>
    %c0_133 = arith.constant 0 : index
    %c128_134 = arith.constant 128 : index
    %219 = vector.load %arg25[%c0_133, %c128_134] : memref<1x256xf32, #tpu.memory_space<vmem>>, vector<1x128xf32>
    tpu.vector_store %arg25[%c0_133, %c128_134], %218 {strides = array<i32>} : memref<1x256xf32, #tpu.memory_space<vmem>>, vector<1x128xf32>,
    return
  }
  func.func @transform_0(%arg0: i32) -> (i32, i32) {
    %c0_i32 = arith.constant 0 : i32
    %c0_i32_0 = arith.constant 0 : i32
    return %arg0, %c0_i32 : i32, i32
  }
  func.func @transform_1(%arg0: i32) -> (i32, i32) {
    %c0_i32 = arith.constant 0 : i32
    %c0_i32_0 = arith.constant 0 : i32
    return %arg0, %c0_i32 : i32, i32
  }
  func.func @transform_2(%arg0: i32) -> (i32, i32) {
    %c0_i32 = arith.constant 0 : i32
    %c0_i32_0 = arith.constant 0 : i32
    %c0_i32_1 = arith.constant 0 : i32
    return %c0_i32, %c0_i32_0 : i32, i32
  }
  func.func @transform_3(%arg0: i32) -> (i32, i32) {
    %c0_i32 = arith.constant 0 : i32
    %c0_i32_0 = arith.constant 0 : i32
    %c0_i32_1 = arith.constant 0 : i32
    return %c0_i32, %c0_i32_0 : i32, i32
  }
  func.func @transform_4(%arg0: i32) -> (i32, i32) {
    %c0_i32 = arith.constant 0 : i32
    %c0_i32_0 = arith.constant 0 : i32
    %c0_i32_1 = arith.constant 0 : i32
    return %c0_i32, %c0_i32_0 : i32, i32
  }
  func.func @transform_5(%arg0: i32) -> (i32, i32) {
    %c0_i32 = arith.constant 0 : i32
    %c0_i32_0 = arith.constant 0 : i32
    %c0_i32_1 = arith.constant 0 : i32
    return %c0_i32, %c0_i32_0 : i32, i32
  }
  func.func @transform_6(%arg0: i32) -> (i32, i32) {
    %c0_i32 = arith.constant 0 : i32
    %c0_i32_0 = arith.constant 0 : i32
    %c0_i32_1 = arith.constant 0 : i32
    return %c0_i32, %c0_i32_0 : i32, i32
  }
  func.func @transform_7(%arg0: i32) -> (i32, i32) {
    %c0_i32 = arith.constant 0 : i32
    %c0_i32_0 = arith.constant 0 : i32
    %c0_i32_1 = arith.constant 0 : i32
    return %c0_i32, %c0_i32_0 : i32, i32
  }
  func.func @transform_8(%arg0: i32) -> (i32, i32) {
    %c0_i32 = arith.constant 0 : i32
    %c0_i32_0 = arith.constant 0 : i32
    %c0_i32_1 = arith.constant 0 : i32
    return %c0_i32, %c0_i32_0 : i32, i32
  }
  func.func @transform_9(%arg0: i32) -> (i32, i32) {
    %c0_i32 = arith.constant 0 : i32
    %c0_i32_0 = arith.constant 0 : i32
    %c0_i32_1 = arith.constant 0 : i32
    return %c0_i32, %c0_i32_0 : i32, i32
  }
  func.func @transform_10(%arg0: i32) -> (i32, i32) {
    %c0_i32 = arith.constant 0 : i32
    %c0_i32_0 = arith.constant 0 : i32
    %c0_i32_1 = arith.constant 0 : i32
    return %c0_i32, %c0_i32_0 : i32, i32
  }
  func.func @transform_11(%arg0: i32) -> (i32, i32) {
    %c0_i32 = arith.constant 0 : i32
    %c0_i32_0 = arith.constant 0 : i32
    %c0_i32_1 = arith.constant 0 : i32
    return %c0_i32, %c0_i32_0 : i32, i32
  }
  func.func @transform_12(%arg0: i32) -> (i32, i32) {
    %c0_i32 = arith.constant 0 : i32
    %c0_i32_0 = arith.constant 0 : i32
    %c0_i32_1 = arith.constant 0 : i32
    return %c0_i32, %c0_i32_0 : i32, i32
  }
  func.func @transform_13(%arg0: i32) -> (i32, i32) {
    %c0_i32 = arith.constant 0 : i32
    %c0_i32_0 = arith.constant 0 : i32
    %c0_i32_1 = arith.constant 0 : i32
    return %c0_i32, %c0_i32_0 : i32, i32
  }
  func.func @transform_14(%arg0: i32) -> (i32, i32) {
    %c0_i32 = arith.constant 0 : i32
    %c0_i32_0 = arith.constant 0 : i32
    %c0_i32_1 = arith.constant 0 : i32
    return %c0_i32, %c0_i32_0 : i32, i32
  }
  func.func @transform_15(%arg0: i32) -> (i32, i32) {
    %c0_i32 = arith.constant 0 : i32
    %c0_i32_0 = arith.constant 0 : i32
    %c0_i32_1 = arith.constant 0 : i32
    return %c0_i32, %c0_i32_0 : i32, i32
  }
  func.func @transform_16(%arg0: i32) -> (i32, i32) {
    %c0_i32 = arith.constant 0 : i32
    %c0_i32_0 = arith.constant 0 : i32
    %c0_i32_1 = arith.constant 0 : i32
    return %c0_i32, %c0_i32_0 : i32, i32
  }
  func.func @transform_17(%arg0: i32) -> (i32, i32) {
    %c0_i32 = arith.constant 0 : i32
    %c0_i32_0 = arith.constant 0 : i32
    %c0_i32_1 = arith.constant 0 : i32
    return %c0_i32, %c0_i32_0 : i32, i32
  }
  func.func @transform_18(%arg0: i32) -> (i32, i32) {
    %c0_i32 = arith.constant 0 : i32
    %c0_i32_0 = arith.constant 0 : i32
    %c0_i32_1 = arith.constant 0 : i32
    return %c0_i32, %c0_i32_0 : i32, i32
  }
  func.func @transform_19(%arg0: i32) -> (i32, i32) {
    %c0_i32 = arith.constant 0 : i32
    %c0_i32_0 = arith.constant 0 : i32
    %c0_i32_1 = arith.constant 0 : i32
    return %c0_i32, %c0_i32_0 : i32, i32
  }
  func.func @transform_20(%arg0: i32) -> (i32, i32) {
    %c0_i32 = arith.constant 0 : i32
    %c0_i32_0 = arith.constant 0 : i32
    %c0_i32_1 = arith.constant 0 : i32
    return %c0_i32, %c0_i32_0 : i32, i32
  }
  func.func @transform_21(%arg0: i32) -> (i32, i32) {
    %c0_i32 = arith.constant 0 : i32
    %c0_i32_0 = arith.constant 0 : i32
    %c0_i32_1 = arith.constant 0 : i32
    return %c0_i32, %c0_i32_0 : i32, i32
  }
  func.func @transform_22(%arg0: i32) -> (i32, i32) {
    %c0_i32 = arith.constant 0 : i32
    %c0_i32_0 = arith.constant 0 : i32
    %c0_i32_1 = arith.constant 0 : i32
    return %c0_i32, %c0_i32_0 : i32, i32
  }
  func.func @transform_23(%arg0: i32) -> (i32, i32) {
    %c0_i32 = arith.constant 0 : i32
    %c0_i32_0 = arith.constant 0 : i32
    %c0_i32_1 = arith.constant 0 : i32
    return %c0_i32, %c0_i32_0 : i32, i32
  }
  func.func @transform_24(%arg0: i32) -> (i32, i32) {
    %c0_i32 = arith.constant 0 : i32
    %c0_i32_0 = arith.constant 0 : i32
    return %c0_i32, %arg0 : i32, i32
  }
}

</mosaic_0001>

<bundles_post_ra>
// kernel: tpu_custom_call.1
= control target key start
LH: loop header
LB: loop body
LE: loop exit
PB: predicated region body
PF: predicated region fallthrough
CT: control target
= control target key end

     0   :  { %s4570_s0 = inlined_call_operand.vmem [shape: f32[512,50], index: 0, kind: input, shape index: {}]   ;;  %s4571_s1 = inlined_call_operand.vmem [shape: f32[512,6], index: 1, kind: input, shape index: {}]   ;;  %s4572_s2 = inlined_call_operand.vmem [shape: bf16[50,128], index: 2, kind: input, shape index: {}]   ;;  %s4573_s3 = inlined_call_operand.vmem [shape: f32[1,128], index: 3, kind: input, shape index: {}]   ;;  %s4574_s4 = inlined_call_operand.vmem [shape: bf16[128,128], index: 4, kind: input, shape index: {}]   ;;  %s4575_s5 = inlined_call_operand.vmem [shape: f32[1,128], index: 5, kind: input, shape index: {}]   ;;  %s4576_s6 = inlined_call_operand.vmem [shape: bf16[128,128], index: 6, kind: input, shape index: {}]   ;;  %s4577_s7 = inlined_call_operand.vmem [shape: f32[1,128], index: 7, kind: input, shape index: {}]   ;;  %s4578_s8 = inlined_call_operand.vmem [shape: bf16[6,128], index: 8, kind: input, shape index: {}]   ;;  %s4579_s9 = inlined_call_operand.vmem [shape: f32[1,128], index: 9, kind: input, shape index: {}]   ;;  %s4580_s10 = inlined_call_operand.vmem [shape: bf16[128,128], index: 10, kind: input, shape index: {}]   ;;  %s4581_s11 = inlined_call_operand.vmem [shape: f32[1,128], index: 11, kind: input, shape index: {}]   ;;  %s4582_s12 = inlined_call_operand.vmem [shape: bf16[64,128], index: 12, kind: input, shape index: {}]   ;;  %s4583_s13 = inlined_call_operand.vmem [shape: f32[64,1], index: 13, kind: input, shape index: {}]   ;;  %s4584_s14 = inlined_call_operand.vmem [shape: bf16[16,64], index: 14, kind: input, shape index: {}]   ;;  %s4585_s15 = inlined_call_operand.vmem [shape: f32[16,1], index: 15, kind: input, shape index: {}]   ;;  %s4586_s16 = inlined_call_operand.vmem [shape: f32[16,1], index: 16, kind: input, shape index: {}]   ;;  %s4587_s17 = inlined_call_operand.<no memory space> [shape: f32[1,1], index: 17, kind: input, shape index: {}]   ;;  %s4588_s18 = inlined_call_operand.vmem [shape: bf16[16,128], index: 18, kind: input, shape index: {}]   ;;  %s4589_s19 = inlined_call_operand.vmem [shape: f32[16,1], index: 19, kind: input, shape index: {}]   ;;  %s4590_s20 = inlined_call_operand.vmem [shape: f32[16,1], index: 20, kind: input, shape index: {}]   ;;  %s4591_s22 = inlined_call_operand.vmem [shape: f32[2,1], index: 22, kind: input, shape index: {}]   ;;  %s4592_s24 = inlined_call_operand.hbm [shape: f32[1,512], index: 24, kind: output, shape index: {}]   ;;  %s4593_s21 = inlined_call_operand.<no memory space> [shape: f32[1,1], index: 21, kind: input, shape index: {}]   ;;  %s4594_s23 = inlined_call_operand.<no memory space> [shape: f32[1,1], index: 23, kind: input, shape index: {}]  }
   0x1   :  { %4610 = sst [smem:[#allocation13_spill]] %s4570_s0  ;;  %v29_v0 = vstv %s4587_s17  ;;  %v31_v1 = vstv %s4593_s21  ;;  %v33_v2 = vstv %s4594_s23 }
   0x2   :  { %4611 = sst [smem:[#allocation14_spill]] %s4571_s1  ;;  %30 = vst [vmem:[#allocation2] sm:$0x1] %v29_v0 }
   0x3   :  { %4612 = sst [smem:[#allocation15_spill]] %s4572_s2  ;;  %32 = vst [vmem:[#allocation3] sm:$0x1] %v31_v1 }
   0x4   :  { %4613 = sst [smem:[#allocation16_spill]] %s4573_s3  ;;  %34 = vst [vmem:[#allocation4] sm:$0x1] %v33_v2 }
   0x5   :  { %4614 = sst [smem:[#allocation17_spill]] %s4574_s4 }
   0x6   :  { %4615 = sst [smem:[#allocation18_spill]] %s4575_s5 }
   0x7   :  { %4616 = sst [smem:[#allocation19_spill]] %s4576_s6 }
   0x8   :  { %4617 = sst [smem:[#allocation20_spill]] %s4577_s7 }
   0x9   :  { %4618 = sst [smem:[#allocation21_spill]] %s4578_s8 }
   0xa   :  { %4619 = sst [smem:[#allocation22_spill]] %s4579_s9 }
   0xb   :  { %4620 = sst [smem:[#allocation23_spill]] %s4591_s22 }
   0xc   :  { %35 = vsyncpa [#allocation6], 0 }
   0xd   :  { %37 = vsyncpa [#allocation6 + $0x1], 0  ;;  %s3724_s29 = smov 0   ;;  %s3726_s0 = smov 0  }
   0xe   :  { %s3728_s7 = smov 0   ;;  %s3730_s17 = smov 0  }
   0xf LB: > { %4621 = sst [smem:[#allocation8_spill]] %s3575_s29  ;;  %s3745_s21 = sadd.s32 4294967295, %s3587_s17   ;;  %s3587_s17 = sphi %s3730_s17, %s4643_s17   ;;  %s3583_s7 = sphi %s3728_s7, %s4645_s7   ;;  %s3579_s0 = sphi %s3726_s0, %s4647_s0   ;;  %s3575_s29 = sphi %s3724_s29, %s4646_s29  }
  0x10   : > { %4622 = sst [smem:[#allocation9_spill]] %s3583_s7  ;;  %s3057_s23 = sadd.s32 4294967294, %s3587_s17  }
  0x11   : > { %s3749_s30 = sadd.s32 1, %s3587_s17   ;;  %s564_s3 = sadd.s32 1, %s3583_s7 }
  0x12   : > { %4623 = sst [smem:[#allocation10_spill]] %s3749_s30  ;;  %s561_s25 = ssub.s32 %s3587_s17, %s3749_s30 }
  0x13   : > { %p574_p0 = scmp.ne.s32.totalorder %s3583_s7, %s3579_s0  ;;  %p562_p1 = scmp.eq.s32.totalorder %s561_s25, 0 }
  0x14   : > { %p575_p2 = scmp.eq.s32.totalorder %s3745_s21, 1  ;;  %p580_p3 = scmp.ne.s32.totalorder %s3579_s0, %s3575_s29 }
  0x15   : > { %p581_p4 = scmp.eq.s32.totalorder %s3057_s23, 1  ;;  %p3060_p7 = scmp.ge.s32.totalorder %s3587_s17, 1 }
  0x16   : > { %s3760_s8 = scalar_select %p562_p1, %s3583_s7, %s564_s3  }
  0x17   : > { %p3762_p5 = por %p575_p2, %p574_p0  ;;  %p3766_p6 = por %p581_p4, %p580_p3 }
  0x18   : > { %4624 = sst [smem:[#allocation11_spill]] %s3760_s8  ;;  %p683_p8 = scmp.lt.s32.totalorder %s3587_s17, 3 }
  0x19   : > { %s4626_s1 = scalar_select %p3766_p6, 1, 0 }
  0x1a   : > { %p684_p9 = pnand %p3060_p7, %p683_p8 }
  0x1b   : > { %4627 = sst [smem:[#allocation12_spill]] %s4626_s1  ;;  %s3062_s28 = sshll.u32 (!%p684_p9), %s3745_s21, 5 }
  0x1c   : > { %687 = sbr.rel (%p684_p9) target bundleno = 2167 (0x877), region = 116  ;;  %s4628_s27 = sld [smem:[#allocation15_spill]] (!%p684_p9) }
  0x1d   : > { %p755_p10 = scmp.lt.s32.totalorder (!%p684_p9), %s3062_s28, 63  ;;  %s4629_s8 = sld [smem:[#allocation13_spill]] (!%p684_p9) }
  0x1e   : > { %s4630_s2 = sld [smem:[#allocation14_spill]] (!%p684_p9) }
  0x1f   : > { %s4631_s1 = sld [smem:[#allocation21_spill]] (!%p684_p9) }
  0x20   : > { %s4632_s5 = sld [smem:[#allocation17_spill]] (!%p684_p9) }
  0x21   : > { %vm851_vm0 = vcmask 1040384   ;;  %s4649_s28 = smov (!%p755_p10, %s3062_s28), 63  ;;  %vm826_vm1 = vcmask 408576   ;;  %vm1288_vm2 = vcmask 1042432   ;;  %vm1263_vm3 = vcmask 48128   ;;  %s4633_s30 = sld [smem:[#allocation16_spill]] }
  0x22   : > { %v800_v3 = vld [vmem:[%s4628_s27 + $0x18] sm:$0x1]  ;;  %v3376_v7 = vld [vmem:[%s4628_s27 + $0x10] sm:$0xff]  ;;  %s3063_s23 = sshll.u32 %s4649_s28, 3  ;;  %v3375_v8 = vld [vmem:[%s4628_s27 + $0x8] sm:$0xff]  ;;  %s4634_s9 = sld [smem:[#allocation22_spill]] }
  0x23   : > { %v818_v4 = vunpack.c.l.b16 %v800_v3  ;;  %s3786_s7 = scalar_lea.vmem %s4629_s8, %s3063_s23  ;;  %v3374_v9 = vld [vmem:[%s4628_s27] sm:$0xff]  ;;  %s4635_s26 = sld [smem:[#allocation19_spill]]  ;;  %vm1678_vm4 = vcmask 523264  }
  0x24   : > { %v770_v10 = vld [vmem:[%s3786_s7] sm:$0xff]  ;;  %v771_v11 = vld [vmem:[%s3786_s7 + $0x8] sm:$0xff]  ;;  %s3796_s3 = scalar_lea.vmem %s4630_s2, %s3063_s23  ;;  %v772_v18 = vld [vmem:[%s3786_s7 + $0x10] sm:$0xff]  ;;  %s4636_s25 = sld [smem:[#allocation18_spill]] }
  0x25   : > { %v822_v5 = vpack.c.b16 %v818_v4, %v818_v4  ;;  %v786_v12 = vpack.c.bf16 %v771_v11, %v770_v10  ;;  %v1258_v13 = vld [vmem:[%s4631_s1] sm:$0x7]  ;;  %v1235_v16 = vld [vmem:[%s3796_s3 + $0x8] sm:$0xff]  ;;  %v773_v19 = vld [vmem:[%s3786_s7 + $0x18] sm:$0xff]  ;;  %s4637_s8 = sld [smem:[#allocation20_spill]] }
  0x26   : > { %v1234_v14 = vld [vmem:[%s3796_s3] sm:$0xff]  ;;  %v1290_v15 = vsel %vm1288_vm2, %v1258_v13, 0  ;;  %v787_v20 = vpack.c.bf16 %v773_v19, %v772_v18  ;;  %v1236_v21 = vld [vmem:[%s3796_s3 + $0x10] sm:$0xff]  ;;  %v1237_v22 = vld [vmem:[%s3796_s3 + $0x18] sm:$0xff]  ;;  %s4638_s22 = sld [smem:[#allocation23_spill]] }
  0x27   : > { %v853_v6 = vsel %vm851_vm0, %v822_v5, 0  ;;  %1299 = vmatpush.bf16.msra.mxu3 %v1290_v15  ;;  %v1250_v17 = vpack.c.bf16 %v1235_v16, %v1234_v14  ;;  %v1251_v23 = vpack.c.bf16 %v1237_v22, %v1236_v21  ;;  %v774_v24 = vld [vmem:[%s3786_s7 + $0x20] sm:$0xff]  ;;  %v775_v25 = vld [vmem:[%s3786_s7 + $0x28] sm:$0xff]  ;;  %v776_v30 = vld [vmem:[%s3786_s7 + $0x30] sm:$0xff] }
  0x28   : > { %859 = vmatpush.bf16.msra.mxu0 %v853_v6  ;;  %v788_v26 = vpack.c.bf16 %v775_v25, %v774_v24  ;;  %v1238_v27 = vld [vmem:[%s3796_s3 + $0x20] sm:$0xff]  ;;  %v1239_v28 = vld [vmem:[%s3796_s3 + $0x28] sm:$0xff]  ;;  %v777_v31 = vld [vmem:[%s3786_s7 + $0x38] sm:$0xff] }
  0x29   : > { %v1252_v29 = vpack.c.bf16 %v1239_v28, %v1238_v27  ;;  %v789_v32 = vpack.c.bf16 %v777_v31, %v776_v30  ;;  %v1240_v33 = vld [vmem:[%s3796_s3 + $0x30] sm:$0xff]  ;;  %v1241_v34 = vld [vmem:[%s3796_s3 + $0x38] sm:$0xff]  ;;  %v778_v36 = vld [vmem:[%s3786_s7 + $0x40] sm:$0xff] }
  0x2a   : > { %3150 = vmatmul.msk.bf16.vlgmr.msra.gmra.mxu3 %vm1263_vm3, %v1250_v17  ;;  %v1253_v35 = vpack.c.bf16 %v1241_v34, %v1240_v33  ;;  %v779_v37 = vld [vmem:[%s3786_s7 + $0x48] sm:$0xff]  ;;  %v1242_v39 = vld [vmem:[%s3796_s3 + $0x40] sm:$0xff]  ;;  %v3384_v41 = vld [vmem:[%s4632_s5 + $0x38] sm:$0xff] }
  0x2b   : > { %v790_v38 = vpack.c.bf16 %v779_v37, %v778_v36  ;;  %v1243_v40 = vld [vmem:[%s3796_s3 + $0x48] sm:$0xff]  ;;  %3440 = vmatpush.bf16.msra.mxu1 %v3384_v41  ;;  %v780_v43 = vld [vmem:[%s3786_s7 + $0x50] sm:$0xff]  ;;  %v781_v44 = vld [vmem:[%s3786_s7 + $0x58] sm:$0xff] }
  0x2c   : > { %860 = vmatpush.bf16.msra.mxu0 %v3376_v7  ;;  %v1254_v42 = vpack.c.bf16 %v1243_v40, %v1242_v39  ;;  %v791_v45 = vpack.c.bf16 %v781_v44, %v780_v43  ;;  %v3383_v46 = vld [vmem:[%s4632_s5 + $0x30] sm:$0xff]  ;;  %v1245_v48 = vld [vmem:[%s3796_s3 + $0x58] sm:$0xff]  ;;  %v3382_v49 = vld [vmem:[%s4632_s5 + $0x28] sm:$0xff] }
  0x2d   : > { %v1244_v47 = vld [vmem:[%s3796_s3 + $0x50] sm:$0xff]  ;;  %v3381_v51 = vld [vmem:[%s4632_s5 + $0x20] sm:$0xff]  ;;  %v783_v53 = vld [vmem:[%s3786_s7 + $0x68] sm:$0xff] }
  0x2e   : > { %v1255_v50 = vpack.c.bf16 %v1245_v48, %v1244_v47  ;;  %v782_v52 = vld [vmem:[%s3786_s7 + $0x60] sm:$0xff]  ;;  %v3380_v54 = vld [vmem:[%s4632_s5 + $0x18] sm:$0xff]  ;;  %v3379_v56 = vld [vmem:[%s4632_s5 + $0x10] sm:$0xff] }
  0x2f   : > { %3441 = vmatpush.bf16.msra.mxu1 %v3383_v46  ;;  %v792_v55 = vpack.c.bf16 %v783_v53, %v782_v52  ;;  %v3378_v57 = vld [vmem:[%s4632_s5 + $0x8] sm:$0xff]  ;;  %v1246_v58 = vld [vmem:[%s3796_s3 + $0x60] sm:$0xff]  ;;  %v784_v62 = vld [vmem:[%s3786_s7 + $0x70] sm:$0xff] }
  0x30   : > { %861 = vmatpush.bf16.msra.mxu0 %v3375_v8  ;;  %v1247_v59 = vld [vmem:[%s3796_s3 + $0x68] sm:$0xff]  ;;  %v3377_v61 = vld [vmem:[%s4632_s5] sm:$0xff]  ;;  %v785_v63 = vld [vmem:[%s3786_s7 + $0x78] sm:$0xff] }
  0x31   : > { %v1256_v60 = vpack.c.bf16 %v1247_v59, %v1246_v58  ;;  %v793_v0 = vpack.c.bf16 %v785_v63, %v784_v62  ;;  %v1248_v1 = vld [vmem:[%s3796_s3 + $0x70] sm:$0xff]  ;;  %v1249_v2 = vld [vmem:[%s3796_s3 + $0x78] sm:$0xff]  ;;  %v3881_v7 = vld [vmem:[%s4633_s30] ss:$0 sm:$0xff] }
  0x32   : > { %v1257_v3 = vpack.c.bf16 %v1249_v2, %v1248_v1  ;;  %v3400_v4 = vld [vmem:[%s4580_s10 + $0x38] sm:$0xff]  ;;  %v3399_v6 = vld [vmem:[%s4580_s10 + $0x30] sm:$0xff]  ;;  %v3398_v8 = vld [vmem:[%s4580_s10 + $0x28] sm:$0xff] }
  0x33   : > { %3442 = vmatpush.bf16.msra.mxu1 %v3382_v49  ;;  %1433 = vmatpush.bf16.msrb.mxu3 %v3400_v4  ;;  %v3397_v11 = vld [vmem:[%s4580_s10 + $0x20] sm:$0xff]  ;;  %v3396_v16 = vld [vmem:[%s4580_s10 + $0x18] sm:$0xff] }
  0x34   : > { %862 = vmatpush.bf16.msra.mxu0 %v3374_v9  ;;  %v3897_v18 = vld [vmem:[%s4634_s9] ss:$0 sm:$0xff] }
  0x35   : > { %v2366_v25 = vld [vmem:[%s4631_s1] sm:$0x7] }
  0x36   : > { %v3393_v31 = vld [vmem:[%s4580_s10] sm:$0xff] }
  0x37   : > { %3078 = vmatmul.msk.bf16.vlgmr.msra.gmra.mxu0 %vm826_vm1, %v786_v12  ;;  %3443 = vmatpush.bf16.msra.mxu1 %v3381_v51 }
  0x38   : > { %996 = vmatpush.bf16.msrb.mxu0 %v3384_v41  ;;  %1434 = vmatpush.bf16.msrb.mxu3 %v3399_v6 }
  0x3a   : > { %3151 = vmatmul.msk.bf16.gmra.mxu3 %vm1263_vm3, %v1251_v23  ;;  %v3394_v23 = vld [vmem:[%s4580_s10 + $0x8] sm:$0xff] }
  0x3b   : > { %3444 = vmatpush.bf16.msra.mxu1 %v3380_v54 }
  0x3c   : > { %997 = vmatpush.bf16.msrb.mxu0 %v3383_v46  ;;  %1435 = vmatpush.bf16.msrb.mxu3 %v3398_v8 }
  0x3f   : > { %3445 = vmatpush.bf16.msra.mxu1 %v3379_v56 }
  0x40   : > { %998 = vmatpush.bf16.msrb.mxu0 %v3382_v49  ;;  %1436 = vmatpush.bf16.msrb.mxu3 %v3397_v11 }
  0x43   : > { %3446 = vmatpush.bf16.msra.mxu1 %v3378_v57 }
  0x44   : > { %999 = vmatpush.bf16.msrb.mxu0 %v3381_v51  ;;  %1437 = vmatpush.bf16.msrb.mxu3 %v3396_v16 }
  0x47   : > { %3079 = vmatmul.msk.bf16.gmra.mxu0 %vm826_vm1, %v787_v20  ;;  %3447 = vmatpush.bf16.msra.mxu1 %v3377_v61  ;;  %v3395_v20 = vld [vmem:[%s4580_s10 + $0x10] sm:$0xff] }
  0x48   : > { %1000 = vmatpush.bf16.msrb.mxu0 %v3380_v54  ;;  %1438 = vmatpush.bf16.msrb.mxu3 %v3395_v20 }
  0x4a   : > { %3152 = vmatmul.msk.bf16.gmra.mxu3 %vm1263_vm3, %v1252_v29  ;;  %v2396_v29 = vsel %vm1288_vm2, %v2366_v25, 0 }
  0x4c   : > { %1001 = vmatpush.bf16.msrb.mxu0 %v3379_v56  ;;  %1439 = vmatpush.bf16.msrb.mxu3 %v3394_v23  ;;  %v3589_v23 = vmov 0  }
  0x4d   : > { %3488 = vset.pattern.permute.xlu1 %v3589_v23  ;;  %3489 = vset.pattern.permute.xlu2 %v3589_v23 }
  0x50   : > { %1002 = vmatpush.bf16.msrb.mxu0 %v3378_v57  ;;  %1440 = vmatpush.bf16.msrb.mxu3 %v3393_v31 }
  0x54   : > { %1003 = vmatpush.bf16.msrb.mxu0 %v3377_v61  ;;  %2405 = vmatpush.bf16.msra.mxu3 %v2396_v29  ;;  %v3392_v29 = vld [vmem:[%s4635_s26 + $0x38] sm:$0xff] }
  0x55   : > { %1137 = vmatpush.bf16.msra.mxu2 %v3392_v29 }
  0x57   : > { %3080 = vmatmul.msk.bf16.gmra.mxu0 %vm826_vm1, %v788_v26 }
  0x5a   : > { %3153 = vmatmul.msk.bf16.gmra.mxu3 %vm1263_vm3, %v1253_v35 }
  0x67   : > { %3081 = vmatmul.msk.bf16.gmra.mxu0 %vm826_vm1, %v789_v32 }
  0x6a   : > { %3154 = vmatmul.msk.bf16.gmra.mxu3 %vm1263_vm3, %v1254_v42 }
  0x77   : > { %3082 = vmatmul.msk.bf16.gmra.mxu0 %vm826_vm1, %v790_v38 }
  0x7a   : > { %3155 = vmatmul.msk.bf16.gmra.mxu3 %vm1263_vm3, %v1255_v50 }
  0x87   : > { %3083 = vmatmul.msk.bf16.gmra.mxu0 %vm826_vm1, %v791_v45 }
  0x8a   : > { %3156 = vmatmul.msk.bf16.gmra.mxu3 %vm1263_vm3, %v1256_v60 }
  0x97   : > { %3084 = vmatmul.msk.bf16.gmra.mxu0 %vm826_vm1, %v792_v55 }
  0x9a   : > { %3157 = vmatmul.msk.bf16.gmra.mxu3 %vm1263_vm3, %v1257_v3 }
  0xa7   : > { %3085 = vmatmul.msk.bf16.gmra.mxu0 %vm826_vm1, %v793_v0 }
  0xad   : > { %v1301_v15 = vpop.f32.mrf.mxu3 }
  0xae   : > { %v1302_v21 = vadd.f32 %v3897_v18, %v1301_v15 }
  0xb0   : > { %v1341_v27 = vmax.f32 %v1302_v21, 0.0  ;;  %v1544_v21 = vld [vmem:[%s4583_s13 + $0x30] sm:$0xff] }
  0xb1   : > { %1586 = vperm.xlu1 %3488, %v1544_v21  }
  0xb4   : > { %v864_v5 = vpop.f32.mrf.mxu0 }
  0xb5   : > { %v865_v9 = vadd.f32 %v3881_v7, %v864_v5  ;;  %v1303_v22 = vpop.f32.mrf.mxu3 }
  0xb6   : > { %v1304_v24 = vadd.f32 %v3897_v18, %v1303_v22 }
  0xb7   : > { %v904_v13 = vmax.f32 %v865_v9, 0.0 }
  0xb8   : > { %v1342_v28 = vmax.f32 %v1304_v24, 0.0 }
  0xba   : > { %v1357_v35 = vpack.c.bf16 %v1342_v28, %v1341_v27 }
  0xbc   : > { %v866_v10 = vpop.f32.mrf.mxu0  ;;  %1441 = vmatmul.bf16.vlgmr.msrb.gmra.mxu3 %v1357_v35  ;;  %v3391_v35 = vld [vmem:[%s4635_s26 + $0x30] sm:$0xff] }
  0xbd   : > { %v867_v12 = vadd.f32 %v3881_v7, %v866_v10  ;;  %v1306_v36 = vpop.f32.mrf.mxu3  ;;  %1138 = vmatpush.bf16.msra.mxu2 %v3391_v35 }
  0xbe   : > { %v1307_v39 = vadd.f32 %v3897_v18, %v1306_v36  ;;  %v3946_v36 = vld [vmem:[%s4583_s13 + $0x38] sm:$0xff] }
  0xbf   : > { %v905_v14 = vmax.f32 %v867_v12, 0.0  ;;  %1591 = vperm.xlu1 %3488, %v3946_v36  }
  0xc0   : > { %v1343_v43 = vmax.f32 %v1307_v39, 0.0 }
  0xc1   : > { %v920_v17 = vpack.c.bf16 %v905_v14, %v904_v13 }
  0xc3   : > { %1004 = vmatmul.bf16.vlgmr.msrb.gmra.mxu0 %v920_v17 }
  0xc4   : > { %v869_v19 = vpop.f32.mrf.mxu0 }
  0xc5   : > { %v870_v26 = vadd.f32 %v3881_v7, %v869_v19  ;;  %v1308_v40 = vpop.f32.mrf.mxu3 }
  0xc6   : > { %v1309_v41 = vadd.f32 %v3897_v18, %v1308_v40 }
  0xc7   : > { %v906_v33 = vmax.f32 %v870_v26, 0.0 }
  0xc8   : > { %v1344_v44 = vmax.f32 %v1309_v41, 0.0 }
  0xca   : > { %v1358_v49 = vpack.c.bf16 %v1344_v44, %v1343_v43  ;;  %v1540_v43 = vld [vmem:[%s4583_s13 + $0x10] sm:$0xff] }
  0xcb   : > { %1566 = vperm.xlu1 %3488, %v1540_v43  }
  0xcc   : > { %v871_v30 = vpop.f32.mrf.mxu0  ;;  %1446 = vmatmul.bf16.gmra.mxu3 %v1358_v49  ;;  %v3388_v49 = vld [vmem:[%s4635_s26 + $0x18] sm:$0xff] }
  0xcd   : > { %v872_v32 = vadd.f32 %v3881_v7, %v871_v30  ;;  %v1311_v50 = vpop.f32.mrf.mxu3 }
  0xce   : > { %v1312_v53 = vadd.f32 %v3897_v18, %v1311_v50 }
  0xcf   : > { %v907_v34 = vmax.f32 %v872_v32, 0.0 }
  0xd0   : > { %v1345_v57 = vmax.f32 %v1312_v53, 0.0 }
  0xd1   : > { %v921_v37 = vpack.c.bf16 %v907_v34, %v906_v33 }
  0xd3   : > { %1009 = vmatmul.bf16.gmra.mxu0 %v921_v37 }
  0xd4   : > { %v874_v38 = vpop.f32.mrf.mxu0 }
  0xd5   : > { %v875_v42 = vadd.f32 %v3881_v7, %v874_v38  ;;  %v1313_v54 = vpop.f32.mrf.mxu3  ;;  %v3390_v38 = vld [vmem:[%s4635_s26 + $0x28] sm:$0xff] }
  0xd6   : > { %v1314_v55 = vadd.f32 %v3897_v18, %v1313_v54  ;;  %1139 = vmatpush.bf16.msra.mxu2 %v3390_v38 }
  0xd7   : > { %v908_v47 = vmax.f32 %v875_v42, 0.0  ;;  %v3389_v42 = vld [vmem:[%s4635_s26 + $0x20] sm:$0xff] }
  0xd8   : > { %v1346_v58 = vmax.f32 %v1314_v55, 0.0  ;;  %v3387_v55 = vld [vmem:[%s4635_s26 + $0x10] sm:$0xff] }
  0xda   : > { %v1359_v63 = vpack.c.bf16 %v1346_v58, %v1345_v57  ;;  %1140 = vmatpush.bf16.msra.mxu2 %v3389_v42  ;;  %v3386_v58 = vld [vmem:[%s4635_s26 + $0x8] sm:$0xff] }
  0xdc   : > { %v876_v45 = vpop.f32.mrf.mxu0  ;;  %1451 = vmatmul.bf16.gmra.mxu3 %v1359_v63 }
  0xdd   : > { %v877_v46 = vadd.f32 %v3881_v7, %v876_v45  ;;  %v1316_v0 = vpop.f32.mrf.mxu3 }
  0xde   : > { %v1317_v3 = vadd.f32 %v3897_v18, %v1316_v0  ;;  %1141 = vmatpush.bf16.msra.mxu2 %v3388_v49 }
  0xdf   : > { %v909_v48 = vmax.f32 %v877_v46, 0.0 }
  0xe0   : > { %v1347_v8 = vmax.f32 %v1317_v3, 0.0 }
  0xe1   : > { %v922_v51 = vpack.c.bf16 %v909_v48, %v908_v47 }
  0xe2   : > { %1142 = vmatpush.bf16.msra.mxu2 %v3387_v55 }
  0xe3   : > { %1014 = vmatmul.bf16.vlgmr.msra.gmra.mxu1 %v922_v51 }
  0xe4   : > { %v879_v52 = vpop.f32.mrf.mxu0 }
  0xe5   : > { %v880_v56 = vadd.f32 %v3881_v7, %v879_v52  ;;  %v1318_v4 = vpop.f32.mrf.mxu3 }
  0xe6   : > { %v1319_v5 = vadd.f32 %v3897_v18, %v1318_v4  ;;  %1143 = vmatpush.bf16.msra.mxu2 %v3386_v58 }
  0xe7   : > { %v910_v61 = vmax.f32 %v880_v56, 0.0  ;;  %v1538_v56 = vld [vmem:[%s4583_s13] sm:$0xff] }
  0xe8   : > { %v1348_v9 = vmax.f32 %v1319_v5, 0.0  ;;  %1556 = vperm.xlu1 %3488, %v1538_v56  }
  0xea   : > { %v1360_v14 = vpack.c.bf16 %v1348_v9, %v1347_v8 }
  0xec   : > { %v881_v59 = vpop.f32.mrf.mxu0  ;;  %1456 = vmatmul.bf16.gmra.mxu3 %v1360_v14 }
  0xed   : > { %v882_v60 = vadd.f32 %v3881_v7, %v881_v59  ;;  %v1321_v15 = vpop.f32.mrf.mxu3 }
  0xee   : > { %v1322_v19 = vadd.f32 %v3897_v18, %v1321_v15 }
  0xef   : > { %v911_v62 = vmax.f32 %v882_v60, 0.0 }
  0xf0   : > { %v1349_v25 = vmax.f32 %v1322_v19, 0.0 }
  0xf1   : > { %v923_v1 = vpack.c.bf16 %v911_v62, %v910_v61  ;;  %v3385_v61 = vld [vmem:[%s4635_s26] sm:$0xff] }
  0xf2   : > { %1144 = vmatpush.bf16.msra.mxu2 %v3385_v61 }
  0xf3   : > { %1019 = vmatmul.bf16.gmra.mxu1 %v923_v1 }
  0xf4   : > { %v884_v2 = vpop.f32.mrf.mxu0 }
  0xf5   : > { %v885_v6 = vadd.f32 %v3881_v7, %v884_v2  ;;  %v1323_v20 = vpop.f32.mrf.mxu3 }
  0xf6   : > { %v1324_v22 = vadd.f32 %v3897_v18, %v1323_v20 }
  0xf7   : > { %v912_v12 = vmax.f32 %v885_v6, 0.0 }
  0xf8   : > { %v1350_v26 = vmax.f32 %v1324_v22, 0.0 }
  0xfa   : > { %v1361_v32 = vpack.c.bf16 %v1350_v26, %v1349_v25 }
  0xfc   : > { %v886_v10 = vpop.f32.mrf.mxu0  ;;  %1461 = vmatmul.bf16.gmra.mxu3 %v1361_v32 }
  0xfd   : > { %v887_v11 = vadd.f32 %v3881_v7, %v886_v10  ;;  %v1326_v33 = vpop.f32.mrf.mxu3 }
  0xfe   : > { %v1327_v39 = vadd.f32 %v3897_v18, %v1326_v33 }
  0xff   : > { %v913_v13 = vmax.f32 %v887_v11, 0.0 }
 0x100   : > { %v1351_v45 = vmax.f32 %v1327_v39, 0.0 }
 0x101   : > { %v924_v16 = vpack.c.bf16 %v913_v13, %v912_v12 }
 0x103   : > { %1024 = vmatmul.bf16.gmra.mxu1 %v924_v16 }
 0x104   : > { %v889_v17 = vpop.f32.mrf.mxu0 }
 0x105   : > { %v890_v24 = vadd.f32 %v3881_v7, %v889_v17  ;;  %v1328_v40 = vpop.f32.mrf.mxu3 }
 0x106   : > { %v1329_v41 = vadd.f32 %v3897_v18, %v1328_v40 }
 0x107   : > { %v914_v30 = vmax.f32 %v890_v24, 0.0 }
 0x108   : > { %v1352_v46 = vmax.f32 %v1329_v41, 0.0 }
 0x10a   : > { %v1362_v52 = vpack.c.bf16 %v1352_v46, %v1351_v45 }
 0x10c   : > { %v891_v27 = vpop.f32.mrf.mxu0  ;;  %1466 = vmatmul.bf16.gmra.mxu3 %v1362_v52 }
 0x10d   : > { %v892_v28 = vadd.f32 %v3881_v7, %v891_v27  ;;  %v1331_v54 = vpop.f32.mrf.mxu3 }
 0x10e   : > { %v1332_v59 = vadd.f32 %v3897_v18, %v1331_v54 }
 0x10f   : > { %v915_v31 = vmax.f32 %v892_v28, 0.0 }
 0x110   : > { %v1353_v63 = vmax.f32 %v1332_v59, 0.0 }
 0x111   : > { %v925_v34 = vpack.c.bf16 %v915_v31, %v914_v30 }
 0x113   : > { %1029 = vmatmul.bf16.gmra.mxu1 %v925_v34 }
 0x114   : > { %v894_v37 = vpop.f32.mrf.mxu0 }
 0x115   : > { %v895_v44 = vadd.f32 %v3881_v7, %v894_v37  ;;  %v1333_v60 = vpop.f32.mrf.mxu3 }
 0x116   : > { %v1334_v0 = vadd.f32 %v3897_v18, %v1333_v60 }
 0x117   : > { %v916_v50 = vmax.f32 %v895_v44, 0.0 }
 0x118   : > { %v1354_v3 = vmax.f32 %v1334_v0, 0.0 }
 0x11a   : > { %v1363_v6 = vpack.c.bf16 %v1354_v3, %v1353_v63 }
 0x11c   : > { %v896_v47 = vpop.f32.mrf.mxu0  ;;  %1471 = vmatmul.bf16.gmra.mxu3 %v1363_v6 }
 0x11d   : > { %v897_v48 = vadd.f32 %v3881_v7, %v896_v47  ;;  %v1336_v9 = vpop.f32.mrf.mxu3 }
 0x11e   : > { %v1337_v10 = vadd.f32 %v3897_v18, %v1336_v9 }
 0x11f   : > { %v917_v51 = vmax.f32 %v897_v48, 0.0 }
 0x120   : > { %v1355_v12 = vmax.f32 %v1337_v10, 0.0 }
 0x121   : > { %v926_v53 = vpack.c.bf16 %v917_v51, %v916_v50 }
 0x123   : > { %1034 = vmatmul.bf16.gmra.mxu1 %v926_v53 }
 0x124   : > { %v899_v57 = vpop.f32.mrf.mxu0 }
 0x125   : > { %v900_v62 = vadd.f32 %v3881_v7, %v899_v57  ;;  %v1338_v11 = vpop.f32.mrf.mxu3 }
 0x126   : > { %v1339_v13 = vadd.f32 %v3897_v18, %v1338_v11  ;;  %v3993_v18 = vld [vmem:[%s4581_s11] ss:$0 sm:$0xff] }
 0x127   : > { %v918_v4 = vmax.f32 %v900_v62, 0.0 }
 0x128   : > { %v1356_v14 = vmax.f32 %v1339_v13, 0.0 }
 0x12a   : > { %v1364_v15 = vpack.c.bf16 %v1356_v14, %v1355_v12 }
 0x12c   : > { %v901_v1 = vpop.f32.mrf.mxu0  ;;  %1476 = vmatmul.bf16.gmra.mxu3 %v1364_v15 }
 0x12d   : > { %v902_v2 = vadd.f32 %v3881_v7, %v901_v1  ;;  %v3986_v7 = vld [vmem:[%s4636_s25] ss:$0 sm:$0xff] }
 0x12f   : > { %v919_v5 = vmax.f32 %v902_v2, 0.0 }
 0x131   : > { %v927_v8 = vpack.c.bf16 %v919_v5, %v918_v4 }
 0x133   : > { %1039 = vmatmul.bf16.gmra.mxu1 %v927_v8 }
 0x13f   : > { %v1442_v26 = vpop.f32.mrf.mxu3 }
 0x140   : > { %v1005_v16 = vpop.f32.mrf.mxu0  ;;  %v1443_v27 = vadd.f32 %v3993_v18, %v1442_v26 }
 0x141   : > { %v1006_v17 = vadd.f32 %v3986_v7, %v1005_v16 }
 0x142   : > { %v1482_v29 = vmax.f32 %v1443_v27, 0.0 }
 0x143   : > { %v1045_v21 = vmax.f32 %v1006_v17, 0.0 }
 0x144   : > { %1498 = vxpose.xlu1.b32.start [1/16] %v1482_v29, 128 }
 0x147   : > { %v1444_v34 = vpop.f32.mrf.mxu3 }
 0x148   : > { %v1007_v19 = vpop.f32.mrf.mxu0  ;;  %v1445_v37 = vadd.f32 %v3993_v18, %v1444_v34 }
 0x149   : > { %v1008_v20 = vadd.f32 %v3986_v7, %v1007_v19 }
 0x14a   : > { %v1483_v38 = vmax.f32 %v1445_v37, 0.0 }
 0x14b   : > { %v1046_v22 = vmax.f32 %v1008_v20, 0.0 }
 0x14c   : > { %1499 = vxpose.xlu1.b32.cont [2/16] %v1483_v38, 128 }
 0x14d   : > { %v1061_v24 = vpack.c.bf16 %v1046_v22, %v1045_v21 }
 0x14f   : > { %1145 = vmatmul.bf16.vlgmr.msra.gmra.mxu2 %v1061_v24  ;;  %v1447_v40 = vpop.f32.mrf.mxu3 }
 0x150   : > { %v1010_v25 = vpop.f32.mrf.mxu0  ;;  %v1448_v41 = vadd.f32 %v3993_v18, %v1447_v40 }
 0x151   : > { %v1011_v28 = vadd.f32 %v3986_v7, %v1010_v25 }
 0x152   : > { %v1484_v43 = vmax.f32 %v1448_v41, 0.0 }
 0x153   : > { %v1047_v32 = vmax.f32 %v1011_v28, 0.0 }
 0x154   : > { %1500 = vxpose.xlu1.b32.cont [3/16] %v1484_v43, 128 }
 0x157   : > { %v1449_v48 = vpop.f32.mrf.mxu3 }
 0x158   : > { %v1012_v30 = vpop.f32.mrf.mxu0  ;;  %v1450_v50 = vadd.f32 %v3993_v18, %v1449_v48 }
 0x159   : > { %v1013_v31 = vadd.f32 %v3986_v7, %v1012_v30 }
 0x15a   : > { %v1485_v51 = vmax.f32 %v1450_v50, 0.0 }
 0x15b   : > { %v1048_v33 = vmax.f32 %v1013_v31, 0.0 }
 0x15c   : > { %1501 = vxpose.xlu1.b32.cont [4/16] %v1485_v51, 128 }
 0x15d   : > { %v1062_v35 = vpack.c.bf16 %v1048_v33, %v1047_v32 }
 0x15f   : > { %1150 = vmatmul.bf16.gmra.mxu2 %v1062_v35  ;;  %v1452_v53 = vpop.f32.mrf.mxu3 }
 0x160   : > { %v1015_v39 = vpop.f32.mrf.mxu1  ;;  %v1453_v54 = vadd.f32 %v3993_v18, %v1452_v53 }
 0x161   : > { %v1016_v42 = vadd.f32 %v3986_v7, %v1015_v39 }
 0x162   : > { %v1486_v56 = vmax.f32 %v1453_v54, 0.0 }
 0x163   : > { %v1049_v46 = vmax.f32 %v1016_v42, 0.0 }
 0x164   : > { %1502 = vxpose.xlu1.b32.cont [5/16] %v1486_v56, 128 }
 0x167   : > { %v1454_v61 = vpop.f32.mrf.mxu3 }
 0x168   : > { %v1017_v44 = vpop.f32.mrf.mxu1  ;;  %v1455_v63 = vadd.f32 %v3993_v18, %v1454_v61 }
 0x169   : > { %v1018_v45 = vadd.f32 %v3986_v7, %v1017_v44 }
 0x16a   : > { %v1487_v0 = vmax.f32 %v1455_v63, 0.0 }
 0x16b   : > { %v1050_v47 = vmax.f32 %v1018_v45, 0.0 }
 0x16c   : > { %1503 = vxpose.xlu1.b32.cont [6/16] %v1487_v0, 128 }
 0x16d   : > { %v1063_v49 = vpack.c.bf16 %v1050_v47, %v1049_v46 }
 0x16f   : > { %1155 = vmatmul.bf16.gmra.mxu2 %v1063_v49  ;;  %v1457_v2 = vpop.f32.mrf.mxu3 }
 0x170   : > { %v1020_v52 = vpop.f32.mrf.mxu1  ;;  %v1458_v3 = vadd.f32 %v3993_v18, %v1457_v2 }
 0x171   : > { %v1021_v55 = vadd.f32 %v3986_v7, %v1020_v52 }
 0x172   : > { %v1488_v5 = vmax.f32 %v1458_v3, 0.0 }
 0x173   : > { %v1051_v59 = vmax.f32 %v1021_v55, 0.0 }
 0x174   : > { %1504 = vxpose.xlu1.b32.cont [7/16] %v1488_v5, 128 }
 0x177   : > { %v1459_v11 = vpop.f32.mrf.mxu3 }
 0x178   : > { %v1022_v57 = vpop.f32.mrf.mxu1  ;;  %v1460_v13 = vadd.f32 %v3993_v18, %v1459_v11 }
 0x179   : > { %v1023_v58 = vadd.f32 %v3986_v7, %v1022_v57 }
 0x17a   : > { %v1489_v14 = vmax.f32 %v1460_v13, 0.0 }
 0x17b   : > { %v1052_v60 = vmax.f32 %v1023_v58, 0.0 }
 0x17c   : > { %1505 = vxpose.xlu1.b32.cont [8/16] %v1489_v14, 128 }
 0x17d   : > { %v1064_v62 = vpack.c.bf16 %v1052_v60, %v1051_v59 }
 0x17f   : > { %1160 = vmatmul.bf16.gmra.mxu2 %v1064_v62  ;;  %v1462_v16 = vpop.f32.mrf.mxu3 }
 0x180   : > { %v1025_v1 = vpop.f32.mrf.mxu1  ;;  %v1463_v17 = vadd.f32 %v3993_v18, %v1462_v16 }
 0x181   : > { %v1026_v4 = vadd.f32 %v3986_v7, %v1025_v1 }
 0x182   : > { %v1490_v20 = vmax.f32 %v1463_v17, 0.0 }
 0x183   : > { %v1053_v9 = vmax.f32 %v1026_v4, 0.0  ;;  %v4032_v4 = vpop.permute.xlu1 %1586 }
 0x184   : > { %1506 = vxpose.xlu1.b32.cont [9/16] %v1490_v20, 128 }
 0x187   : > { %v1464_v26 = vpop.f32.mrf.mxu3 }
 0x188   : > { %v1027_v6 = vpop.f32.mrf.mxu1  ;;  %v1465_v28 = vadd.f32 %v3993_v18, %v1464_v26 }
 0x189   : > { %v1028_v8 = vadd.f32 %v3986_v7, %v1027_v6 }
 0x18a   : > { %v1491_v29 = vmax.f32 %v1465_v28, 0.0 }
 0x18b   : > { %v1054_v10 = vmax.f32 %v1028_v8, 0.0 }
 0x18c   : > { %1507 = vxpose.xlu1.b32.cont [10/16] %v1491_v29, 128 }
 0x18d   : > { %v1065_v12 = vpack.c.bf16 %v1054_v10, %v1053_v9  ;;  %v4035_v9 = vpop.permute.xlu1 %1591 }
 0x18f   : > { %1165 = vmatmul.bf16.gmra.mxu2 %v1065_v12  ;;  %v1467_v31 = vpop.f32.mrf.mxu3 }
 0x190   : > { %v1030_v15 = vpop.f32.mrf.mxu1  ;;  %v1468_v32 = vadd.f32 %v3993_v18, %v1467_v31 }
 0x191   : > { %v1031_v19 = vadd.f32 %v3986_v7, %v1030_v15 }
 0x192   : > { %v1492_v34 = vmax.f32 %v1468_v32, 0.0 }
 0x193   : > { %v1055_v24 = vmax.f32 %v1031_v19, 0.0 }
 0x194   : > { %1508 = vxpose.xlu1.b32.cont [11/16] %v1492_v34, 128 }
 0x195   : > { %v4038_v13 = vpop.permute.xlu1 %1566 }
 0x197   : > { %v1469_v40 = vpop.f32.mrf.mxu3 }
 0x198   : > { %v1032_v21 = vpop.f32.mrf.mxu1  ;;  %v1470_v42 = vadd.f32 %v3993_v18, %v1469_v40 }
 0x199   : > { %v1033_v22 = vadd.f32 %v3986_v7, %v1032_v21 }
 0x19a   : > { %v1493_v43 = vmax.f32 %v1470_v42, 0.0 }
 0x19b   : > { %v1056_v25 = vmax.f32 %v1033_v22, 0.0 }
 0x19c   : > { %1509 = vxpose.xlu1.b32.cont [12/16] %v1493_v43, 128 }
 0x19d   : > { %v1066_v27 = vpack.c.bf16 %v1056_v25, %v1055_v24  ;;  %v4041_v17 = vpop.permute.xlu1 %1556 }
 0x19f   : > { %1170 = vmatmul.bf16.gmra.mxu2 %v1066_v27  ;;  %v1472_v45 = vpop.f32.mrf.mxu3 }
 0x1a0   : > { %v1035_v30 = vpop.f32.mrf.mxu1  ;;  %v1473_v46 = vadd.f32 %v3993_v18, %v1472_v45 }
 0x1a1   : > { %v1036_v33 = vadd.f32 %v3986_v7, %v1035_v30 }
 0x1a2   : > { %v1494_v48 = vmax.f32 %v1473_v46, 0.0 }
 0x1a3   : > { %v1057_v38 = vmax.f32 %v1036_v33, 0.0 }
 0x1a4   : > { %1510 = vxpose.xlu1.b32.cont [13/16] %v1494_v48, 128 }
 0x1a7   : > { %v1474_v53 = vpop.f32.mrf.mxu3 }
 0x1a8   : > { %v1037_v35 = vpop.f32.mrf.mxu1  ;;  %v1475_v55 = vadd.f32 %v3993_v18, %v1474_v53 }
 0x1a9   : > { %v1038_v37 = vadd.f32 %v3986_v7, %v1037_v35 }
 0x1aa   : > { %v1495_v56 = vmax.f32 %v1475_v55, 0.0 }
 0x1ab   : > { %v1058_v39 = vmax.f32 %v1038_v37, 0.0 }
 0x1ac   : > { %1511 = vxpose.xlu1.b32.cont [14/16] %v1495_v56, 128 }
 0x1ad   : > { %v1067_v41 = vpack.c.bf16 %v1058_v39, %v1057_v38 }
 0x1af   : > { %1175 = vmatmul.bf16.gmra.mxu2 %v1067_v41  ;;  %v1477_v57 = vpop.f32.mrf.mxu3 }
 0x1b0   : > { %v1040_v44 = vpop.f32.mrf.mxu1  ;;  %v1478_v58 = vadd.f32 %v3993_v18, %v1477_v57 }
 0x1b1   : > { %v1041_v47 = vadd.f32 %v3986_v7, %v1040_v44 }
 0x1b2   : > { %v1496_v59 = vmax.f32 %v1478_v58, 0.0 }
 0x1b3   : > { %v1059_v51 = vmax.f32 %v1041_v47, 0.0 }
 0x1b4   : > { %1512 = vxpose.xlu1.b32.cont [15/16] %v1496_v59, 128 }
 0x1b7   : > { %v1479_v60 = vpop.f32.mrf.mxu3 }
 0x1b8   : > { %v1042_v49 = vpop.f32.mrf.mxu1  ;;  %v1480_v61 = vadd.f32 %v3993_v18, %v1479_v60 }
 0x1b9   : > { %v1043_v50 = vadd.f32 %v3986_v7, %v1042_v49  ;;  %v4028_v7 = vld [vmem:[%s4637_s8] ss:$0 sm:$0xff] }
 0x1ba   : > { %v1497_v62 = vmax.f32 %v1480_v61, 0.0 }
 0x1bb   : > { %v1060_v52 = vmax.f32 %v1043_v50, 0.0 }
 0x1bc   : > { %1513 = vxpose.xlu1.b32.end [16/16] %v1497_v62, 128 }
 0x1bd   : > { %v1068_v54 = vpack.c.bf16 %v1060_v52, %v1059_v51 }
 0x1bf   : > { %1180 = vmatmul.bf16.gmra.mxu2 %v1068_v54 }
 0x1d2   : > { %v1146_v63 = vpop.f32.mrf.mxu2 }
 0x1d3   : > { %v1147_v0 = vadd.f32 %v4028_v7, %v1146_v63 }
 0x1d5   : > { %v1186_v1 = vmax.f32 %v1147_v0, 0.0 }
 0x1d7   : > { %1202 = vxpose.xlu0.b32.start [1/16] %v1186_v1, 128 }
 0x1da   : > { %v1148_v2 = vpop.f32.mrf.mxu2 }
 0x1db   : > { %v1149_v3 = vadd.f32 %v4028_v7, %v1148_v2 }
 0x1dd   : > { %v1187_v5 = vmax.f32 %v1149_v3, 0.0 }
 0x1df   : > { %1203 = vxpose.xlu0.b32.cont [2/16] %v1187_v5, 128 }
 0x1e2   : > { %v1151_v18 = vpop.f32.mrf.mxu2 }
 0x1e3   : > { %v1152_v6 = vadd.f32 %v4028_v7, %v1151_v18  ;;  %v4073_v18 = vld [vmem:[%s4583_s13 + $0x28] sm:$0xff] }
 0x1e5   : > { %v1188_v8 = vmax.f32 %v1152_v6, 0.0 }
 0x1e7   : > { %1204 = vxpose.xlu0.b32.cont [3/16] %v1188_v8, 128  ;;  %v4079_v8 = vld [vmem:[%s4583_s13 + $0x18] sm:$0xff] }
 0x1e8   : > { %v4044_v22 = vpop.trf.xlu1 }
 0x1ea   : > { %v1153_v10 = vpop.f32.mrf.mxu2 }
 0x1eb   : > { %v1154_v11 = vadd.f32 %v4028_v7, %v1153_v10  ;;  %v4085_v10 = vld [vmem:[%s4583_s13 + $0x8] sm:$0xff] }
 0x1ed   : > { %v1189_v12 = vmax.f32 %v1154_v11, 0.0 }
 0x1ef   : > { %1205 = vxpose.xlu0.b32.cont [4/16] %v1189_v12, 128  ;;  %v1658_v12 = vld [vmem:[%s4585_s15 + $0x8] sm:$0xff] }
 0x1f0   : > { %v4047_v27 = vpop.trf.xlu1 }
 0x1f1   : > { %v1750_v28 = vpack.c.bf16 %v4047_v27, %v4044_v22  ;;  %v1792_v27 = vld [vmem:[#allocation3] sm:$0x1] }
 0x1f2   : > { %v1156_v14 = vpop.f32.mrf.mxu2 }
 0x1f3   : > { %v1157_v15 = vadd.f32 %v4028_v7, %v1156_v14 }
 0x1f5   : > { %v1190_v16 = vmax.f32 %v1157_v15, 0.0 }
 0x1f7   : > { %1206 = vxpose.xlu0.b32.cont [5/16] %v1190_v16, 128 }
 0x1f8   : > { %v4052_v32 = vpop.trf.xlu1 }
 0x1fa   : > { %v1158_v19 = vpop.f32.mrf.mxu2 }
 0x1fb   : > { %v1159_v20 = vadd.f32 %v4028_v7, %v1158_v19 }
 0x1fd   : > { %v1191_v21 = vmax.f32 %v1159_v20, 0.0  ;;  %v1749_v20 = vld [vmem:[%s4589_s19 + $0x8] sm:$0xff] }
 0x1ff   : > { %1207 = vxpose.xlu0.b32.cont [6/16] %v1191_v21, 128 }
 0x200   : > { %v4055_v37 = vpop.trf.xlu1 }
 0x201   : > { %v1751_v38 = vpack.c.bf16 %v4055_v37, %v4052_v32  ;;  %v1791_v32 = vld [vmem:[%s4590_s20 + $0x8] sm:$0xff] }
 0x202   : > { %v1161_v24 = vpop.f32.mrf.mxu2 }
 0x203   : > { %v1162_v25 = vadd.f32 %v4028_v7, %v1161_v24 }
 0x205   : > { %v1192_v26 = vmax.f32 %v1162_v25, 0.0 }
 0x207   : > { %1208 = vxpose.xlu0.b32.cont [7/16] %v1192_v26, 128 }
 0x208   : > { %v4060_v42 = vpop.trf.xlu1 }
 0x20a   : > { %v1163_v29 = vpop.f32.mrf.mxu2 }
 0x20b   : > { %v1164_v30 = vadd.f32 %v4028_v7, %v1163_v29 }
 0x20d   : > { %v1193_v31 = vmax.f32 %v1164_v30, 0.0 }
 0x20f   : > { %1209 = vxpose.xlu0.b32.cont [8/16] %v1193_v31, 128  ;;  %v1699_v31 = vld [vmem:[%s4586_s16 + $0x8] sm:$0xff] }
 0x210   : > { %v1519_v46 = vpop.trf.xlu1 }
 0x211   : > { %v1752_v47 = vpack.c.bf16 %v1519_v46, %v4060_v42 }
 0x212   : > { %v1166_v33 = vpop.f32.mrf.mxu2 }
 0x213   : > { %v1167_v34 = vadd.f32 %v4028_v7, %v1166_v33 }
 0x215   : > { %v1194_v35 = vmax.f32 %v1167_v34, 0.0  ;;  %v3406_v34 = vld [vmem:[%s4588_s18] sm:$0xff] }
 0x216   : > { %2697 = vperm.xlu1 %3488, %v3946_v36  }
 0x217   : > { %1210 = vxpose.xlu0.b32.cont [9/16] %v1194_v35, 128 }
 0x218   : > { %v1520_v51 = vpop.trf.xlu1 }
 0x21a   : > { %v1168_v39 = vpop.f32.mrf.mxu2 }
 0x21b   : > { %v1169_v40 = vadd.f32 %v4028_v7, %v1168_v39 }
 0x21d   : > { %v1195_v41 = vmax.f32 %v1169_v40, 0.0  ;;  %v768_v40 = vld [vmem:[%s4638_s22] sm:$0x3]  ;;  %s3371_s22 = sshll.u32 %s3745_s21, 1 }
 0x21e   : > { %2687 = vperm.xlu1 %3488, %v4073_v18   ;;  %s2981_s2 = scalar_lea.hbm %s4592_s24, %s3371_s22 }
 0x21f   : > { %1211 = vxpose.xlu0.b32.cont [10/16] %v1195_v41, 128  ;;  %s2985_s28 = sshll.u32 %s2981_s2, 4  ;;  %s3545_s2 = scalar_lea.hbm %s4592_s24, 4  ;;  %s2986_s28 = int_to_ptr.hbm [resolvable:$true] %s2985_s28 }
 0x220   : > { %v1521_v55 = vpop.trf.xlu1 }
 0x221   : > { %v1753_v56 = vpack.c.bf16 %v1521_v55, %v1520_v51  ;;  %v3401_v55 = vld [vmem:[%s4582_s12] sm:$0xff] }
 0x222   : > { %v1171_v43 = vpop.f32.mrf.mxu2 }
 0x223   : > { %v1172_v44 = vadd.f32 %v4028_v7, %v1171_v43 }
 0x225   : > { %v1196_v45 = vmax.f32 %v1172_v44, 0.0 }
 0x226   : > { %2677 = vperm.xlu1 %3488, %v4079_v8  }
 0x227   : > { %1212 = vxpose.xlu0.b32.cont [11/16] %v1196_v45, 128 }
 0x228   : > { %v1522_v60 = vpop.trf.xlu1 }
 0x22a   : > { %v1173_v48 = vpop.f32.mrf.mxu2 }
 0x22b   : > { %v1174_v49 = vadd.f32 %v4028_v7, %v1173_v48 }
 0x22d   : > { %v1197_v50 = vmax.f32 %v1174_v49, 0.0 }
 0x22e   : > { %2667 = vperm.xlu1 %3488, %v4085_v10  }
 0x22f   : > { %1213 = vxpose.xlu0.b32.cont [12/16] %v1197_v50, 128 }
 0x230   : > { %v1523_v63 = vpop.trf.xlu1 }
 0x231   : > { %v1754_v24 = vpack.c.bf16 %v1523_v63, %v1522_v60 }
 0x232   : > { %v1176_v52 = vpop.f32.mrf.mxu2 }
 0x233   : > { %v1177_v53 = vadd.f32 %v4028_v7, %v1176_v52 }
 0x235   : > { %v1198_v54 = vmax.f32 %v1177_v53, 0.0 }
 0x236   : > { %1670 = vperm.xlu1 %3488, %v1658_v12  }
 0x237   : > { %1214 = vxpose.xlu0.b32.cont [13/16] %v1198_v54, 128  ;;  %v1542_v54 = vld [vmem:[%s4583_s13 + $0x20] sm:$0xff] }
 0x238   : > { %v1524_v3 = vpop.trf.xlu1  ;;  %1576 = vperm.xlu2 %3489, %v1542_v54   ;;  %v1883_v54 = vld [vmem:[%s3786_s7 + $0x98] sm:$0xff] }
 0x23a   : > { %v1178_v57 = vpop.f32.mrf.mxu2 }
 0x23b   : > { %v1179_v58 = vadd.f32 %v4028_v7, %v1178_v57  ;;  %v3403_v57 = vld [vmem:[%s4582_s12 + $0x10] sm:$0xff] }
 0x23d   : > { %v1199_v59 = vmax.f32 %v1179_v58, 0.0  ;;  %v3404_v58 = vld [vmem:[%s4582_s12 + $0x18] sm:$0xff] }
 0x23e   : > { %1765 = vperm.xlu1 %3488, %v1749_v20  }
 0x23f   : > { %1215 = vxpose.xlu0.b32.cont [14/16] %v1199_v59, 128 }
 0x240   : > { %v1525_v5 = vpop.trf.xlu1  ;;  %1581 = vperm.xlu2 %3489, %v4073_v18  }
 0x241   : > { %v1755_v21 = vpack.c.bf16 %v1525_v5, %v1524_v3 }
 0x242   : > { %v1181_v61 = vpop.f32.mrf.mxu2 }
 0x243   : > { %v1182_v62 = vadd.f32 %v4028_v7, %v1181_v61 }
 0x245   : > { %v1200_v36 = vmax.f32 %v1182_v62, 0.0 }
 0x246   : > { %2776 = vperm.xlu1 %3488, %v1658_v12  }
 0x247   : > { %1216 = vxpose.xlu0.b32.cont [15/16] %v1200_v36, 128 }
 0x248   : > { %v1526_v6 = vpop.trf.xlu1  ;;  %1571 = vperm.xlu2 %3489, %v4079_v8  }
 0x24a   : > { %v1183_v0 = vpop.f32.mrf.mxu2 }
 0x24b   : > { %v1184_v1 = vadd.f32 %v4028_v7, %v1183_v0 }
 0x24d   : > { %v1201_v2 = vmax.f32 %v1184_v1, 0.0  ;;  %v2342_v1 = vld [vmem:[%s3796_s3 + $0x80] sm:$0xff] }
 0x24e   : > { %2870 = vperm.xlu1 %3488, %v1749_v20  }
 0x24f   : > { %1217 = vxpose.xlu0.b32.end [16/16] %v1201_v2, 128  ;;  %v2343_v2 = vld [vmem:[%s3796_s3 + $0x88] sm:$0xff] }
 0x250   : > { %v1527_v7 = vpop.trf.xlu1  ;;  %1561 = vperm.xlu2 %3489, %v4085_v10   ;;  %v2358_v5 = vpack.c.bf16 %v2343_v2, %v2342_v1  ;;  %v2344_v10 = vld [vmem:[%s3796_s3 + $0x90] sm:$0xff]  ;;  %v1887_v1 = vld [vmem:[%s3786_s7 + $0xb8] sm:$0xff] }
 0x251   : > { %v1756_v16 = vpack.c.bf16 %v1527_v7, %v1526_v6 }
 0x252   : > { %3302 = vmatmul.msk.bf16.vlgmr.msra.gmra.mxu3 %vm1263_vm3, %v2358_v5  ;;  %v2356_v5 = vld [vmem:[%s3796_s3 + $0xf0] sm:$0xff] }
 0x256   : > { %1708 = vperm.xlu1 %3488, %v1699_v31  }
 0x258   : > { %v1528_v11 = vpop.trf.xlu1 }
 0x25e   : > { %1800 = vperm.xlu1 %3488, %v1791_v32  }
 0x260   : > { %v1529_v14 = vpop.trf.xlu1 }
 0x261   : > { %v1757_v15 = vpack.c.bf16 %v1529_v14, %v1528_v11  ;;  %v2345_v11 = vld [vmem:[%s3796_s3 + $0x98] sm:$0xff] }
 0x263   : > { %1774 = vmatpush.bf16.msrb.mxu2 %v1757_v15  ;;  %v2359_v15 = vpack.c.bf16 %v2345_v11, %v2344_v10  ;;  %v3433_v11 = vld [vmem:[%s4580_s10 + $0x38] sm:$0xff] }
 0x265   : > { %3303 = vmatmul.msk.bf16.gmra.mxu3 %vm1263_vm3, %v2359_v15  ;;  %v1890_v15 = vld [vmem:[%s3786_s7 + $0xd0] sm:$0xff] }
 0x267   : > { %1775 = vmatpush.bf16.msrb.mxu2 %v1756_v16 }
 0x26b   : > { %1776 = vmatpush.bf16.msrb.mxu2 %v1755_v21 }
 0x26f   : > { %1777 = vmatpush.bf16.msrb.mxu2 %v1754_v24 }
 0x273   : > { %1778 = vmatpush.bf16.msrb.mxu2 %v1753_v56  ;;  %v3402_v56 = vld [vmem:[%s4582_s12 + $0x8] sm:$0xff] }
 0x277   : > { %1779 = vmatpush.bf16.msrb.mxu2 %v1752_v47 }
 0x27b   : > { %v1218_v19 = vpop.trf.xlu0  ;;  %1780 = vmatpush.bf16.msrb.mxu2 %v1751_v38  ;;  %v2895_v38 = vld [vmem:[%s4590_s20] sm:$0xff] }
 0x27c   : > { %2900 = vperm.xlu1 %3488, %v2895_v38  }
 0x27f   : > { %1781 = vmatpush.bf16.msrb.mxu2 %v1750_v28 }
 0x282   : > { %1782 = vmatmul.bf16.vlgmr.msrb.gmra.mxu2 %v3406_v34 }
 0x283   : > { %v1219_v25 = vpop.trf.xlu0 }
 0x284   : > { %v1546_v26 = vpack.c.bf16 %v1219_v25, %v1218_v19  ;;  %1814 = vperm.xlu1 %3488, %v1792_v27   ;;  %v2347_v27 = vld [vmem:[%s3796_s3 + $0xa8] sm:$0xff] }
 0x28b   : > { %v1220_v29 = vpop.trf.xlu0 }
 0x28c   : > { %1840 = vperm.xlu1 %3488, %v768_v40  }
 0x292   : > { %v1577_v36 = vpop.permute.xlu2 %1576 }
 0x293   : > { %v1221_v30 = vpop.trf.xlu0 }
 0x294   : > { %v1547_v33 = vpack.c.bf16 %v1221_v30, %v1220_v29 }
 0x29a   : > { %v1582_v3 = vpop.permute.xlu2 %1581 }
 0x29b   : > { %v1222_v35 = vpop.trf.xlu0 }
 0x2a2   : > { %v1572_v6 = vpop.permute.xlu2 %1571 }
 0x2a3   : > { %v1223_v37 = vpop.trf.xlu0 }
 0x2a4   : > { %v1548_v39 = vpack.c.bf16 %v1223_v37, %v1222_v35 }
 0x2ab   : > { %v1224_v22 = vpop.trf.xlu0 }
 0x2b3   : > { %v1225_v28 = vpop.trf.xlu0 }
 0x2b4   : > { %v1549_v41 = vpack.c.bf16 %v1225_v28, %v1224_v22  ;;  %v2346_v22 = vld [vmem:[%s3796_s3 + $0xa0] sm:$0xff] }
 0x2bb   : > { %v1226_v42 = vpop.trf.xlu0 }
 0x2c3   : > { %v1227_v43 = vpop.trf.xlu0 }
 0x2c4   : > { %v1550_v53 = vpack.c.bf16 %v1227_v43, %v1226_v42  ;;  %v3409_v42 = vld [vmem:[%s4628_s27 + $0x10] sm:$0xff]  ;;  %v3408_v43 = vld [vmem:[%s4628_s27 + $0x8] sm:$0xff] }
 0x2cb   : > { %v1228_v44 = vpop.trf.xlu0 }
 0x2d3   : > { %v1229_v45 = vpop.trf.xlu0 }
 0x2d4   : > { %v1551_v52 = vpack.c.bf16 %v1229_v45, %v1228_v44  ;;  %v3407_v44 = vld [vmem:[%s4628_s27] sm:$0xff]  ;;  %v2348_v45 = vld [vmem:[%s3796_s3 + $0xb0] sm:$0xff] }
 0x2db   : > { %v1230_v46 = vpop.trf.xlu0 }
 0x2e3   : > { %v1231_v47 = vpop.trf.xlu0 }
 0x2e4   : > { %v1552_v51 = vpack.c.bf16 %v1231_v47, %v1230_v46  ;;  %v2349_v46 = vld [vmem:[%s3796_s3 + $0xb8] sm:$0xff]  ;;  %v1880_v47 = vld [vmem:[%s3786_s7 + $0x80] sm:$0xff] }
 0x2eb   : > { %v1232_v48 = vpop.trf.xlu0 }
 0x2f3   : > { %v1233_v49 = vpop.trf.xlu0 }
 0x2f4   : > { %v1553_v50 = vpack.c.bf16 %v1233_v49, %v1232_v48  ;;  %v1881_v48 = vld [vmem:[%s3786_s7 + $0x88] sm:$0xff]  ;;  %v2361_v49 = vpack.c.bf16 %v2349_v46, %v2348_v45 }
 0x2f6   : > { %1618 = vmatpush.bf16.msra.mxu0 %v1553_v50  ;;  %v1896_v50 = vpack.c.bf16 %v1881_v48, %v1880_v47 }
 0x2fa   : > { %1619 = vmatpush.bf16.msra.mxu0 %v1552_v51  ;;  %v2350_v51 = vld [vmem:[%s3796_s3 + $0xc0] sm:$0xff] }
 0x2fe   : > { %1620 = vmatpush.bf16.msra.mxu0 %v1551_v52  ;;  %v2351_v52 = vld [vmem:[%s3796_s3 + $0xc8] sm:$0xff] }
 0x302   : > { %1621 = vmatpush.bf16.msra.mxu0 %v1550_v53  ;;  %v1882_v53 = vld [vmem:[%s3786_s7 + $0x90] sm:$0xff] }
 0x306   : > { %1622 = vmatpush.bf16.msra.mxu0 %v1549_v41 }
 0x30a   : > { %1623 = vmatpush.bf16.msra.mxu0 %v1548_v39 }
 0x30e   : > { %1624 = vmatpush.bf16.msra.mxu0 %v1547_v33 }
 0x312   : > { %1625 = vmatpush.bf16.msra.mxu0 %v1546_v26  ;;  %v1562_v26 = vpop.permute.xlu2 %1561 }
 0x315   : > { %1626 = vmatmul.bf16.vlgmr.msra.gmra.mxu0 %v3401_v55  ;;  %v2362_v55 = vpack.c.bf16 %v2351_v52, %v2350_v51  ;;  %v4264_v52 = vld [vmem:[%s4633_s30] ss:$0 sm:$0xff] }
 0x325   : > { %1631 = vmatmul.bf16.gmra.mxu0 %v3402_v56  ;;  %v1897_v56 = vpack.c.bf16 %v1883_v54, %v1882_v53 }
 0x335   : > { %1636 = vmatmul.bf16.gmra.mxu0 %v3403_v57  ;;  %v2352_v57 = vld [vmem:[%s3796_s3 + $0xd0] sm:$0xff] }
 0x345   : > { %1641 = vmatmul.bf16.gmra.mxu0 %v3404_v58  ;;  %v2353_v58 = vld [vmem:[%s3796_s3 + $0xd8] sm:$0xff] }
 0x392   : > { %v1627_v59 = vpop.f32.mrf.mxu0 }
 0x393   : > { %v1628_v35 = vadd.f32 %v1627_v59, %v4041_v17  ;;  %v3405_v17 = vld [vmem:[%s4584_s14] sm:$0xff] }
 0x394   : > { %v1884_v59 = vld [vmem:[%s3786_s7 + $0xa0] sm:$0xff] }
 0x395   : > { %v1647_v28 = vmax.f32 %v1628_v35, 0.0  ;;  %v3413_v35 = vld [vmem:[%s4632_s5 + $0x18] sm:$0xff] }
 0x39a   : > { %v1629_v60 = vpop.f32.mrf.mxu0 }
 0x39b   : > { %v1630_v31 = vadd.f32 %v1629_v60, %v1562_v26  ;;  %v1885_v60 = vld [vmem:[%s3786_s7 + $0xa8] sm:$0xff] }
 0x39c   : > { %v3415_v26 = vld [vmem:[%s4632_s5 + $0x28] sm:$0xff] }
 0x39d   : > { %v1648_v38 = vmax.f32 %v1630_v31, 0.0  ;;  %v1892_v31 = vld [vmem:[%s3786_s7 + $0xe0] sm:$0xff] }
 0x39f   : > { %v1659_v41 = vpack.c.bf16 %v1648_v38, %v1647_v28  ;;  %v3412_v38 = vld [vmem:[%s4632_s5 + $0x10] sm:$0xff] }
 0x3a0   : > { %v1894_v28 = vld [vmem:[%s3786_s7 + $0xf0] sm:$0xff] }
 0x3a2   : > { %v1632_v61 = vpop.f32.mrf.mxu0 }
 0x3a3   : > { %v1633_v29 = vadd.f32 %v1632_v61, %v4038_v13  ;;  %v2360_v13 = vpack.c.bf16 %v2347_v27, %v2346_v22  ;;  %v2363_v61 = vpack.c.bf16 %v2353_v58, %v2352_v57  ;;  %v3411_v22 = vld [vmem:[%s4632_s5 + $0x8] sm:$0xff]  ;;  %v3410_v27 = vld [vmem:[%s4632_s5] sm:$0xff] }
 0x3a5   : > { %v1649_v32 = vmax.f32 %v1633_v29, 0.0  ;;  %3304 = vmatmul.msk.bf16.gmra.mxu3 %vm1263_vm3, %v2360_v13  ;;  %v3428_v29 = vld [vmem:[%s4580_s10 + $0x10] sm:$0xff]  ;;  %v1895_v13 = vld [vmem:[%s3786_s7 + $0xf8] sm:$0xff] }
 0x3aa   : > { %v1634_v62 = vpop.f32.mrf.mxu0 }
 0x3ab   : > { %v1635_v21 = vadd.f32 %v1634_v62, %v1572_v6  ;;  %v1898_v62 = vpack.c.bf16 %v1885_v60, %v1884_v59  ;;  %v1888_v6 = vld [vmem:[%s3786_s7 + $0xc0] sm:$0xff] }
 0x3ad   : > { %v1650_v33 = vmax.f32 %v1635_v21, 0.0 }
 0x3af   : > { %v1660_v39 = vpack.c.bf16 %v1650_v33, %v1649_v32  ;;  %v1893_v33 = vld [vmem:[%s3786_s7 + $0xe8] sm:$0xff]  ;;  %v3426_v32 = vld [vmem:[%s4580_s10] sm:$0xff] }
 0x3b2   : > { %v1637_v63 = vpop.f32.mrf.mxu0 }
 0x3b3   : > { %v1638_v16 = vadd.f32 %v1637_v63, %v1577_v36  ;;  %v2354_v36 = vld [vmem:[%s3796_s3 + $0xe0] sm:$0xff]  ;;  %v2355_v63 = vld [vmem:[%s3796_s3 + $0xe8] sm:$0xff] }
 0x3b4   : > { %v2364_v2 = vpack.c.bf16 %v2355_v63, %v2354_v36 }
 0x3b5   : > { %v1651_v30 = vmax.f32 %v1638_v16, 0.0  ;;  %3305 = vmatmul.msk.bf16.gmra.mxu3 %vm1263_vm3, %v2361_v49  ;;  %v1891_v16 = vld [vmem:[%s3786_s7 + $0xd8] sm:$0xff] }
 0x3b6   : > { %v1901_v21 = vpack.c.bf16 %v1891_v16, %v1890_v15 }
 0x3ba   : > { %v1639_v0 = vpop.f32.mrf.mxu0 }
 0x3bb   : > { %v1640_v12 = vadd.f32 %v1639_v0, %v1582_v3  ;;  %v1886_v0 = vld [vmem:[%s3786_s7 + $0xb0] sm:$0xff] }
 0x3bc   : > { %v1899_v3 = vpack.c.bf16 %v1887_v1, %v1886_v0 }
 0x3bd   : > { %v1652_v24 = vmax.f32 %v1640_v12, 0.0  ;;  %v3432_v12 = vld [vmem:[%s4580_s10 + $0x30] sm:$0xff] }
 0x3bf   : > { %v1661_v34 = vpack.c.bf16 %v1652_v24, %v1651_v30  ;;  %v3416_v24 = vld [vmem:[%s4632_s5 + $0x30] sm:$0xff]  ;;  %v3414_v30 = vld [vmem:[%s4632_s5 + $0x20] sm:$0xff] }
 0x3c2   : > { %v1642_v18 = vpop.f32.mrf.mxu0 }
 0x3c3   : > { %v1643_v8 = vadd.f32 %v1642_v18, %v4032_v4  ;;  %v1910_v4 = vld [vmem:[%s4628_s27 + $0x18] sm:$0x1] }
 0x3c4   : > { %v2357_v18 = vld [vmem:[%s3796_s3 + $0xf8] sm:$0xff]  ;;  %s3539_s3 = sshra.s32 %s2986_s28, 4  ;;  %s3540_s3 = int_to_ptr.hbm [resolvable:$true] %s3539_s3 }
 0x3c5   : > { %v1653_v19 = vmax.f32 %v1643_v8, 0.0  ;;  %3306 = vmatmul.msk.bf16.gmra.mxu3 %vm1263_vm3, %v2362_v55  ;;  %v1889_v8 = vld [vmem:[%s3786_s7 + $0xc8] sm:$0xff]  ;;  %s751_s7 = sand.u32 1, %s3579_s0   ;;  %s3541_s22 = scalar_lea.hbm %s3540_s3, 2 }
 0x3c6   : > { %v1900_v10 = vpack.c.bf16 %v1889_v8, %v1888_v6  ;;  %s3061_s1 = sshll.u32 %s751_s7, 1  ;;  %s2971_s21 = scalar_lea.sflag [#allocation6], %s751_s7 }
 0x3c7   : > { %s4505_s23 = scalar_lea.vmem [#allocation5], %s3061_s1  ;;  %p3542_p11 = scmp.ne.s32.totalorder %s3540_s3, %s3541_s22 }
 0x3c8   : > { %s2983_s1 = sshll.u32 %s4505_s23, 4  ;;  %p3546_p0 = scmp.lt.s32.totalorder %s3540_s3, %s4592_s24  ;;  %s2984_s1 = int_to_ptr.vmem [resolvable:$true] %s2983_s1 }
 0x3c9   : > { %p3543_p12 = pnand %p3542_p11, %p3762_p5  ;;  %p3547_p1 = scmp.lt.s32.totalorder %s3545_s2, %s3541_s22 }
 0x3ca   : > { %v1644_v7 = vpop.f32.mrf.mxu0 }
 0x3cb   : > { %v1645_v14 = vadd.f32 %v1644_v7, %v4035_v9  ;;  %v1928_v9 = vunpack.c.l.b16 %v1910_v4  ;;  %v2365_v7 = vpack.c.bf16 %v2357_v18, %v2356_v5  ;;  %v2407_v4 = vpop.f32.mrf.mxu3  ;;  %p3544_p13 = pneg %p3543_p12  ;;  %p3548_p2 = por %p3547_p1, %p3546_p0 }
 0x3cd   : > { %v1654_v20 = vmax.f32 %v1645_v14, 0.0  ;;  %v1932_v37 = vpack.c.b16 %v1928_v9, %v1928_v9  ;;  %v3431_v14 = vld [vmem:[%s4580_s10 + $0x28] sm:$0xff]  ;;  %p3549_p3 = pnand %p3548_p2, %p3544_p13 }
 0x3ce   : > { %v3427_v9 = vld [vmem:[%s4580_s10 + $0x8] sm:$0xff] }
 0x3cf   : > { %v1662_v25 = vpack.c.bf16 %v1654_v20, %v1653_v19  ;;  %v1961_v40 = vsel %vm851_vm0, %v1932_v37, 0  ;;  %v3417_v19 = vld [vmem:[%s4632_s5 + $0x38] sm:$0xff]  ;;  %v3430_v20 = vld [vmem:[%s4580_s10 + $0x20] sm:$0xff]  ;;  %v1902_v37 = vpack.c.bf16 %v1893_v33, %v1892_v31 }
 0x3d0   : > { %2104 = vmatpush.bf16.msra.mxu2 %v3417_v19 }
 0x3d1   : > { %1686 = vmatpush.bf16.msrb.mxu1 %v1662_v25  ;;  %v3429_v25 = vld [vmem:[%s4580_s10 + $0x18] sm:$0xff] }
 0x3d4   : > { %2105 = vmatpush.bf16.msra.mxu2 %v3416_v24 }
 0x3d5   : > { %1687 = vmatpush.bf16.msrb.mxu1 %v1661_v34  ;;  %3307 = vmatmul.msk.bf16.gmra.mxu3 %vm1263_vm3, %v2363_v61  ;;  %v2409_v34 = vpop.f32.mrf.mxu3 }
 0x3d8   : > { %2106 = vmatpush.bf16.msra.mxu2 %v3415_v26 }
 0x3d9   : > { %1688 = vmatpush.bf16.msrb.mxu1 %v1660_v39 }
 0x3dc   : > { %2107 = vmatpush.bf16.msra.mxu2 %v3414_v30 }
 0x3dd   : > { %1689 = vmatpush.bf16.msrb.mxu1 %v1659_v41  ;;  %v2412_v39 = vpop.f32.mrf.mxu3  ;;  %v1903_v41 = vpack.c.bf16 %v1895_v13, %v1894_v28 }
 0x3e0   : > { %3210 = vmatmul.msk.bf16.vlgmr.msrb.gmra.mxu1 %vm1678_vm4, %v3405_v17  ;;  %2108 = vmatpush.bf16.msra.mxu2 %v3413_v35 }
 0x3e1   : > { %1967 = vmatpush.bf16.msra.mxu1 %v1961_v40 }
 0x3e4   : > { %2109 = vmatpush.bf16.msra.mxu2 %v3412_v38 }
 0x3e5   : > { %1968 = vmatpush.bf16.msra.mxu1 %v3409_v42  ;;  %3308 = vmatmul.msk.bf16.gmra.mxu3 %vm1263_vm3, %v2364_v2  ;;  %v2414_v40 = vpop.f32.mrf.mxu3  ;;  %v4255_v42 = vld [vmem:[%s4634_s9] ss:$0 sm:$0xff] }
 0x3e6   : > { %v2410_v45 = vadd.f32 %v4255_v42, %v2409_v34  ;;  %v2413_v54 = vadd.f32 %v4255_v42, %v2412_v39  ;;  %v2415_v55 = vadd.f32 %v4255_v42, %v2414_v40 }
 0x3e8   : > { %2110 = vmatpush.bf16.msra.mxu2 %v3411_v22  ;;  %v2448_v48 = vmax.f32 %v2410_v45, 0.0  ;;  %v2449_v60 = vmax.f32 %v2413_v54, 0.0 }
 0x3e9   : > { %1969 = vmatpush.bf16.msra.mxu1 %v3408_v43 }
 0x3ec   : > { %2111 = vmatpush.bf16.msra.mxu2 %v3410_v27 }
 0x3ed   : > { %1970 = vmatpush.bf16.msra.mxu1 %v3407_v44  ;;  %v2408_v44 = vadd.f32 %v4255_v42, %v2407_v4 }
 0x3ef   : > { %v2447_v47 = vmax.f32 %v2408_v44, 0.0 }
 0x3f0   : > { %3230 = vmatmul.msk.bf16.vlgmr.msra.gmra.mxu1 %vm826_vm1, %v1896_v50 }
 0x3f1   : > { %2539 = vmatpush.bf16.msrb.mxu1 %v3433_v11  ;;  %v2463_v49 = vpack.c.bf16 %v2448_v48, %v2447_v47 }
 0x3f5   : > { %3309 = vmatmul.msk.bf16.gmra.mxu3 %vm1263_vm3, %v2365_v7  ;;  %2540 = vmatpush.bf16.msrb.mxu1 %v3432_v12 }
 0x3f9   : > { %2541 = vmatpush.bf16.msrb.mxu1 %v3431_v14 }
 0x3fd   : > { %2542 = vmatpush.bf16.msrb.mxu1 %v3430_v20 }
 0x400   : > { %3231 = vmatmul.msk.bf16.gmra.mxu1 %vm826_vm1, %v1897_v56 }
 0x401   : > { %2543 = vmatpush.bf16.msrb.mxu1 %v3429_v25 }
 0x405   : > { %2544 = vmatpush.bf16.msrb.mxu1 %v3428_v29 }
 0x409   : > { %2545 = vmatpush.bf16.msrb.mxu1 %v3427_v9 }
 0x40d   : > { %2546 = vmatpush.bf16.msrb.mxu1 %v3426_v32 }
 0x410   : > { %3232 = vmatmul.msk.bf16.gmra.mxu1 %vm826_vm1, %v1898_v62  ;;  %v2450_v62 = vmax.f32 %v2415_v55, 0.0 }
 0x412   : > { %v2464_v63 = vpack.c.bf16 %v2450_v62, %v2449_v60 }
 0x420   : > { %3233 = vmatmul.msk.bf16.gmra.mxu1 %vm826_vm1, %v1899_v3 }
 0x428   : > { %v2417_v43 = vpop.f32.mrf.mxu3 }
 0x429   : > { %v2418_v3 = vadd.f32 %v4255_v42, %v2417_v43 }
 0x42b   : > { %v2451_v7 = vmax.f32 %v2418_v3, 0.0 }
 0x430   : > { %3234 = vmatmul.msk.bf16.gmra.mxu1 %vm826_vm1, %v1900_v10  ;;  %v2419_v51 = vpop.f32.mrf.mxu3 }
 0x431   : > { %v2420_v5 = vadd.f32 %v4255_v42, %v2419_v51 }
 0x433   : > { %v2452_v11 = vmax.f32 %v2420_v5, 0.0 }
 0x435   : > { %v2465_v15 = vpack.c.bf16 %v2452_v11, %v2451_v7  ;;  %v3425_v11 = vld [vmem:[%s4635_s26 + $0x38] sm:$0xff] }
 0x436   : > { %2245 = vmatpush.bf16.msrb.mxu0 %v3425_v11 }
 0x438   : > { %v2422_v58 = vpop.f32.mrf.mxu3 }
 0x439   : > { %v2423_v20 = vadd.f32 %v4255_v42, %v2422_v58 }
 0x43b   : > { %v2453_v29 = vmax.f32 %v2423_v20, 0.0 }
 0x440   : > { %3235 = vmatmul.msk.bf16.gmra.mxu1 %vm826_vm1, %v1901_v21  ;;  %v2424_v1 = vpop.f32.mrf.mxu3 }
 0x441   : > { %v2425_v21 = vadd.f32 %v4255_v42, %v2424_v1 }
 0x443   : > { %v2454_v9 = vmax.f32 %v2425_v21, 0.0  ;;  %v3423_v21 = vld [vmem:[%s4635_s26 + $0x28] sm:$0xff] }
 0x445   : > { %v2466_v33 = vpack.c.bf16 %v2454_v9, %v2453_v29 }
 0x448   : > { %v2427_v14 = vpop.f32.mrf.mxu3 }
 0x450   : > { %3236 = vmatmul.msk.bf16.gmra.mxu1 %vm826_vm1, %v1902_v37  ;;  %v2429_v25 = vpop.f32.mrf.mxu3  ;;  %v2428_v37 = vadd.f32 %v4255_v42, %v2427_v14  ;;  %v3424_v14 = vld [vmem:[%s4635_s26 + $0x30] sm:$0xff] }
 0x451   : > { %v2430_v38 = vadd.f32 %v4255_v42, %v2429_v25  ;;  %2246 = vmatpush.bf16.msrb.mxu0 %v3424_v14 }
 0x452   : > { %v2455_v28 = vmax.f32 %v2428_v37, 0.0  ;;  %v3419_v37 = vld [vmem:[%s4635_s26 + $0x8] sm:$0xff] }
 0x453   : > { %v2456_v40 = vmax.f32 %v2430_v38, 0.0 }
 0x455   : > { %v2467_v44 = vpack.c.bf16 %v2456_v40, %v2455_v28  ;;  %2247 = vmatpush.bf16.msrb.mxu0 %v3423_v21  ;;  %v4325_v40 = vpop.f32.mrf.mxu2 }
 0x458   : > { %v2432_v35 = vpop.f32.mrf.mxu3 }
 0x45d   : > { %v4249_v17 = vpop.f32.mrf.mxu1 }
 0x460   : > { %3237 = vmatmul.msk.bf16.gmra.mxu1 %vm826_vm1, %v1903_v41  ;;  %v2434_v41 = vpop.f32.mrf.mxu3 }
 0x465   : > { %v4259_v46 = vpop.f32.mrf.mxu1 }
 0x468   : > { %v2437_v47 = vpop.f32.mrf.mxu3 }
 0x46d   : > { %v1972_v50 = vpop.f32.mrf.mxu1 }
 0x46e   : > { %v1973_v53 = vadd.f32 %v4264_v52, %v1972_v50  ;;  %v2435_v50 = vadd.f32 %v4255_v42, %v2434_v41 }
 0x470   : > { %2547 = vmatmul.bf16.vlgmr.msrb.gmra.mxu1 %v2463_v49  ;;  %v2012_v59 = vmax.f32 %v1973_v53, 0.0  ;;  %v2433_v49 = vadd.f32 %v4255_v42, %v2432_v35 }
 0x472   : > { %v2457_v55 = vmax.f32 %v2433_v49, 0.0 }
 0x475   : > { %v1974_v56 = vpop.f32.mrf.mxu1 }
 0x476   : > { %v1975_v57 = vadd.f32 %v4264_v52, %v1974_v56 }
 0x478   : > { %v2013_v61 = vmax.f32 %v1975_v57, 0.0  ;;  %v2458_v57 = vmax.f32 %v2435_v50, 0.0 }
 0x47a   : > { %v2028_v36 = vpack.c.bf16 %v2013_v61, %v2012_v59  ;;  %v2468_v59 = vpack.c.bf16 %v2458_v57, %v2457_v55  ;;  %v2439_v61 = vpop.f32.mrf.mxu3 }
 0x47c   : > { %2112 = vmatmul.bf16.vlgmr.msra.gmra.mxu2 %v2028_v36  ;;  %v2438_v36 = vadd.f32 %v4255_v42, %v2437_v47  ;;  %v4329_v47 = vpop.f32.mrf.mxu2 }
 0x47d   : > { %v1977_v0 = vpop.f32.mrf.mxu1 }
 0x47e   : > { %v1978_v2 = vadd.f32 %v4264_v52, %v1977_v0  ;;  %v2459_v5 = vmax.f32 %v2438_v36, 0.0 }
 0x480   : > { %2552 = vmatmul.bf16.gmra.mxu1 %v2464_v63  ;;  %v2014_v8 = vmax.f32 %v1978_v2, 0.0  ;;  %v2440_v63 = vadd.f32 %v4255_v42, %v2439_v61 }
 0x482   : > { %v2442_v2 = vpop.f32.mrf.mxu3 }
 0x485   : > { %v1979_v18 = vpop.f32.mrf.mxu1 }
 0x486   : > { %v1980_v6 = vadd.f32 %v4264_v52, %v1979_v18 }
 0x488   : > { %v2015_v10 = vmax.f32 %v1980_v6, 0.0  ;;  %v2460_v6 = vmax.f32 %v2440_v63, 0.0 }
 0x48a   : > { %v2029_v12 = vpack.c.bf16 %v2015_v10, %v2014_v8  ;;  %v2469_v7 = vpack.c.bf16 %v2460_v6, %v2459_v5 }
 0x48c   : > { %2117 = vmatmul.bf16.gmra.mxu2 %v2029_v12  ;;  %v2444_v12 = vpop.f32.mrf.mxu3 }
 0x48d   : > { %v1982_v16 = vpop.f32.mrf.mxu1 }
 0x48e   : > { %v1983_v19 = vadd.f32 %v4264_v52, %v1982_v16  ;;  %v2443_v16 = vadd.f32 %v4255_v42, %v2442_v2 }
 0x490   : > { %2557 = vmatmul.bf16.gmra.mxu1 %v2465_v15  ;;  %v2016_v26 = vmax.f32 %v1983_v19, 0.0  ;;  %v2445_v19 = vadd.f32 %v4255_v42, %v2444_v12 }
 0x492   : > { %v2462_v29 = vmax.f32 %v2445_v19, 0.0 }
 0x495   : > { %v1984_v24 = vpop.f32.mrf.mxu1 }
 0x496   : > { %v1985_v4 = vadd.f32 %v4264_v52, %v1984_v24 }
 0x498   : > { %v2017_v30 = vmax.f32 %v1985_v4, 0.0  ;;  %v2461_v4 = vmax.f32 %v2443_v16, 0.0 }
 0x49a   : > { %v2030_v31 = vpack.c.bf16 %v2017_v30, %v2016_v26  ;;  %v3422_v30 = vld [vmem:[%s4635_s26 + $0x20] sm:$0xff] }
 0x49b   : > { %2248 = vmatpush.bf16.msrb.mxu0 %v3422_v30 }
 0x49c   : > { %2122 = vmatmul.bf16.gmra.mxu2 %v2030_v31  ;;  %v2470_v31 = vpack.c.bf16 %v2462_v29, %v2461_v4 }
 0x49d   : > { %v1987_v34 = vpop.f32.mrf.mxu1 }
 0x49e   : > { %v1988_v32 = vadd.f32 %v4264_v52, %v1987_v34  ;;  %v3420_v34 = vld [vmem:[%s4635_s26 + $0x10] sm:$0xff] }
 0x4a0   : > { %2562 = vmatmul.bf16.gmra.mxu1 %v2466_v33  ;;  %v2018_v27 = vmax.f32 %v1988_v32, 0.0  ;;  %v3421_v33 = vld [vmem:[%s4635_s26 + $0x18] sm:$0xff] }
 0x4a1   : > { %2249 = vmatpush.bf16.msrb.mxu0 %v3421_v33 }
 0x4a5   : > { %v1989_v39 = vpop.f32.mrf.mxu1  ;;  %2250 = vmatpush.bf16.msrb.mxu0 %v3420_v34 }
 0x4a6   : > { %v1990_v22 = vadd.f32 %v4264_v52, %v1989_v39 }
 0x4a8   : > { %v2019_v13 = vmax.f32 %v1990_v22, 0.0 }
 0x4a9   : > { %2251 = vmatpush.bf16.msrb.mxu0 %v3419_v37 }
 0x4aa   : > { %v2031_v43 = vpack.c.bf16 %v2019_v13, %v2018_v27  ;;  %v3418_v27 = vld [vmem:[%s4635_s26] sm:$0xff] }
 0x4ab   : > { %v4323_v13 = vld [vmem:[%s4581_s11] ss:$0 sm:$0xff] }
 0x4ac   : > { %2127 = vmatmul.bf16.gmra.mxu2 %v2031_v43 }
 0x4ad   : > { %v1992_v45 = vpop.f32.mrf.mxu1  ;;  %2252 = vmatpush.bf16.msrb.mxu0 %v3418_v27 }
 0x4ae   : > { %v1993_v48 = vadd.f32 %v4264_v52, %v1992_v45 }
 0x4b0   : > { %2567 = vmatmul.bf16.gmra.mxu1 %v2467_v44  ;;  %v2020_v54 = vmax.f32 %v1993_v48, 0.0 }
 0x4b5   : > { %v1994_v51 = vpop.f32.mrf.mxu1 }
 0x4b6   : > { %v1995_v53 = vadd.f32 %v4264_v52, %v1994_v51 }
 0x4b8   : > { %v2021_v56 = vmax.f32 %v1995_v53, 0.0 }
 0x4ba   : > { %v2032_v58 = vpack.c.bf16 %v2021_v56, %v2020_v54  ;;  %v4335_v54 = vld [vmem:[%s4636_s25] ss:$0 sm:$0xff] }
 0x4bc   : > { %2132 = vmatmul.bf16.gmra.mxu2 %v2032_v58 }
 0x4bd   : > { %v1997_v60 = vpop.f32.mrf.mxu1 }
 0x4be   : > { %v1998_v62 = vadd.f32 %v4264_v52, %v1997_v60 }
 0x4c0   : > { %2572 = vmatmul.bf16.gmra.mxu1 %v2468_v59  ;;  %v2022_v3 = vmax.f32 %v1998_v62, 0.0 }
 0x4c5   : > { %v1999_v0 = vpop.f32.mrf.mxu1 }
 0x4c6   : > { %v2000_v1 = vadd.f32 %v4264_v52, %v1999_v0 }
 0x4c8   : > { %v2023_v18 = vmax.f32 %v2000_v1, 0.0 }
 0x4ca   : > { %v2033_v8 = vpack.c.bf16 %v2023_v18, %v2022_v3 }
 0x4cc   : > { %2137 = vmatmul.bf16.gmra.mxu2 %v2033_v8 }
 0x4cd   : > { %v2002_v10 = vpop.f32.mrf.mxu1 }
 0x4ce   : > { %v2003_v15 = vadd.f32 %v4264_v52, %v2002_v10 }
 0x4d0   : > { %2577 = vmatmul.bf16.gmra.mxu1 %v2469_v7  ;;  %v2024_v25 = vmax.f32 %v2003_v15, 0.0 }
 0x4d5   : > { %v2004_v20 = vpop.f32.mrf.mxu1 }
 0x4d6   : > { %v2005_v24 = vadd.f32 %v4264_v52, %v2004_v20 }
 0x4d8   : > { %v2025_v26 = vmax.f32 %v2005_v24, 0.0 }
 0x4da   : > { %v2034_v9 = vpack.c.bf16 %v2025_v26, %v2024_v25 }
 0x4dc   : > { %2142 = vmatmul.bf16.gmra.mxu2 %v2034_v9 }
 0x4dd   : > { %v2007_v42 = vpop.f32.mrf.mxu1 }
 0x4de   : > { %v2008_v35 = vadd.f32 %v4264_v52, %v2007_v42 }
 0x4e0   : > { %2582 = vmatmul.bf16.gmra.mxu1 %v2470_v31  ;;  %v2026_v39 = vmax.f32 %v2008_v35, 0.0 }
 0x4e5   : > { %v2009_v32 = vpop.f32.mrf.mxu1 }
 0x4e6   : > { %v2010_v38 = vadd.f32 %v4264_v52, %v2009_v32 }
 0x4e8   : > { %v2027_v22 = vmax.f32 %v2010_v38, 0.0 }
 0x4ea   : > { %v2035_v28 = vpack.c.bf16 %v2027_v22, %v2026_v39 }
 0x4ec   : > { %2147 = vmatmul.bf16.gmra.mxu2 %v2035_v28 }
 0x4ed   : > { %v2548_v41 = vpop.f32.mrf.mxu1 }
 0x4ee   : > { %v2549_v52 = vadd.f32 %v4323_v13, %v2548_v41 }
 0x4f0   : > { %v2588_v43 = vmax.f32 %v2549_v52, 0.0 }
 0x4f2   : > { %2604 = vxpose.xlu0.b32.start [1/16] %v2588_v43, 128 }
 0x4f5   : > { %v2550_v44 = vpop.f32.mrf.mxu1 }
 0x4f6   : > { %v2551_v45 = vadd.f32 %v4323_v13, %v2550_v44 }
 0x4f8   : > { %v2589_v48 = vmax.f32 %v2551_v45, 0.0 }
 0x4fa   : > { %2605 = vxpose.xlu0.b32.cont [2/16] %v2589_v48, 128 }
 0x4fd   : > { %v2553_v49 = vpop.f32.mrf.mxu1 }
 0x4fe   : > { %v2554_v50 = vadd.f32 %v4323_v13, %v2553_v49 }
 0x4ff   : > { %v2113_v51 = vpop.f32.mrf.mxu2 }
 0x500   : > { %v2590_v53 = vmax.f32 %v2554_v50, 0.0  ;;  %v2114_v56 = vadd.f32 %v4335_v54, %v2113_v51 }
 0x502   : > { %2606 = vxpose.xlu0.b32.cont [3/16] %v2590_v53, 128  ;;  %v2153_v61 = vmax.f32 %v2114_v56, 0.0 }
 0x505   : > { %v2555_v55 = vpop.f32.mrf.mxu1 }
 0x506   : > { %v2556_v57 = vadd.f32 %v4323_v13, %v2555_v55 }
 0x507   : > { %v2115_v58 = vpop.f32.mrf.mxu2 }
 0x508   : > { %v2591_v59 = vmax.f32 %v2556_v57, 0.0  ;;  %v2116_v60 = vadd.f32 %v4335_v54, %v2115_v58 }
 0x50a   : > { %v2154_v62 = vmax.f32 %v2116_v60, 0.0  ;;  %2607 = vxpose.xlu0.b32.cont [4/16] %v2591_v59, 128 }
 0x50c   : > { %v2169_v36 = vpack.c.bf16 %v2154_v62, %v2153_v61 }
 0x50d   : > { %v2558_v63 = vpop.f32.mrf.mxu1 }
 0x50e   : > { %v2559_v0 = vadd.f32 %v4323_v13, %v2558_v63  ;;  %2253 = vmatmul.bf16.vlgmr.msrb.gmra.mxu0 %v2169_v36 }
 0x50f   : > { %v2118_v1 = vpop.f32.mrf.mxu2 }
 0x510   : > { %v2592_v2 = vmax.f32 %v2559_v0, 0.0  ;;  %v2119_v5 = vadd.f32 %v4335_v54, %v2118_v1 }
 0x512   : > { %2608 = vxpose.xlu0.b32.cont [5/16] %v2592_v2, 128  ;;  %v2155_v10 = vmax.f32 %v2119_v5, 0.0 }
 0x515   : > { %v2560_v3 = vpop.f32.mrf.mxu1 }
 0x516   : > { %v2561_v18 = vadd.f32 %v4323_v13, %v2560_v3 }
 0x517   : > { %v2120_v6 = vpop.f32.mrf.mxu2 }
 0x518   : > { %v2593_v8 = vmax.f32 %v2561_v18, 0.0  ;;  %v2121_v7 = vadd.f32 %v4335_v54, %v2120_v6 }
 0x51a   : > { %v2156_v11 = vmax.f32 %v2121_v7, 0.0  ;;  %2609 = vxpose.xlu0.b32.cont [6/16] %v2593_v8, 128 }
 0x51c   : > { %v2170_v12 = vpack.c.bf16 %v2156_v11, %v2155_v10 }
 0x51d   : > { %v2563_v14 = vpop.f32.mrf.mxu1 }
 0x51e   : > { %v2564_v15 = vadd.f32 %v4323_v13, %v2563_v14  ;;  %2258 = vmatmul.bf16.gmra.mxu0 %v2170_v12 }
 0x51f   : > { %v2123_v16 = vpop.f32.mrf.mxu2 }
 0x520   : > { %v2594_v19 = vmax.f32 %v2564_v15, 0.0  ;;  %v2124_v21 = vadd.f32 %v4335_v54, %v2123_v16 }
 0x522   : > { %2610 = vxpose.xlu0.b32.cont [7/16] %v2594_v19, 128  ;;  %v2157_v29 = vmax.f32 %v2124_v21, 0.0 }
 0x525   : > { %v2565_v20 = vpop.f32.mrf.mxu1 }
 0x526   : > { %v2566_v24 = vadd.f32 %v4323_v13, %v2565_v20 }
 0x527   : > { %v2125_v25 = vpop.f32.mrf.mxu2 }
 0x528   : > { %v2595_v4 = vmax.f32 %v2566_v24, 0.0  ;;  %v2126_v26 = vadd.f32 %v4335_v54, %v2125_v25 }
 0x52a   : > { %v2158_v30 = vmax.f32 %v2126_v26, 0.0  ;;  %2611 = vxpose.xlu0.b32.cont [8/16] %v2595_v4, 128 }
 0x52c   : > { %v2171_v9 = vpack.c.bf16 %v2158_v30, %v2157_v29 }
 0x52d   : > { %v2568_v31 = vpop.f32.mrf.mxu1 }
 0x52e   : > { %v2569_v42 = vadd.f32 %v4323_v13, %v2568_v31  ;;  %2263 = vmatmul.bf16.gmra.mxu0 %v2171_v9 }
 0x52f   : > { %v2128_v33 = vpop.f32.mrf.mxu2 }
 0x530   : > { %v2596_v34 = vmax.f32 %v2569_v42, 0.0  ;;  %v2129_v32 = vadd.f32 %v4335_v54, %v2128_v33 }
 0x532   : > { %2612 = vxpose.xlu0.b32.cont [9/16] %v2596_v34, 128  ;;  %v2159_v27 = vmax.f32 %v2129_v32, 0.0 }
 0x535   : > { %v2570_v35 = vpop.f32.mrf.mxu1 }
 0x536   : > { %v2571_v37 = vadd.f32 %v4323_v13, %v2570_v35 }
 0x537   : > { %v2130_v38 = vpop.f32.mrf.mxu2 }
 0x538   : > { %v2597_v39 = vmax.f32 %v2571_v37, 0.0  ;;  %v2131_v22 = vadd.f32 %v4335_v54, %v2130_v38 }
 0x53a   : > { %v2160_v28 = vmax.f32 %v2131_v22, 0.0  ;;  %2613 = vxpose.xlu0.b32.cont [10/16] %v2597_v39, 128 }
 0x53c   : > { %v2172_v41 = vpack.c.bf16 %v2160_v28, %v2159_v27 }
 0x53d   : > { %v2573_v52 = vpop.f32.mrf.mxu1 }
 0x53e   : > { %v2574_v43 = vadd.f32 %v4323_v13, %v2573_v52  ;;  %2268 = vmatmul.bf16.gmra.mxu0 %v2172_v41 }
 0x53f   : > { %v2133_v44 = vpop.f32.mrf.mxu2 }
 0x540   : > { %v2598_v45 = vmax.f32 %v2574_v43, 0.0  ;;  %v2134_v49 = vadd.f32 %v4335_v54, %v2133_v44 }
 0x542   : > { %2614 = vxpose.xlu0.b32.cont [11/16] %v2598_v45, 128  ;;  %v2161_v56 = vmax.f32 %v2134_v49, 0.0 }
 0x545   : > { %v2575_v48 = vpop.f32.mrf.mxu1 }
 0x546   : > { %v2576_v50 = vadd.f32 %v4323_v13, %v2575_v48 }
 0x547   : > { %v2135_v51 = vpop.f32.mrf.mxu2 }
 0x548   : > { %v2599_v53 = vmax.f32 %v2576_v50, 0.0  ;;  %v2136_v55 = vadd.f32 %v4335_v54, %v2135_v51 }
 0x54a   : > { %v2162_v57 = vmax.f32 %v2136_v55, 0.0  ;;  %2615 = vxpose.xlu0.b32.cont [12/16] %v2599_v53, 128 }
 0x54c   : > { %v2173_v58 = vpack.c.bf16 %v2162_v57, %v2161_v56 }
 0x54d   : > { %v2578_v59 = vpop.f32.mrf.mxu1 }
 0x54e   : > { %v2579_v60 = vadd.f32 %v4323_v13, %v2578_v59  ;;  %2273 = vmatmul.bf16.gmra.mxu0 %v2173_v58 }
 0x54f   : > { %v2138_v61 = vpop.f32.mrf.mxu2 }
 0x550   : > { %v2600_v62 = vmax.f32 %v2579_v60, 0.0  ;;  %v2139_v63 = vadd.f32 %v4335_v54, %v2138_v61 }
 0x552   : > { %2616 = vxpose.xlu0.b32.cont [13/16] %v2600_v62, 128  ;;  %v2163_v5 = vmax.f32 %v2139_v63, 0.0 }
 0x555   : > { %v2580_v36 = vpop.f32.mrf.mxu1 }
 0x556   : > { %v2581_v0 = vadd.f32 %v4323_v13, %v2580_v36 }
 0x557   : > { %v2140_v1 = vpop.f32.mrf.mxu2 }
 0x558   : > { %v2601_v2 = vmax.f32 %v2581_v0, 0.0  ;;  %v2141_v3 = vadd.f32 %v4335_v54, %v2140_v1 }
 0x55a   : > { %v2164_v18 = vmax.f32 %v2141_v3, 0.0  ;;  %2617 = vxpose.xlu0.b32.cont [14/16] %v2601_v2, 128 }
 0x55c   : > { %v2174_v6 = vpack.c.bf16 %v2164_v18, %v2163_v5 }
 0x55d   : > { %v2583_v8 = vpop.f32.mrf.mxu1 }
 0x55e   : > { %v2584_v7 = vadd.f32 %v4323_v13, %v2583_v8  ;;  %2278 = vmatmul.bf16.gmra.mxu0 %v2174_v6 }
 0x55f   : > { %v2143_v10 = vpop.f32.mrf.mxu2 }
 0x560   : > { %v2602_v11 = vmax.f32 %v2584_v7, 0.0  ;;  %v2144_v14 = vadd.f32 %v4335_v54, %v2143_v10 }
 0x562   : > { %2618 = vxpose.xlu0.b32.cont [15/16] %v2602_v11, 128  ;;  %v2165_v21 = vmax.f32 %v2144_v14, 0.0 }
 0x565   : > { %v2585_v12 = vpop.f32.mrf.mxu1 }
 0x566   : > { %v2586_v15 = vadd.f32 %v4323_v13, %v2585_v12  ;;  %v4369_v13 = vld [vmem:[%s4637_s8] ss:$0 sm:$0xff] }
 0x567   : > { %v2145_v16 = vpop.f32.mrf.mxu2 }
 0x568   : > { %v2603_v19 = vmax.f32 %v2586_v15, 0.0  ;;  %v2146_v20 = vadd.f32 %v4335_v54, %v2145_v16 }
 0x56a   : > { %v2166_v24 = vmax.f32 %v2146_v20, 0.0  ;;  %2619 = vxpose.xlu0.b32.end [16/16] %v2603_v19, 128 }
 0x56c   : > { %v2175_v25 = vpack.c.bf16 %v2166_v24, %v2165_v21 }
 0x56e   : > { %2283 = vmatmul.bf16.gmra.mxu0 %v2175_v25 }
 0x56f   : > { %v2148_v4 = vpop.f32.mrf.mxu2 }
 0x570   : > { %v2149_v26 = vadd.f32 %v4335_v54, %v2148_v4 }
 0x572   : > { %v2167_v9 = vmax.f32 %v2149_v26, 0.0 }
 0x577   : > { %v2150_v29 = vpop.f32.mrf.mxu2 }
 0x578   : > { %v2151_v30 = vadd.f32 %v4335_v54, %v2150_v29 }
 0x57a   : > { %v2168_v31 = vmax.f32 %v2151_v30, 0.0 }
 0x57c   : > { %v2176_v42 = vpack.c.bf16 %v2168_v31, %v2167_v9 }
 0x57e   : > { %2288 = vmatmul.bf16.gmra.mxu0 %v2176_v42 }
 0x58b   : > { %v2254_v33 = vpop.f32.mrf.mxu0 }
 0x58c   : > { %v2255_v34 = vadd.f32 %v4369_v13, %v2254_v33 }
 0x58e   : > { %v2294_v35 = vmax.f32 %v2255_v34, 0.0 }
 0x590   : > { %2310 = vxpose.xlu2.b32.start [1/16] %v2294_v35, 128 }
 0x593   : > { %v2256_v32 = vpop.f32.mrf.mxu0 }
 0x594   : > { %v2257_v37 = vadd.f32 %v4369_v13, %v2256_v32 }
 0x596   : > { %v2295_v38 = vmax.f32 %v2257_v37, 0.0  ;;  %v4373_v39 = vpop.trf.xlu0 }
 0x598   : > { %2311 = vxpose.xlu2.b32.cont [2/16] %v2295_v38, 128 }
 0x59b   : > { %v2259_v54 = vpop.f32.mrf.mxu0 }
 0x59c   : > { %v2260_v22 = vadd.f32 %v4369_v13, %v2259_v54 }
 0x59e   : > { %v2296_v27 = vmax.f32 %v2260_v22, 0.0  ;;  %v4376_v28 = vpop.trf.xlu0 }
 0x59f   : > { %v2855_v41 = vpack.c.bf16 %v4376_v28, %v4373_v39  ;;  %v2650_v39 = vld [vmem:[%s4583_s13 + $0x30] sm:$0xff] }
 0x5a0   : > { %2312 = vxpose.xlu2.b32.cont [3/16] %v2296_v27, 128 }
 0x5a3   : > { %v2261_v52 = vpop.f32.mrf.mxu0 }
 0x5a4   : > { %v2262_v43 = vadd.f32 %v4369_v13, %v2261_v52 }
 0x5a6   : > { %v2297_v44 = vmax.f32 %v2262_v43, 0.0  ;;  %v4381_v45 = vpop.trf.xlu0 }
 0x5a8   : > { %2313 = vxpose.xlu2.b32.cont [4/16] %v2297_v44, 128 }
 0x5ab   : > { %v2264_v48 = vpop.f32.mrf.mxu0 }
 0x5ac   : > { %v2265_v49 = vadd.f32 %v4369_v13, %v2264_v48 }
 0x5ae   : > { %v2298_v50 = vmax.f32 %v2265_v49, 0.0  ;;  %v4384_v51 = vpop.trf.xlu0 }
 0x5af   : > { %v2856_v53 = vpack.c.bf16 %v4384_v51, %v4381_v45 }
 0x5b0   : > { %2314 = vxpose.xlu2.b32.cont [5/16] %v2298_v50, 128 }
 0x5b3   : > { %v2266_v55 = vpop.f32.mrf.mxu0 }
 0x5b4   : > { %v2267_v56 = vadd.f32 %v4369_v13, %v2266_v55 }
 0x5b6   : > { %v2299_v57 = vmax.f32 %v2267_v56, 0.0  ;;  %v4389_v58 = vpop.trf.xlu0 }
 0x5b8   : > { %2315 = vxpose.xlu2.b32.cont [6/16] %v2299_v57, 128 }
 0x5bb   : > { %v2269_v59 = vpop.f32.mrf.mxu0 }
 0x5bc   : > { %v2270_v60 = vadd.f32 %v4369_v13, %v2269_v59 }
 0x5be   : > { %v2300_v61 = vmax.f32 %v2270_v60, 0.0  ;;  %v2625_v62 = vpop.trf.xlu0 }
 0x5bf   : > { %v2857_v36 = vpack.c.bf16 %v2625_v62, %v4389_v58 }
 0x5c0   : > { %2316 = vxpose.xlu2.b32.cont [7/16] %v2300_v61, 128 }
 0x5c3   : > { %v2271_v63 = vpop.f32.mrf.mxu0 }
 0x5c4   : > { %v2272_v0 = vadd.f32 %v4369_v13, %v2271_v63  ;;  %v2646_v63 = vld [vmem:[%s4583_s13 + $0x10] sm:$0xff] }
 0x5c6   : > { %v2301_v1 = vmax.f32 %v2272_v0, 0.0  ;;  %v2626_v2 = vpop.trf.xlu0 }
 0x5c8   : > { %2317 = vxpose.xlu2.b32.cont [8/16] %v2301_v1, 128  ;;  %v1700_v1 = vld [vmem:[#allocation2] sm:$0x1] }
 0x5cb   : > { %v2274_v3 = vpop.f32.mrf.mxu0 }
 0x5cc   : > { %v2275_v5 = vadd.f32 %v4369_v13, %v2274_v3 }
 0x5ce   : > { %v2302_v18 = vmax.f32 %v2275_v5, 0.0  ;;  %v2627_v6 = vpop.trf.xlu0  ;;  %v1657_v5 = vld [vmem:[%s4585_s15] sm:$0xff] }
 0x5cf   : > { %v2858_v8 = vpack.c.bf16 %v2627_v6, %v2626_v2  ;;  %v2644_v2 = vld [vmem:[%s4583_s13] sm:$0xff] }
 0x5d0   : > { %2318 = vxpose.xlu2.b32.cont [9/16] %v2302_v18, 128  ;;  %v1748_v6 = vld [vmem:[%s4589_s19] sm:$0xff] }
 0x5d1   : > { %3490 = vset.pattern.permute.xlu0 %v3589_v23 }
 0x5d3   : > { %v2276_v7 = vpop.f32.mrf.mxu0 }
 0x5d4   : > { %v2277_v10 = vadd.f32 %v4369_v13, %v2276_v7  ;;  %v2897_v7 = vld [vmem:[#allocation3] sm:$0x1] }
 0x5d6   : > { %v2303_v11 = vmax.f32 %v2277_v10, 0.0  ;;  %v2628_v12 = vpop.trf.xlu0 }
 0x5d8   : > { %2319 = vxpose.xlu2.b32.cont [10/16] %v2303_v11, 128 }
 0x5db   : > { %v2279_v14 = vpop.f32.mrf.mxu0 }
 0x5dc   : > { %v2280_v15 = vadd.f32 %v4369_v13, %v2279_v14 }
 0x5de   : > { %v2304_v16 = vmax.f32 %v2280_v15, 0.0  ;;  %v2629_v19 = vpop.trf.xlu0  ;;  %v1698_v15 = vld [vmem:[%s4586_s16] sm:$0xff] }
 0x5df   : > { %v2859_v48 = vpack.c.bf16 %v2629_v19, %v2628_v12  ;;  %v4439_v19 = vpop.permute.xlu1 %2697 }
 0x5e0   : > { %2320 = vxpose.xlu2.b32.cont [11/16] %v2304_v16, 128 }
 0x5e3   : > { %v2281_v20 = vpop.f32.mrf.mxu0 }
 0x5e4   : > { %v2282_v21 = vadd.f32 %v4369_v13, %v2281_v20 }
 0x5e6   : > { %v2305_v24 = vmax.f32 %v2282_v21, 0.0  ;;  %v2630_v25 = vpop.trf.xlu0  ;;  %v1790_v21 = vld [vmem:[%s4590_s20] sm:$0xff] }
 0x5e8   : > { %2321 = vxpose.xlu2.b32.cont [12/16] %v2305_v24, 128  ;;  %v4444_v24 = vpop.permute.xlu1 %2687 }
 0x5eb   : > { %v2284_v4 = vpop.f32.mrf.mxu0 }
 0x5ec   : > { %v2285_v23 = vadd.f32 %v4369_v13, %v2284_v4 }
 0x5ee   : > { %v2306_v26 = vmax.f32 %v2285_v23, 0.0  ;;  %v2631_v29 = vpop.trf.xlu0  ;;  %v3434_v23 = vld [vmem:[%s4582_s12] sm:$0xff] }
 0x5ef   : > { %v2860_v44 = vpack.c.bf16 %v2631_v29, %v2630_v25  ;;  %v2896_v25 = vld [vmem:[%s4590_s20 + $0x8] sm:$0xff] }
 0x5f0   : > { %2322 = vxpose.xlu2.b32.cont [13/16] %v2306_v26, 128  ;;  %v4449_v4 = vpop.permute.xlu1 %2677  ;;  %v2805_v26 = vld [vmem:[#allocation2] sm:$0x1] }
 0x5f3   : > { %v2286_v30 = vpop.f32.mrf.mxu0 }
 0x5f4   : > { %v2287_v9 = vadd.f32 %v4369_v13, %v2286_v30 }
 0x5f6   : > { %v2307_v31 = vmax.f32 %v2287_v9, 0.0  ;;  %v2632_v42 = vpop.trf.xlu0  ;;  %v769_v9 = vld [vmem:[#allocation4] sm:$0x1] }
 0x5f8   : > { %2323 = vxpose.xlu2.b32.cont [14/16] %v2307_v31, 128  ;;  %v4454_v29 = vpop.permute.xlu1 %2667  ;;  %v3435_v31 = vld [vmem:[%s4582_s12 + $0x8] sm:$0xff] }
 0x5fb   : > { %v2289_v33 = vpop.f32.mrf.mxu0 }
 0x5fc   : > { %v2290_v34 = vadd.f32 %v4369_v13, %v2289_v33 }
 0x5fe   : > { %v2308_v35 = vmax.f32 %v2290_v34, 0.0  ;;  %v2633_v32 = vpop.trf.xlu0 }
 0x5ff   : > { %v2861_v43 = vpack.c.bf16 %v2633_v32, %v2632_v42  ;;  %v3436_v32 = vld [vmem:[%s4582_s12 + $0x10] sm:$0xff] }
 0x600   : > { %2324 = vxpose.xlu2.b32.cont [15/16] %v2308_v35, 128  ;;  %v1671_v42 = vpop.permute.xlu1 %1670 }
 0x603   : > { %v2291_v37 = vpop.f32.mrf.mxu0 }
 0x604   : > { %v2292_v38 = vadd.f32 %v4369_v13, %v2291_v37  ;;  %v3439_v13 = vld [vmem:[%s4588_s18] sm:$0xff] }
 0x606   : > { %v2309_v54 = vmax.f32 %v2292_v38, 0.0  ;;  %v2634_v22 = vpop.trf.xlu0 }
 0x608   : > { %2325 = vxpose.xlu2.b32.end [16/16] %v2309_v54, 128  ;;  %v1766_v35 = vpop.permute.xlu1 %1765 }
 0x60e   : > { %v2635_v27 = vpop.trf.xlu0 }
 0x60f   : > { %v2862_v52 = vpack.c.bf16 %v2635_v27, %v2634_v22  ;;  %v3437_v22 = vld [vmem:[%s4582_s12 + $0x18] sm:$0xff] }
 0x610   : > { %v4468_v38 = vpop.permute.xlu1 %2776 }
 0x611   : > { %2879 = vmatpush.bf16.msra.mxu0 %v2862_v52 }
 0x615   : > { %2880 = vmatpush.bf16.msra.mxu0 %v2861_v43 }
 0x618   : > { %v2871_v27 = vpop.permute.xlu1 %2870 }
 0x619   : > { %2881 = vmatpush.bf16.msra.mxu0 %v2860_v44 }
 0x61d   : > { %2882 = vmatpush.bf16.msra.mxu0 %v2859_v48 }
 0x620   : > { %v1709_v44 = vpop.permute.xlu1 %1708 }
 0x621   : > { %2883 = vmatpush.bf16.msra.mxu0 %v2858_v8 }
 0x625   : > { %2884 = vmatpush.bf16.msra.mxu0 %v2857_v36  ;;  %v2648_v36 = vld [vmem:[%s4583_s13 + $0x20] sm:$0xff] }
 0x626   : > { %2682 = vperm.xlu0 %3490, %v2648_v36  }
 0x629   : > { %2885 = vmatpush.bf16.msra.mxu0 %v2856_v53  ;;  %v4406_v49 = vpop.trf.xlu2 }
 0x62d   : > { %2886 = vmatpush.bf16.msra.mxu0 %v2855_v41  ;;  %v2804_v41 = vld [vmem:[%s4586_s16 + $0x8] sm:$0xff] }
 0x62e   : > { %2813 = vperm.xlu0 %3490, %v2804_v41  }
 0x630   : > { %2887 = vmatmul.bf16.vlgmr.msra.gmra.mxu0 %v3439_v13 }
 0x631   : > { %v2327_v50 = vpop.trf.xlu2 }
 0x632   : > { %v2652_v55 = vpack.c.bf16 %v2327_v50, %v4406_v49  ;;  %v1694_v49 = vadd.f32 %v4259_v46, %v1671_v42 }
 0x634   : > { %v1697_v50 = vmax.f32 %v1694_v49, 0.0 }
 0x636   : > { %1722 = vperm.xlu0 %3490, %v1700_v1  }
 0x639   : > { %v2328_v56 = vpop.trf.xlu2 }
 0x63e   : > { %2919 = vperm.xlu0 %3490, %v2897_v7  }
 0x641   : > { %v2329_v57 = vpop.trf.xlu2 }
 0x642   : > { %v2653_v58 = vpack.c.bf16 %v2329_v57, %v2328_v56 }
 0x649   : > { %v2330_v59 = vpop.trf.xlu2 }
 0x651   : > { %v2331_v45 = vpop.trf.xlu2 }
 0x652   : > { %v2654_v51 = vpack.c.bf16 %v2331_v45, %v2330_v59  ;;  %v1712_v59 = vmul.f32 %v1709_v44, %v1697_v50 }
 0x659   : > { %v2332_v53 = vpop.trf.xlu2 }
 0x661   : > { %v2333_v60 = vpop.trf.xlu2 }
 0x662   : > { %v2655_v61 = vpack.c.bf16 %v2333_v60, %v2332_v53 }
 0x669   : > { %v2334_v62 = vpop.trf.xlu2 }
 0x671   : > { %2692 = vperm.xlu2 %3489, %v2650_v39   ;;  %v2335_v28 = vpop.trf.xlu2 }
 0x672   : > { %v2656_v20 = vpack.c.bf16 %v2335_v28, %v2334_v62 }
 0x679   : > { %2672 = vperm.xlu2 %3489, %v2646_v63   ;;  %v2336_v0 = vpop.trf.xlu2 }
 0x681   : > { %2662 = vperm.xlu2 %3489, %v2644_v2   ;;  %v2337_v3 = vpop.trf.xlu2 }
 0x682   : > { %v2657_v16 = vpack.c.bf16 %v2337_v3, %v2336_v0 }
 0x689   : > { %1665 = vperm.xlu2 %3489, %v1657_v5   ;;  %v2338_v18 = vpop.trf.xlu2 }
 0x691   : > { %1760 = vperm.xlu2 %3489, %v1748_v6   ;;  %v2339_v8 = vpop.trf.xlu2 }
 0x692   : > { %v2658_v14 = vpack.c.bf16 %v2339_v8, %v2338_v18 }
 0x698   : > { %v4475_v43 = vpop.permute.xlu0 %2682 }
 0x699   : > { %2771 = vperm.xlu2 %3489, %v1657_v5   ;;  %v2340_v10 = vpop.trf.xlu2 }
 0x6a0   : > { %v4479_v57 = vpop.permute.xlu0 %2813 }
 0x6a1   : > { %2865 = vperm.xlu2 %3489, %v1748_v6   ;;  %v2341_v11 = vpop.trf.xlu2 }
 0x6a2   : > { %v2659_v12 = vpack.c.bf16 %v2341_v11, %v2340_v10 }
 0x6a4   : > { %2724 = vmatpush.bf16.msrb.mxu2 %v2659_v12 }
 0x6a8   : > { %2725 = vmatpush.bf16.msrb.mxu2 %v2658_v14  ;;  %v1723_v0 = vpop.permute.xlu0 %1722 }
 0x6a9   : > { %1703 = vperm.xlu2 %3489, %v1698_v15   ;;  %v1725_v18 = vperm.slane %v1723_v0, 0 }
 0x6ac   : > { %2726 = vmatpush.bf16.msrb.mxu2 %v2657_v16 }
 0x6ad   : > { %v2888_v36 = vpop.f32.mrf.mxu0 }
 0x6b0   : > { %2727 = vmatpush.bf16.msrb.mxu2 %v2656_v20 }
 0x6b1   : > { %1795 = vperm.xlu2 %3489, %v1790_v21  }
 0x6b4   : > { %2728 = vmatpush.bf16.msrb.mxu2 %v2655_v61 }
 0x6b8   : > { %2729 = vmatpush.bf16.msrb.mxu2 %v2654_v51  ;;  %v1801_v51 = vpop.permute.xlu1 %1800 }
 0x6b9   : > { %2808 = vperm.xlu2 %3489, %v1698_v15  }
 0x6bc   : > { %2730 = vmatpush.bf16.msrb.mxu2 %v2653_v58  ;;  %v1786_v58 = vadd.f32 %v4329_v47, %v1766_v35 }
 0x6be   : > { %v1789_v61 = vmax.f32 %v1786_v58, 0.0 }
 0x6c0   : > { %2731 = vmatpush.bf16.msrb.mxu2 %v2652_v55  ;;  %v2901_v3 = vpop.permute.xlu1 %2900 }
 0x6c1   : > { %2905 = vperm.xlu2 %3489, %v2896_v25  }
 0x6c3   : > { %2732 = vmatmul.bf16.vlgmr.msrb.gmra.mxu2 %v3434_v23 }
 0x6c8   : > { %v1815_v25 = vpop.permute.xlu1 %1814 }
 0x6c9   : > { %2827 = vperm.xlu2 %3489, %v2805_v26   ;;  %v1817_v23 = vperm.slane %v1815_v25, 0 }
 0x6cb   : > { %v4456_v30 = vpop.permute.xlu2 %2692 }
 0x6d1   : > { %1846 = vperm.xlu2 %3489, %v769_v9  }
 0x6d3   : > { %2737 = vmatmul.bf16.gmra.mxu2 %v3435_v31  ;;  %v4461_v33 = vpop.permute.xlu2 %2672 }
 0x6db   : > { %v4463_v34 = vpop.permute.xlu2 %2662 }
 0x6e3   : > { %2742 = vmatmul.bf16.gmra.mxu2 %v3436_v32  ;;  %v1666_v37 = vpop.permute.xlu2 %1665 }
 0x6e4   : > { %v1692_v13 = vadd.f32 %v4249_v17, %v1666_v37  ;;  %v1804_v17 = vmul.f32 %v1801_v51, %v1789_v61 }
 0x6e6   : > { %v1696_v55 = vmax.f32 %v1692_v13, 0.0 }
 0x6eb   : > { %v1761_v54 = vpop.permute.xlu2 %1760 }
 0x6ec   : > { %v1784_v53 = vadd.f32 %v4325_v40, %v1761_v54  ;;  %v2890_v40 = vpop.f32.mrf.mxu0 }
 0x6ed   : > { %v2891_v14 = vadd.f32 %v2890_v40, %v2871_v27 }
 0x6ee   : > { %v1788_v39 = vmax.f32 %v1784_v53, 0.0 }
 0x6ef   : > { %v2894_v26 = vmax.f32 %v2891_v14, 0.0 }
 0x6f3   : > { %2747 = vmatmul.bf16.gmra.mxu2 %v3437_v22  ;;  %v4473_v52 = vpop.permute.xlu2 %2771 }
 0x6fb   : > { %v2866_v48 = vpop.permute.xlu2 %2865 }
 0x6fc   : > { %v2889_v10 = vadd.f32 %v2888_v36, %v2866_v48 }
 0x6fe   : > { %v2893_v20 = vmax.f32 %v2889_v10, 0.0 }
 0x700   : > { %v2908_v42 = vmul.f32 %v2901_v3, %v2893_v20 }
 0x703   : > { %v1704_v56 = vpop.permute.xlu2 %1703 }
 0x704   : > { %v1711_v45 = vmul.f32 %v1704_v56, %v1696_v55 }
 0x706   : > { %v1713_v60 = vadd.f32 %v1712_v59, %v1711_v45 }
 0x708   : > { %v1714_v62 = vrot.slane %v1713_v60, 4 }
 0x70a   : > { %v1715_v46 = vadd.f32 %v1714_v62, %v1713_v60 }
 0x70b   : > { %v1796_v28 = vpop.permute.xlu2 %1795 }
 0x70c   : > { %v1716_v41 = vrot.slane %v1715_v46, 2  ;;  %v1803_v63 = vmul.f32 %v1796_v28, %v1788_v39 }
 0x70e   : > { %v1805_v1 = vadd.f32 %v1804_v17, %v1803_v63  ;;  %v1717_v2 = vadd.f32 %v1716_v41, %v1715_v46  ;;  %v4489_v41 = vpop.permute.xlu1 %1840 }
 0x710   : > { %v1806_v47 = vrot.slane %v1805_v1, 4  ;;  %v1718_v5 = vrot.slane %v1717_v2, 1 }
 0x712   : > { %v1807_v6 = vadd.f32 %v1806_v47, %v1805_v1  ;;  %v1719_v8 = vadd.f32 %v1718_v5, %v1717_v2 }
 0x713   : > { %v4483_v7 = vpop.permute.xlu2 %2808 }
 0x714   : > { %v1808_v11 = vrot.slane %v1807_v6, 2  ;;  %v1726_v12 = vadd.f32 %v1725_v18, %v1719_v8 }
 0x716   : > { %v1809_v15 = vadd.f32 %v1808_v11, %v1807_v6  ;;  %v3211_v16 = vmul.f32 -1.442695, %v1726_v12 }
 0x718   : > { %v1810_v21 = vrot.slane %v1809_v15, 1  ;;  %3501 = vpow2.f32 %v3211_v16 }
 0x71a   : > { %v1811_v9 = vadd.f32 %v1810_v21, %v1809_v15 }
 0x71b   : > { %v2906_v31 = vpop.permute.xlu2 %2905 }
 0x71c   : > { %v1818_v35 = vadd.f32 %v1817_v23, %v1811_v9  ;;  %v2909_v32 = vmul.f32 %v2906_v31, %v2894_v26  ;;  %v1875_v23 = vlaneseq }
 0x71e   : > { %v3502_v37 = vpop.eup %3501  ;;  %v3216_v54 = vmul.f32 -1.442695, %v1818_v35  ;;  %v4485_v22 = vadd.f32 %v2909_v32, %v2908_v42  ;;  %vm4501_vm0 = vcmp.lt.s32.totalorder %v1875_v23, 128 }
 0x71f   : > { %v1730_v44 = vadd.f32 1.0, %v3502_v37 }
 0x720   : > { %3503 = vpow2.f32 %v3216_v54 }
 0x721   : > { %3505 = vrcp.f32 %v1730_v44  ;;  %v1742_v51 = vand.u32 2147483648, %v1730_v44  ;;  %vm1736_vm6 = vweird.f32 %v1730_v44  ;;  %v1740_v53 = vand.u32 2147483647, %v1730_v44 }
 0x723   : > { %v4487_v56 = vpop.permute.xlu2 %2827  ;;  %v1743_v39 = vor.u32 1.1754944e-38, %v1742_v51  ;;  %vm1741_vm9 = vcmp.eq.f32.partialorder %v1740_v53, 8.507059e+37 }
 0x726   : > { %v3504_v27 = vpop.eup %3503 }
 0x727   : > { %v3506_v48 = vpop.eup %3505  ;;  %v1822_v49 = vadd.f32 1.0, %v3504_v27 }
 0x728   : > { %v1732_v13 = vmul.f32 %v3506_v48, %v1730_v44  ;;  %vm1737_vm5 = vweird.f32 %v3506_v48 }
 0x729   : > { %3507 = vrcp.f32 %v1822_v49  ;;  %vm1738_vm7 = vmor %vm1736_vm6, %vm1737_vm5  ;;  %v1834_v36 = vand.u32 2147483648, %v1822_v49  ;;  %v1832_v46 = vand.u32 2147483647, %v1822_v49  ;;  %vm1828_vm10 = vweird.f32 %v1822_v49 }
 0x72a   : > { %v1733_v50 = vsub.f32 1.0, %v1732_v13 }
 0x72b   : > { %v1835_v0 = vor.u32 1.1754944e-38, %v1834_v36  ;;  %v4491_v1 = vpop.permute.xlu2 %1846  ;;  %vm1833_vm12 = vcmp.eq.f32.partialorder %v1832_v46, 8.507059e+37 }
 0x72c   : > { %v1734_v55 = vmul.f32 %v3506_v48, %v1733_v50  ;;  %v1849_v5 = vperm.slane %v4491_v1, 0 }
 0x72e   : > { %v1735_v59 = vadd.f32 %v3506_v48, %v1734_v55 }
 0x72f   : > { %v3508_v58 = vpop.eup %3507 }
 0x730   : > { %v1824_v45 = vmul.f32 %v3508_v58, %v1822_v49  ;;  %v1739_v61 = vsel %vm1738_vm7, %v3506_v48, %v1735_v59  ;;  %vm1829_vm8 = vweird.f32 %v3508_v58 }
 0x731   : > { %v1744_v17 = vsel %vm1741_vm9, %v1743_v39, %v1739_v61  ;;  %vm1830_vm11 = vmor %vm1828_vm10, %vm1829_vm8 }
 0x732   : > { %v1825_v60 = vsub.f32 1.0, %v1824_v45  ;;  %v1843_v2 = vmul.f32 %v4489_v41, %v1744_v17 }
 0x734   : > { %v1826_v62 = vmul.f32 %v3508_v58, %v1825_v60  ;;  %v1850_v6 = vadd.f32 %v1849_v5, %v1843_v2  ;;  %v2920_v2 = vpop.permute.xlu0 %2919 }
 0x736   : > { %v1827_v28 = vadd.f32 %v3508_v58, %v1826_v62 }
 0x738   : > { %v1831_v63 = vsel %vm1830_vm11, %v3508_v58, %v1827_v28 }
 0x739   : > { %v1836_v3 = vsel %vm1833_vm12, %v1835_v0, %v1831_v63 }
 0x73a   : > { %v1851_v47 = vmul.f32 %v4489_v41, %v1836_v3 }
 0x73c   : > { %v1853_v18 = vrot.slane %v1851_v47, 1 }
 0x73e   : > { %v1855_v8 = vadd.f32 %v1853_v18, %v1850_v6  ;;  %v2922_v18 = vperm.slane %v2920_v2, 0 }
 0x740   : > { %v3217_v40 = vmul.f32 -1.442695, %v1855_v8 }
 0x742   : > { %3509 = vpow2.f32 %v3217_v40 }
 0x746   : > { %v2733_v10 = vpop.f32.mrf.mxu2 }
 0x748   : > { %v3510_v11 = vpop.eup %3509 }
 0x749   : > { %v1859_v12 = vadd.f32 1.0, %v3510_v11 }
 0x74b   : > { %3511 = vrcp.f32 %v1859_v12  ;;  %v1871_v25 = vand.u32 2147483648, %v1859_v12  ;;  %v1869_v9 = vand.u32 2147483647, %v1859_v12  ;;  %vm1865_vm14 = vweird.f32 %v1859_v12 }
 0x74d   : > { %v1872_v42 = vor.u32 1.1754944e-38, %v1871_v25  ;;  %vm1870_vm1 = vcmp.eq.f32.partialorder %v1869_v9, 8.507059e+37 }
 0x74e   : > { %v2735_v14 = vpop.f32.mrf.mxu2 }
 0x74f   : > { %v2736_v36 = vadd.f32 %v2735_v14, %v4454_v29  ;;  %v2911_v29 = vrot.slane %v4485_v22, 4 }
 0x751   : > { %v3512_v15 = vpop.eup %3511 }
 0x752   : > { %v1861_v16 = vmul.f32 %v3512_v15, %v1859_v12  ;;  %vm1866_vm13 = vweird.f32 %v3512_v15 }
 0x753   : > { %vm1867_vm15 = vmor %vm1865_vm14, %vm1866_vm13 }
 0x754   : > { %v1862_v20 = vsub.f32 1.0, %v1861_v16 }
 0x756   : > { %v2738_v21 = vpop.f32.mrf.mxu2  ;;  %v1863_v26 = vmul.f32 %v3512_v15, %v1862_v20 }
 0x757   : > { %v2739_v61 = vadd.f32 %v2738_v21, %v4461_v33  ;;  %v2912_v33 = vadd.f32 %v2911_v29, %v4485_v22 }
 0x758   : > { %v1864_v31 = vadd.f32 %v3512_v15, %v1863_v26 }
 0x759   : > { %v2755_v46 = vmax.f32 %v2739_v61, 0.0  ;;  %v2913_v63 = vrot.slane %v2912_v33, 2 }
 0x75a   : > { %v1868_v32 = vsel %vm1867_vm15, %v3512_v15, %v1864_v31 }
 0x75b   : > { %v1873_v37 = vsel %vm1870_vm1, %v1872_v42, %v1868_v32 }
 0x75c   : > { %1879 = vst.msk [vmem:[%s4505_s23] sm:$0x1] %vm4501_vm0, %v1873_v37 }
 0x75e   : > { %v2740_v54 = vpop.f32.mrf.mxu2 }
 0x75f   : > { %v2741_v51 = vadd.f32 %v2740_v54, %v4449_v4  ;;  %v3438_v4 = vld [vmem:[%s4584_s14] sm:$0xff] }
 0x766   : > { %v2743_v44 = vpop.f32.mrf.mxu2 }
 0x767   : > { %v2744_v58 = vadd.f32 %v2743_v44, %v4475_v43 }
 0x769   : > { %v2757_v62 = vmax.f32 %v2744_v58, 0.0 }
 0x76e   : > { %v2745_v27 = vpop.f32.mrf.mxu2 }
 0x76f   : > { %v2746_v50 = vadd.f32 %v2745_v27, %v4444_v24  ;;  %v2734_v24 = vadd.f32 %v2733_v10, %v4463_v34  ;;  %v2914_v34 = vadd.f32 %v2913_v63, %v2912_v33 }
 0x771   : > { %v2758_v53 = vmax.f32 %v2746_v50, 0.0  ;;  %v2753_v28 = vmax.f32 %v2734_v24, 0.0  ;;  %v2915_v0 = vrot.slane %v2914_v34, 1 }
 0x773   : > { %v2767_v39 = vpack.c.bf16 %v2758_v53, %v2757_v62  ;;  %v2916_v47 = vadd.f32 %v2915_v0, %v2914_v34 }
 0x775   : > { %v2923_v6 = vadd.f32 %v2922_v18, %v2916_v47 }
 0x776   : > { %v2748_v48 = vpop.f32.mrf.mxu2 }
 0x777   : > { %v2749_v49 = vadd.f32 %v2748_v48, %v4456_v30  ;;  %v2756_v30 = vmax.f32 %v2741_v51, 0.0  ;;  %v3368_v10 = vmul.f32 -1.442695, %v2923_v6 }
 0x779   : > { %v2759_v59 = vmax.f32 %v2749_v49, 0.0  ;;  %v2766_v43 = vpack.c.bf16 %v2756_v30, %v2755_v46  ;;  %3513 = vpow2.f32 %v3368_v10 }
 0x77e   : > { %v2750_v13 = vpop.f32.mrf.mxu2 }
 0x77f   : > { %v2751_v55 = vadd.f32 %v2750_v13, %v4439_v19  ;;  %v2754_v19 = vmax.f32 %v2736_v36, 0.0  ;;  %v3514_v21 = vpop.eup %3513 }
 0x780   : > { %v2927_v26 = vadd.f32 1.0, %v3514_v21 }
 0x781   : > { %v2760_v45 = vmax.f32 %v2751_v55, 0.0  ;;  %v2765_v17 = vpack.c.bf16 %v2754_v19, %v2753_v28 }
 0x782   : > { %3515 = vrcp.f32 %v2927_v26  ;;  %v2939_v13 = vand.u32 2147483648, %v2927_v26  ;;  %vm2933_vm3 = vweird.f32 %v2927_v26  ;;  %v2937_v50 = vand.u32 2147483647, %v2927_v26 }
 0x783   : > { %v2768_v60 = vpack.c.bf16 %v2760_v45, %v2759_v59 }
 0x784   : > { %v2940_v59 = vor.u32 1.1754944e-38, %v2939_v13  ;;  %vm2938_vm5 = vcmp.eq.f32.partialorder %v2937_v50, 8.507059e+37 }
 0x785   : > { %2791 = vmatpush.bf16.msra.mxu2 %v2768_v60 }
 0x788   : > { %v3516_v37 = vpop.eup %3515 }
 0x789   : > { %2792 = vmatpush.bf16.msra.mxu2 %v2767_v39  ;;  %v2929_v54 = vmul.f32 %v3516_v37, %v2927_v26  ;;  %vm2934_vm2 = vweird.f32 %v3516_v37 }
 0x78b   : > { %v2930_v44 = vsub.f32 1.0, %v2929_v54 }
 0x78d   : > { %2793 = vmatpush.bf16.msra.mxu2 %v2766_v43  ;;  %v2931_v27 = vmul.f32 %v3516_v37, %v2930_v44 }
 0x78f   : > { %v2932_v48 = vadd.f32 %v3516_v37, %v2931_v27 }
 0x791   : > { %2794 = vmatpush.bf16.msra.mxu2 %v2765_v17 }
 0x794   : > { %3362 = vmatmul.msk.bf16.vlgmr.msra.gmra.mxu2 %vm1678_vm4, %v3438_v4  ;;  %vm2935_vm4 = vmor %vm2933_vm3, %vm2934_vm2 }
 0x817   : > { %v2796_v3 = vpop.f32.mrf.mxu2 }
 0x818   : > { %v2797_v8 = vadd.f32 %v2796_v3, %v4473_v52  ;;  %v2830_v52 = vperm.slane %v4487_v56, 0  ;;  %v2936_v56 = vsel %vm2935_vm4, %v3516_v37, %v2932_v48 }
 0x819   : > { %v2941_v60 = vsel %vm2938_vm5, %v2940_v59, %v2936_v56 }
 0x81a   : > { %v2801_v11 = vmax.f32 %v2797_v8, 0.0  ;;  %v2945_v36 = vmul.f32 %v2941_v60, %v4489_v41 }
 0x81c   : > { %v2816_v15 = vmul.f32 %v4483_v7, %v2801_v11  ;;  %v2947_v46 = vrot.slane %v2945_v36, 1 }
 0x81f   : > { %v2798_v40 = vpop.f32.mrf.mxu2 }
 0x820   : > { %v2799_v12 = vadd.f32 %v2798_v40, %v4468_v38 }
 0x822   : > { %v2802_v14 = vmax.f32 %v2799_v12, 0.0 }
 0x824   : > { %v2817_v22 = vmul.f32 %v4479_v57, %v2802_v14 }
 0x826   : > { %v2818_v16 = vadd.f32 %v2817_v22, %v2816_v15 }
 0x828   : > { %v2819_v20 = vrot.slane %v2818_v16, 4 }
 0x82a   : > { %v2820_v25 = vadd.f32 %v2819_v20, %v2818_v16 }
 0x82c   : > { %v2821_v23 = vrot.slane %v2820_v25, 2 }
 0x82e   : > { %v2822_v9 = vadd.f32 %v2821_v23, %v2820_v25 }
 0x830   : > { %v2823_v31 = vrot.slane %v2822_v9, 1 }
 0x832   : > { %v2824_v42 = vadd.f32 %v2823_v31, %v2822_v9 }
 0x834   : > { %v2831_v32 = vadd.f32 %v2830_v52, %v2824_v42 }
 0x836   : > { %v3363_v38 = vmul.f32 -1.442695, %v2831_v32 }
 0x838   : > { %3517 = vpow2.f32 %v3363_v38 }
 0x83e   : > { %v3518_v7 = vpop.eup %3517 }
 0x83f   : > { %v2835_v57 = vadd.f32 1.0, %v3518_v7 }
 0x841   : > { %3519 = vrcp.f32 %v2835_v57  ;;  %v2847_v45 = vand.u32 2147483648, %v2835_v57  ;;  %v2845_v53 = vand.u32 2147483647, %v2835_v57  ;;  %vm2841_vm7 = vweird.f32 %v2835_v57 }
 0x843   : > { %v2848_v62 = vor.u32 1.1754944e-38, %v2847_v45  ;;  %vm2846_vm9 = vcmp.eq.f32.partialorder %v2845_v53, 8.507059e+37 }
 0x847   : > { %v3520_v49 = vpop.eup %3519 }
 0x848   : > { %v2837_v55 = vmul.f32 %v3520_v49, %v2835_v57  ;;  %vm2842_vm6 = vweird.f32 %v3520_v49 }
 0x849   : > { %vm2843_vm8 = vmor %vm2841_vm7, %vm2842_vm6 }
 0x84a   : > { %v2838_v58 = vsub.f32 1.0, %v2837_v55 }
 0x84c   : > { %v2839_v51 = vmul.f32 %v3520_v49, %v2838_v58 }
 0x84e   : > { %v2840_v61 = vadd.f32 %v3520_v49, %v2839_v51 }
 0x850   : > { %v2844_v30 = vsel %vm2843_vm8, %v3520_v49, %v2840_v61 }
 0x851   : > { %v2849_v39 = vsel %vm2846_vm9, %v2848_v62, %v2844_v30 }
 0x852   : > { %v2943_v24 = vmul.f32 %v2849_v39, %v4489_v41 }
 0x854   : > { %v2944_v19 = vadd.f32 %v2943_v24, %v1849_v5 }
 0x856   : > { %v2949_v43 = vadd.f32 %v2947_v46, %v2944_v19 }
 0x858   : > { %v3369_v28 = vmul.f32 -1.442695, %v2949_v43 }
 0x85a   : > { %3521 = vpow2.f32 %v3369_v28 }
 0x860   : > { %v3522_v17 = vpop.eup %3521 }
 0x861   : > { %v2953_v4 = vadd.f32 1.0, %v3522_v17 }
 0x863   : > { %3523 = vrcp.f32 %v2953_v4  ;;  %v2965_v41 = vand.u32 2147483648, %v2953_v4  ;;  %v2963_v5 = vand.u32 2147483647, %v2953_v4  ;;  %vm2959_vm11 = vweird.f32 %v2953_v4 }
 0x865   : > { %v2966_v0 = vor.u32 1.1754944e-38, %v2965_v41  ;;  %vm2964_vm13 = vcmp.eq.f32.partialorder %v2963_v5, 8.507059e+37 }
 0x869   : > { %v3524_v29 = vpop.eup %3523 }
 0x86a   : > { %v2955_v33 = vmul.f32 %v3524_v29, %v2953_v4  ;;  %vm2960_vm10 = vweird.f32 %v3524_v29 }
 0x86b   : > { %vm2961_vm12 = vmor %vm2959_vm11, %vm2960_vm10 }
 0x86c   : > { %v2956_v63 = vsub.f32 1.0, %v2955_v33 }
 0x86e   : > { %v2957_v1 = vmul.f32 %v3524_v29, %v2956_v63 }
 0x870   : > { %v2958_v34 = vadd.f32 %v3524_v29, %v2957_v1 }
 0x872   : > { %v2962_v2 = vsel %vm2961_vm12, %v3524_v29, %v2958_v34 }
 0x873   : > { %v2967_v3 = vsel %vm2964_vm13, %v2966_v0, %v2962_v2 }
 0x874   : > { %2969 = vst.msk [vmem:[%s4505_s23 + $0x1] sm:$0x1] %vm4501_vm0, %v2967_v3 }
 0x875   : > { %3552 = shalt.err (!%p3549_p3)
}
 0x876   : > { %3448 = dma.vmem_to_hbm [thread:$0]  (%p3762_p5), %s2984_s1, 32, %s2986_s28, %s2971_s21  }
 0x877 PF: > { %s4641_s7 = sld [smem:[#allocation8_spill]]  ;;  %p3454_p4 = scmp.ge.s32.totalorder %s3587_s17, 2 }
 0x879   : > { %p3451_p7 = pnand %p3454_p4, %p3766_p6 }
 0x87b   : > { %p3452_p8 = pneg %p3451_p7 }
 0x87d   : > { %s2997_s9 = sand.u32 1, %s4641_s7  }
 0x87e   : > { %s2998_s29 = scalar_lea.sflag [#allocation6], %s2997_s9 }
 0x87f   : > { %3570 = dma.done.wait (%p3452_p8), %s2998_s29, 32  }
 0x880   : > { %3572 = vsyncadd (%p3452_p8), %s2998_s29, 4294967264  ;;  %s4643_s17 = sld [smem:[#allocation10_spill]]  ;;  %s4646_s29 = smov %s3579_s0 }
 0x881   : > { %s4644_s5 = sld [smem:[#allocation9_spill]] }
 0x882   : > { %s4645_s7 = sld [smem:[#allocation11_spill]] }
 0x886   : > { %p40_p9 = scmp.ge.s32.totalorder %s4643_s17, 4  }
 0x887   : > { %s4647_s0 = smov %s4644_s5 }
 0x888   :  { %42 = sbr.rel (!%p40_p9) target bundleno = 15 (0xf), region = 154 }
 0x88d   :  { %3004 = vsyncpa [#allocation6], 1 }
 0x88e   :  { %3006 = vsyncpa [#allocation6 + $0x1], 1 }

</bundles_post_ra>
